<compile_context>
chip_gen: v6e
topology: v6e:2x2x1
jax: 0.10.0
libtpu: 0.0.40
codegen_flags: <defaults>
</compile_context>

<pallas_src>
import math
import functools

import jax
import jax.numpy as jnp
from jax.experimental import pallas as pl
from jax.experimental.pallas import tpu as pltpu

_LN_EPS = 1e-5  # PyTorch LayerNorm default


def _vmem_limit_bytes():
    """Generation-aware scoped-VMEM limit (3/4 of capacity, clamped)."""
    try:
        cap = int(pltpu.get_tpu_info().vmem_capacity_bytes)
    except Exception:
        cap = 64 * 1024 * 1024  # conservative fallback (v7x-sized)
    return max(32 * 1024 * 1024, min((cap * 3) // 4, 96 * 1024 * 1024))


_VMEM_LIMIT = _vmem_limit_bytes()


def _tile(dim, target):
    """TPU-friendly tile: `target` if it evenly divides `dim`, else the full dim."""
    return target if (dim > target and dim % target == 0) else dim


def _cparams(semantics):
    return pltpu.CompilerParams(dimension_semantics=semantics,
                                vmem_limit_bytes=_VMEM_LIMIT)


# ---------------------------------------------------------------------------
# Tiled linear:  (M, K) @ (K, N) + b   with optional fused scale / relu.
# Output block is k-resident and used directly as the f32 accumulator.
# ---------------------------------------------------------------------------
def _linear_kernel(x_ref, w_ref, b_ref, o_ref, *, scale, relu):
    @pl.when(pl.program_id(2) == 0)
    def _init():
        o_ref[...] = jnp.zeros_like(o_ref)

    o_ref[...] += jnp.dot(x_ref[...].astype(jnp.bfloat16), w_ref[...],
                          preferred_element_type=jnp.float32)

    @pl.when(pl.program_id(2) == pl.num_programs(2) - 1)
    def _finalize():
        y = o_ref[...] + b_ref[...]
        if scale is not None:
            y = y * scale
        if relu:
            y = jnp.maximum(y, 0.0)
        o_ref[...] = y


def linear(x2d, w, b, *, scale=None, relu=False, tm=512, tn=512, tk=1024):
    """x2d: (M, K) @ w(bf16): (K, N) + b: (N,) -> (M, N) f32; tiled + pipelined."""
    M, K = x2d.shape
    N = w.shape[1]
    tm, tn, tk = _tile(M, tm), _tile(N, tn), _tile(K, tk)
    kernel = functools.partial(_linear_kernel, scale=scale, relu=relu)
    return pl.pallas_call(
        kernel,
        out_shape=jax.ShapeDtypeStruct((M, N), jnp.float32),
        grid=(M // tm, N // tn, K // tk),
        in_specs=[
            pl.BlockSpec((tm, tk), lambda i, j, k: (i, k)),
            pl.BlockSpec((tk, tn), lambda i, j, k: (k, j)),
            pl.BlockSpec((1, tn), lambda i, j, k: (0, j)),
        ],
        out_specs=pl.BlockSpec((tm, tn), lambda i, j, k: (i, j)),
        compiler_params=_cparams(("parallel", "parallel", "arbitrary")),
    )(x2d, w, b.reshape(1, N))


# ---------------------------------------------------------------------------
# Standalone LayerNorm (encoder final norm) — f32 math.
# ---------------------------------------------------------------------------
def _ln_kernel(x_ref, g_ref, b_ref, o_ref, *, eps):
    x = x_ref[...]
    mu = jnp.mean(x, axis=-1, keepdims=True)
    var = jnp.mean((x - mu) ** 2, axis=-1, keepdims=True)
    o_ref[...] = (x - mu) * jax.lax.rsqrt(var + eps) * g_ref[...] + b_ref[...]


def layernorm(x2d, gamma, beta, *, tm=512):
    M, N = x2d.shape
    tm = _tile(M, tm)
    kernel = functools.partial(_ln_kernel, eps=_LN_EPS)
    return pl.pallas_call(
        kernel,
        out_shape=jax.ShapeDtypeStruct((M, N), jnp.float32),
        grid=(M // tm,),
        in_specs=[
            pl.BlockSpec((tm, N), lambda i: (i, 0)),
            pl.BlockSpec((1, N), lambda i: (0, 0)),
            pl.BlockSpec((1, N), lambda i: (0, 0)),
        ],
        out_specs=pl.BlockSpec((tm, N), lambda i: (i, 0)),
        compiler_params=_cparams(("parallel",)),
    )(x2d, gamma.reshape(1, N), beta.reshape(1, N))


# ---------------------------------------------------------------------------
# Fused FFN block:  LayerNorm(x + relu(x @ w1 + b1) @ w2 + b2)
# Hidden dim F is tiled along an "arbitrary" reduction axis: the (E,tf)/(tf,E)
# weight slabs are streamed, the (tm, tf) hidden tile never leaves VMEM, and the
# f32 output block is the resident accumulator.
# ---------------------------------------------------------------------------
def _ffn_kernel(x_ref, w1_ref, b1_ref, w2_ref, b2_ref, g_ref, be_ref, o_ref, *, eps):
    f = pl.program_id(1)

    @pl.when(f == 0)
    def _init():
        o_ref[...] = jnp.zeros_like(o_ref)

    x = x_ref[...]
    h = jnp.dot(x.astype(jnp.bfloat16), w1_ref[...],
                preferred_element_type=jnp.float32) + b1_ref[...]
    h = jnp.maximum(h, 0.0)
    o_ref[...] += jnp.dot(h.astype(jnp.bfloat16), w2_ref[...],
                          preferred_element_type=jnp.float32)

    @pl.when(f == pl.num_programs(1) - 1)
    def _finalize():
        y = x_ref[...] + o_ref[...] + b2_ref[...]        # residual + second bias
        mu = jnp.mean(y, axis=-1, keepdims=True)
        var = jnp.mean((y - mu) ** 2, axis=-1, keepdims=True)
        o_ref[...] = (y - mu) * jax.lax.rsqrt(var + eps) * g_ref[...] + be_ref[...]


def ffn_block(x2d, w1, b1, w2, b2, gamma, beta, *, tm=512, tf=512):
    M, E = x2d.shape
    F = w1.shape[1]
    tm, tf = _tile(M, tm), _tile(F, tf)
    kernel = functools.partial(_ffn_kernel, eps=_LN_EPS)
    return pl.pallas_call(
        kernel,
        out_shape=jax.ShapeDtypeStruct((M, E), jnp.float32),
        grid=(M // tm, F // tf),
        in_specs=[
            pl.BlockSpec((tm, E), lambda i, f: (i, 0)),
            pl.BlockSpec((E, tf), lambda i, f: (0, f)),
            pl.BlockSpec((1, tf), lambda i, f: (0, f)),
            pl.BlockSpec((tf, E), lambda i, f: (f, 0)),
            pl.BlockSpec((1, E), lambda i, f: (0, 0)),
            pl.BlockSpec((1, E), lambda i, f: (0, 0)),
            pl.BlockSpec((1, E), lambda i, f: (0, 0)),
        ],
        out_specs=pl.BlockSpec((tm, E), lambda i, f: (i, 0)),
        compiler_params=_cparams(("parallel", "arbitrary")),
    )(x2d, w1, b1.reshape(1, F), w2, b2.reshape(1, E),
      gamma.reshape(1, E), beta.reshape(1, E))


# ---------------------------------------------------------------------------
# Fused LayerNorm + linear (decoder final norm + fc_out), lane-dense padded N.
# ---------------------------------------------------------------------------
def _ln_linear_kernel(x_ref, g_ref, be_ref, w_ref, b_ref, o_ref, *, eps):
    x = x_ref[...]
    mu = jnp.mean(x, axis=-1, keepdims=True)
    var = jnp.mean((x - mu) ** 2, axis=-1, keepdims=True)
    xn = (x - mu) * jax.lax.rsqrt(var + eps) * g_ref[...] + be_ref[...]
    o_ref[...] = jnp.dot(xn.astype(jnp.bfloat16), w_ref[...],
                         preferred_element_type=jnp.float32) + b_ref[...]


def ln_linear(x2d, gamma, beta, w, b, *, tm=512):
    M, E = x2d.shape
    N = w.shape[1]
    n_pad = max(128, ((N + 127) // 128) * 128)       # lane-dense output stores
    if n_pad != N:
        w = jnp.pad(w, ((0, 0), (0, n_pad - N)))
        b = jnp.pad(b, (0, n_pad - N))
    tm = _tile(M, tm)
    kernel = functools.partial(_ln_linear_kernel, eps=_LN_EPS)
    out = pl.pallas_call(
        kernel,
        out_shape=jax.ShapeDtypeStruct((M, n_pad), jnp.float32),
        grid=(M // tm,),
        in_specs=[
            pl.BlockSpec((tm, E), lambda i: (i, 0)),
            pl.BlockSpec((1, E), lambda i: (0, 0)),
            pl.BlockSpec((1, E), lambda i: (0, 0)),
            pl.BlockSpec((E, n_pad), lambda i: (0, 0)),
            pl.BlockSpec((1, n_pad), lambda i: (0, 0)),
        ],
        out_specs=pl.BlockSpec((tm, n_pad), lambda i: (i, 0)),
        compiler_params=_cparams(("parallel",)),
    )(x2d, gamma.reshape(1, E), beta.reshape(1, E), w, b.reshape(1, n_pad))
    return out[:, :N]


# ---------------------------------------------------------------------------
# Fused multi-head attention block:
#   LayerNorm(x + out_proj(MHA(x, kv, kv)))
# One pallas_call, grid over (batch, query tiles).  K/V are computed from the
# full `kv` stream (passed separately even for self-attention so query tiling
# stays correct).  Per-head contexts are written into a VMEM scratch slab.
# ---------------------------------------------------------------------------
def _mha_kernel(x_ref, kv_ref, wq_ref, wk_ref, wv_ref, bq_ref, bk_ref, bv_ref,
                wo_ref, bo_ref, g_ref, be_ref, o_ref, ctx_ref,
                *, num_heads, sm_scale, eps):
    x = x_ref[...]                                    # (tq, E) f32
    kv = kv_ref[...]                                  # (Lk, E) f32
    E = x.shape[-1]
    Dh = E // num_heads

    xb = x.astype(jnp.bfloat16)
    kvb = kv.astype(jnp.bfloat16)
    q = jnp.dot(xb, wq_ref[...], preferred_element_type=jnp.float32) + bq_ref[...]
    k = jnp.dot(kvb, wk_ref[...], preferred_element_type=jnp.float32) + bk_ref[...]
    v = jnp.dot(kvb, wv_ref[...], preferred_element_type=jnp.float32) + bv_ref[...]

    for h in range(num_heads):                        # static unroll over heads
        sl = slice(h * Dh, (h + 1) * Dh)
        qh = q[:, sl].astype(jnp.bfloat16)
        kh = k[:, sl].astype(jnp.bfloat16)
        vh = v[:, sl].astype(jnp.bfloat16)
        # contract head_dim directly (no explicit K transpose)
        s = jax.lax.dot_general(qh, kh, (((1,), (1,)), ((), ())),
                                preferred_element_type=jnp.float32) * sm_scale
        m = jnp.max(s, axis=-1, keepdims=True)
        p = jnp.exp(s - m)
        p = p / jnp.sum(p, axis=-1, keepdims=True)    # exact division (f32)
        ctx_ref[:, sl] = jnp.dot(p.astype(jnp.bfloat16), vh,
                                 preferred_element_type=jnp.float32)

    ctx = ctx_ref[...].astype(jnp.bfloat16)           # (tq, E)
    attn_out = jnp.dot(ctx, wo_ref[...],
                       preferred_element_type=jnp.float32) + bo_ref[...]
    y = x + attn_out                                  # residual
    mu = jnp.mean(y, axis=-1, keepdims=True)
    var = jnp.mean((y - mu) ** 2, axis=-1, keepdims=True)
    o_ref[...] = (y - mu) * jax.lax.rsqrt(var + eps) * g_ref[...] + be_ref[...]


def mha_block(x, kv, p, ln_g, ln_b, *, num_heads, tq=256):
    """x: (B, Lq, E) query/residual stream; kv: (B, Lk, E) key/value stream."""
    B, Lq, E = x.shape
    Lk = kv.shape[1]
    tq = _tile(Lq, tq)
    Dh = E // num_heads
    sm_scale = 1.0 / math.sqrt(Dh)

    kernel = functools.partial(_mha_kernel, num_heads=num_heads,
                               sm_scale=sm_scale, eps=_LN_EPS)

    w_spec = pl.BlockSpec((E, E), lambda b, qi: (0, 0))
    r_spec = pl.BlockSpec((1, E), lambda b, qi: (0, 0))

    in_specs = [
        pl.BlockSpec((None, tq, E), lambda b, qi: (b, qi, 0)),   # query tile
        pl.BlockSpec((None, Lk, E), lambda b, qi: (b, 0, 0)),    # full K/V stream
        w_spec, w_spec, w_spec, r_spec, r_spec, r_spec,
        w_spec, r_spec, r_spec, r_spec,
    ]
    operands = [
        x, kv,
        p["wq"], p["wk"], p["wv"],
        p["bq"].reshape(1, E), p["bk"].reshape(1, E), p["bv"].reshape(1, E),
        p["wo"], p["bo"].reshape(1, E),
        ln_g.reshape(1, E), ln_b.reshape(1, E),
    ]

    return pl.pallas_call(
        kernel,
        out_shape=jax.ShapeDtypeStruct((B, Lq, E), jnp.float32),
        grid=(B, Lq // tq),
        in_specs=in_specs,
        out_specs=pl.BlockSpec((None, tq, E), lambda b, qi: (b, qi, 0)),
        scratch_shapes=[pltpu.VMEM((tq, E), jnp.float32)],
        compiler_params=_cparams(("parallel", "parallel")),
    )(*operands)


# ---------------------------------------------------------------------------
# Transformer built from the fused kernels
# ---------------------------------------------------------------------------
def encoder_layer(x, p, num_heads):
    B, S, E = x.shape
    x = mha_block(x, x, p["self_attn"], p["ln1_g"], p["ln1_b"], num_heads=num_heads)
    x = ffn_block(x.reshape(B * S, E), p["ff1_w"], p["ff1_b"], p["ff2_w"], p["ff2_b"],
                  p["ln2_g"], p["ln2_b"]).reshape(B, S, E)
    return x


def decoder_layer(x, memory, p, num_heads):
    B, T, E = x.shape
    x = mha_block(x, x, p["self_attn"], p["ln1_g"], p["ln1_b"], num_heads=num_heads)
    x = mha_block(x, memory, p["cross_attn"], p["ln2_g"], p["ln2_b"],
                  num_heads=num_heads)
    x = ffn_block(x.reshape(B * T, E), p["ff1_w"], p["ff1_b"], p["ff2_w"], p["ff2_b"],
                  p["ln3_g"], p["ln3_b"]).reshape(B, T, E)
    return x


def transformer_model_forward(params, src, tgt, *, num_heads):
    """src: (S, B, input_dim), tgt: (T, B, input_dim) -> (T, B, output_dim)."""
    E = params["emb_w"].shape[1]
    S, B, _ = src.shape
    T = tgt.shape[0]
    scale = math.sqrt(float(E))

    # batch-first internally so attention kernels grid over (B, Lq tiles) with
    # lane-dense (L, E) blocks and no transposes between pallas_calls.
    srcb = jnp.transpose(src, (1, 0, 2))
    tgtb = jnp.transpose(tgt, (1, 0, 2))
    Din = srcb.shape[-1]

    src_e = linear(srcb.reshape(B * S, Din), params["emb_w"], params["emb_b"],
                   scale=scale).reshape(B, S, E)
    tgt_e = linear(tgtb.reshape(B * T, Din), params["emb_w"], params["emb_b"],
                   scale=scale).reshape(B, T, E)

    # Encoder stack + final norm
    mem = src_e
    for lp in params["enc_layers"]:
        mem = encoder_layer(mem, lp, num_heads)
    mem = layernorm(mem.reshape(B * S, E), params["enc_norm_g"],
                    params["enc_norm_b"]).reshape(B, S, E)

    # Decoder stack
    out = tgt_e
    for lp in params["dec_layers"]:
        out = decoder_layer(out, mem, lp, num_heads)

    # fused decoder-final LayerNorm + fc_out (lane-dense padded output)
    Dout = params["fc_w"].shape[1]
    y = ln_linear(out.reshape(B * T, E), params["dec_norm_g"], params["dec_norm_b"],
                  params["fc_w"], params["fc_b"]).reshape(B, T, Dout)
    return jnp.transpose(y, (1, 0, 2))


# ---------------------------------------------------------------------------
# Deterministic parameter construction.
# Matmul weights stored pre-transposed as (K, N) in bf16; biases / LN in f32.
# ---------------------------------------------------------------------------
def init_params(key, input_dim, model_dim, num_heads, num_layers, output_dim, dim_ff):
    keys = iter(jax.random.split(key, 512))

    def rnd(shape, dtype=jnp.float32, s=0.02):
        return (s * jax.random.normal(next(keys), shape)).astype(dtype)

    bf16 = jnp.bfloat16

    def attn_params():
        return {
            "wq": rnd((model_dim, model_dim), bf16), "bq": rnd((model_dim,)),
            "wk": rnd((model_dim, model_dim), bf16), "bk": rnd((model_dim,)),
            "wv": rnd((model_dim, model_dim), bf16), "bv": rnd((model_dim,)),
            "wo": rnd((model_dim, model_dim), bf16), "bo": rnd((model_dim,)),
        }

    def enc_layer_params():
        return {
            "self_attn": attn_params(),
            "ff1_w": rnd((model_dim, dim_ff), bf16), "ff1_b": rnd((dim_ff,)),
            "ff2_w": rnd((dim_ff, model_dim), bf16), "ff2_b": rnd((model_dim,)),
            "ln1_g": jnp.ones((model_dim,), jnp.float32),
            "ln1_b": jnp.zeros((model_dim,), jnp.float32),
            "ln2_g": jnp.ones((model_dim,), jnp.float32),
            "ln2_b": jnp.zeros((model_dim,), jnp.float32),
        }

    def dec_layer_params():
        p = enc_layer_params()
        p["cross_attn"] = attn_params()
        p["ln3_g"] = jnp.ones((model_dim,), jnp.float32)
        p["ln3_b"] = jnp.zeros((model_dim,), jnp.float32)
        return p

    return {
        "emb_w": rnd((input_dim, model_dim), bf16), "emb_b": rnd((model_dim,)),
        "enc_layers": [enc_layer_params() for _ in range(num_layers)],
        "dec_layers": [dec_layer_params() for _ in range(num_layers)],
        "enc_norm_g": jnp.ones((model_dim,), jnp.float32),
        "enc_norm_b": jnp.zeros((model_dim,), jnp.float32),
        "dec_norm_g": jnp.ones((model_dim,), jnp.float32),
        "dec_norm_b": jnp.zeros((model_dim,), jnp.float32),
        "fc_w": rnd((model_dim, output_dim), bf16), "fc_b": rnd((output_dim,)),
    }


# ---------------------------------------------------------------------------
if __name__ == "__main__":
    input_dim, model_dim, num_heads, num_layers, output_dim = 16, 32, 4, 2, 8
    dim_feedforward = 2048  # fixed by the PyTorch module
    S, T, B = 8, 6, 2

    root = jax.random.PRNGKey(0)
    k_p, k_s, k_t = jax.random.split(root, 3)
    params = init_params(k_p, input_dim, model_dim, num_heads, num_layers,
                         output_dim, dim_feedforward)

    src = jax.random.normal(k_s, (S, B, input_dim), dtype=jnp.float32)
    tgt = jax.random.normal(k_t, (T, B, input_dim), dtype=jnp.float32)

    fwd = jax.jit(functools.partial(transformer_model_forward, num_heads=num_heads))
    out = fwd(params, src, tgt)
    out = jax.block_until_ready(out)

    assert out.shape == (T, B, output_dim), out.shape
    assert bool(jnp.all(jnp.isfinite(out)))
    print("KERNEL_OK")
</pallas_src>

<mosaic_0001>
module attributes {stable_mosaic.version = 11 : i64} {
  func.func @_mha_kernel(%arg0: i32, %arg1: i32, %arg2: memref<1x8x32xf32, #tpu.memory_space<vmem>>, %arg3: memref<1x8x32xf32, #tpu.memory_space<vmem>>, %arg4: memref<32x32xbf16, #tpu.memory_space<vmem>>, %arg5: memref<32x32xbf16, #tpu.memory_space<vmem>>, %arg6: memref<32x32xbf16, #tpu.memory_space<vmem>>, %arg7: memref<1x32xf32, #tpu.memory_space<vmem>>, %arg8: memref<1x32xf32, #tpu.memory_space<vmem>>, %arg9: memref<1x32xf32, #tpu.memory_space<vmem>>, %arg10: memref<32x32xbf16, #tpu.memory_space<vmem>>, %arg11: memref<1x32xf32, #tpu.memory_space<vmem>>, %arg12: memref<1x32xf32, #tpu.memory_space<vmem>>, %arg13: memref<1x32xf32, #tpu.memory_space<vmem>>, %arg14: memref<1x8x32xf32, #tpu.memory_space<vmem>>, %arg15: memref<8x32xf32, #tpu.memory_space<vmem>>) attributes {dimension_semantics = [#tpu.dimension_semantics<parallel>, #tpu.dimension_semantics<parallel>], iteration_bounds = array<i64: 2, 1>, scalar_prefetch = 0 : i64, scratch_operands = 1 : i64, tpu.core_type = #tpu.core_type<tc>, window_params = [{transform_indices = @transform_0, window_bounds = array<i64: 1, 8, 32>}, {transform_indices = @transform_1, window_bounds = array<i64: 1, 8, 32>}, {pipeline_mode = #tpu.pipeline_mode<synchronous>, transform_indices = @transform_2, window_bounds = array<i64: 32, 32>}, {pipeline_mode = #tpu.pipeline_mode<synchronous>, transform_indices = @transform_3, window_bounds = array<i64: 32, 32>}, {pipeline_mode = #tpu.pipeline_mode<synchronous>, transform_indices = @transform_4, window_bounds = array<i64: 32, 32>}, {pipeline_mode = #tpu.pipeline_mode<synchronous>, transform_indices = @transform_5, window_bounds = array<i64: 1, 32>}, {pipeline_mode = #tpu.pipeline_mode<synchronous>, transform_indices = @transform_6, window_bounds = array<i64: 1, 32>}, {pipeline_mode = #tpu.pipeline_mode<synchronous>, transform_indices = @transform_7, window_bounds = array<i64: 1, 32>}, {pipeline_mode = #tpu.pipeline_mode<synchronous>, transform_indices = @transform_8, window_bounds = array<i64: 32, 32>}, {pipeline_mode = #tpu.pipeline_mode<synchronous>, transform_indices = @transform_9, window_bounds = array<i64: 1, 32>}, {pipeline_mode = #tpu.pipeline_mode<synchronous>, transform_indices = @transform_10, window_bounds = array<i64: 1, 32>}, {pipeline_mode = #tpu.pipeline_mode<synchronous>, transform_indices = @transform_11, window_bounds = array<i64: 1, 32>}, {transform_indices = @transform_12, window_bounds = array<i64: 1, 8, 32>}]} {
    %c0 = arith.constant 0 : index
    %c0_0 = arith.constant 0 : index
    %c0_1 = arith.constant 0 : index
    %0 = vector.load %arg2[%c0, %c0_0, %c0_1] : memref<1x8x32xf32, #tpu.memory_space<vmem>>, vector<1x8x32xf32>
    %1 = vector.shape_cast %0 : vector<1x8x32xf32> to vector<8x32xf32>
    %c0_2 = arith.constant 0 : index
    %c0_3 = arith.constant 0 : index
    %c0_4 = arith.constant 0 : index
    %2 = vector.load %arg3[%c0_2, %c0_3, %c0_4] : memref<1x8x32xf32, #tpu.memory_space<vmem>>, vector<1x8x32xf32>
    %3 = vector.shape_cast %2 : vector<1x8x32xf32> to vector<8x32xf32>
    %4 = arith.truncf %1 : vector<8x32xf32> to vector<8x32xbf16>
    %5 = arith.truncf %3 : vector<8x32xf32> to vector<8x32xbf16>
    %c0_5 = arith.constant 0 : index
    %c0_6 = arith.constant 0 : index
    %6 = vector.load %arg4[%c0_5, %c0_6] : memref<32x32xbf16, #tpu.memory_space<vmem>>, vector<32x32xbf16>
    %cst = arith.constant dense<0.000000e+00> : vector<8x32xf32>
    %7 = tpu.matmul %4, %6, %cst {dimension_numbers = #tpu.dot_dimension_numbers<[1], [0], [0], [1], [0, 0, 1, 1], [], []>} : vector<8x32xbf16>, vector<32x32xbf16>, vector<8x32xf32> -> vector<8x32xf32>
    %c0_7 = arith.constant 0 : index
    %c0_8 = arith.constant 0 : index
    %8 = vector.load %arg7[%c0_7, %c0_8] : memref<1x32xf32, #tpu.memory_space<vmem>>, vector<1x32xf32>
    %9 = vector.broadcast %8 : vector<1x32xf32> to vector<8x32xf32>
    %10 = arith.addf %7, %9 : vector<8x32xf32>
    %c0_9 = arith.constant 0 : index
    %c0_10 = arith.constant 0 : index
    %11 = vector.load %arg5[%c0_9, %c0_10] : memref<32x32xbf16, #tpu.memory_space<vmem>>, vector<32x32xbf16>
    %cst_11 = arith.constant dense<0.000000e+00> : vector<8x32xf32>
    %12 = tpu.matmul %5, %11, %cst_11 {dimension_numbers = #tpu.dot_dimension_numbers<[1], [0], [0], [1], [0, 0, 1, 1], [], []>} : vector<8x32xbf16>, vector<32x32xbf16>, vector<8x32xf32> -> vector<8x32xf32>
    %c0_12 = arith.constant 0 : index
    %c0_13 = arith.constant 0 : index
    %13 = vector.load %arg8[%c0_12, %c0_13] : memref<1x32xf32, #tpu.memory_space<vmem>>, vector<1x32xf32>
    %14 = vector.broadcast %13 : vector<1x32xf32> to vector<8x32xf32>
    %15 = arith.addf %12, %14 : vector<8x32xf32>
    %c0_14 = arith.constant 0 : index
    %c0_15 = arith.constant 0 : index
    %16 = vector.load %arg6[%c0_14, %c0_15] : memref<32x32xbf16, #tpu.memory_space<vmem>>, vector<32x32xbf16>
    %cst_16 = arith.constant dense<0.000000e+00> : vector<8x32xf32>
    %17 = tpu.matmul %5, %16, %cst_16 {dimension_numbers = #tpu.dot_dimension_numbers<[1], [0], [0], [1], [0, 0, 1, 1], [], []>} : vector<8x32xbf16>, vector<32x32xbf16>, vector<8x32xf32> -> vector<8x32xf32>
    %c0_17 = arith.constant 0 : index
    %c0_18 = arith.constant 0 : index
    %18 = vector.load %arg9[%c0_17, %c0_18] : memref<1x32xf32, #tpu.memory_space<vmem>>, vector<1x32xf32>
    %19 = vector.broadcast %18 : vector<1x32xf32> to vector<8x32xf32>
    %20 = arith.addf %17, %19 : vector<8x32xf32>
    %21 = vector.extract_strided_slice %10 {offsets = [0, 0], sizes = [8, 8], strides = [1, 1]} : vector<8x32xf32> to vector<8x8xf32>
    %22 = arith.truncf %21 : vector<8x8xf32> to vector<8x8xbf16>
    %23 = vector.extract_strided_slice %15 {offsets = [0, 0], sizes = [8, 8], strides = [1, 1]} : vector<8x32xf32> to vector<8x8xf32>
    %24 = arith.truncf %23 : vector<8x8xf32> to vector<8x8xbf16>
    %25 = vector.extract_strided_slice %20 {offsets = [0, 0], sizes = [8, 8], strides = [1, 1]} : vector<8x32xf32> to vector<8x8xf32>
    %26 = arith.truncf %25 : vector<8x8xf32> to vector<8x8xbf16>
    %cst_19 = arith.constant dense<0.000000e+00> : vector<8x8xf32>
    %27 = tpu.matmul %22, %24, %cst_19 {dimension_numbers = #tpu.dot_dimension_numbers<[1], [1], [0], [0], [0, 0, 1, 0], [], []>} : vector<8x8xbf16>, vector<8x8xbf16>, vector<8x8xf32> -> vector<8x8xf32>
    %cst_20 = arith.constant 0.353553385 : f32
    %28 = vector.broadcast %cst_20 : f32 to vector<8x8xf32>
    %29 = arith.mulf %27, %28 : vector<8x8xf32>
    %cst_21 = arith.constant dense<0xFF800000> : vector<8xf32>
    %30 = vector.multi_reduction <maximumf>, %29, %cst_21 [1] : vector<8x8xf32> to vector<8xf32>
    %31 = vector.shape_cast %30 : vector<8xf32> to vector<8x1xf32>
    %32 = vector.broadcast %31 : vector<8x1xf32> to vector<8x8xf32>
    %33 = arith.subf %29, %32 : vector<8x8xf32>
    %34 = math.exp %33 : vector<8x8xf32>
    %cst_22 = arith.constant dense<0.000000e+00> : vector<8xf32>
    %35 = vector.multi_reduction <add>, %34, %cst_22 [1] : vector<8x8xf32> to vector<8xf32>
    %36 = vector.shape_cast %35 : vector<8xf32> to vector<8x1xf32>
    %37 = vector.broadcast %36 : vector<8x1xf32> to vector<8x8xf32>
    %38 = arith.divf %34, %37 : vector<8x8xf32>
    %39 = arith.truncf %38 : vector<8x8xf32> to vector<8x8xbf16>
    %cst_23 = arith.constant dense<0.000000e+00> : vector<8x8xf32>
    %40 = tpu.matmul %39, %26, %cst_23 {dimension_numbers = #tpu.dot_dimension_numbers<[1], [0], [0], [1], [0, 0, 1, 1], [], []>} : vector<8x8xbf16>, vector<8x8xbf16>, vector<8x8xf32> -> vector<8x8xf32>
    %c0_24 = arith.constant 0 : index
    %c0_25 = arith.constant 0 : index
    %41 = vector.load %arg15[%c0_24, %c0_25] : memref<8x32xf32, #tpu.memory_space<vmem>>, vector<8x8xf32>
    tpu.vector_store %arg15[%c0_24, %c0_25], %40 {strides = array<i32>} : memref<8x32xf32, #tpu.memory_space<vmem>>, vector<8x8xf32>,
    %42 = vector.extract_strided_slice %10 {offsets = [0, 8], sizes = [8, 8], strides = [1, 1]} : vector<8x32xf32> to vector<8x8xf32>
    %43 = arith.truncf %42 : vector<8x8xf32> to vector<8x8xbf16>
    %44 = vector.extract_strided_slice %15 {offsets = [0, 8], sizes = [8, 8], strides = [1, 1]} : vector<8x32xf32> to vector<8x8xf32>
    %45 = arith.truncf %44 : vector<8x8xf32> to vector<8x8xbf16>
    %46 = vector.extract_strided_slice %20 {offsets = [0, 8], sizes = [8, 8], strides = [1, 1]} : vector<8x32xf32> to vector<8x8xf32>
    %47 = arith.truncf %46 : vector<8x8xf32> to vector<8x8xbf16>
    %cst_26 = arith.constant dense<0.000000e+00> : vector<8x8xf32>
    %48 = tpu.matmul %43, %45, %cst_26 {dimension_numbers = #tpu.dot_dimension_numbers<[1], [1], [0], [0], [0, 0, 1, 0], [], []>} : vector<8x8xbf16>, vector<8x8xbf16>, vector<8x8xf32> -> vector<8x8xf32>
    %cst_27 = arith.constant 0.353553385 : f32
    %49 = vector.broadcast %cst_27 : f32 to vector<8x8xf32>
    %50 = arith.mulf %48, %49 : vector<8x8xf32>
    %cst_28 = arith.constant dense<0xFF800000> : vector<8xf32>
    %51 = vector.multi_reduction <maximumf>, %50, %cst_28 [1] : vector<8x8xf32> to vector<8xf32>
    %52 = vector.shape_cast %51 : vector<8xf32> to vector<8x1xf32>
    %53 = vector.broadcast %52 : vector<8x1xf32> to vector<8x8xf32>
    %54 = arith.subf %50, %53 : vector<8x8xf32>
    %55 = math.exp %54 : vector<8x8xf32>
    %cst_29 = arith.constant dense<0.000000e+00> : vector<8xf32>
    %56 = vector.multi_reduction <add>, %55, %cst_29 [1] : vector<8x8xf32> to vector<8xf32>
    %57 = vector.shape_cast %56 : vector<8xf32> to vector<8x1xf32>
    %58 = vector.broadcast %57 : vector<8x1xf32> to vector<8x8xf32>
    %59 = arith.divf %55, %58 : vector<8x8xf32>
    %60 = arith.truncf %59 : vector<8x8xf32> to vector<8x8xbf16>
    %cst_30 = arith.constant dense<0.000000e+00> : vector<8x8xf32>
    %61 = tpu.matmul %60, %47, %cst_30 {dimension_numbers = #tpu.dot_dimension_numbers<[1], [0], [0], [1], [0, 0, 1, 1], [], []>} : vector<8x8xbf16>, vector<8x8xbf16>, vector<8x8xf32> -> vector<8x8xf32>
    %c0_31 = arith.constant 0 : index
    %c8 = arith.constant 8 : index
    %62 = vector.load %arg15[%c0_31, %c8] : memref<8x32xf32, #tpu.memory_space<vmem>>, vector<8x8xf32>
    tpu.vector_store %arg15[%c0_31, %c8], %61 {strides = array<i32>} : memref<8x32xf32, #tpu.memory_space<vmem>>, vector<8x8xf32>,
    %63 = vector.extract_strided_slice %10 {offsets = [0, 16], sizes = [8, 8], strides = [1, 1]} : vector<8x32xf32> to vector<8x8xf32>
    %64 = arith.truncf %63 : vector<8x8xf32> to vector<8x8xbf16>
    %65 = vector.extract_strided_slice %15 {offsets = [0, 16], sizes = [8, 8], strides = [1, 1]} : vector<8x32xf32> to vector<8x8xf32>
    %66 = arith.truncf %65 : vector<8x8xf32> to vector<8x8xbf16>
    %67 = vector.extract_strided_slice %20 {offsets = [0, 16], sizes = [8, 8], strides = [1, 1]} : vector<8x32xf32> to vector<8x8xf32>
    %68 = arith.truncf %67 : vector<8x8xf32> to vector<8x8xbf16>
    %cst_32 = arith.constant dense<0.000000e+00> : vector<8x8xf32>
    %69 = tpu.matmul %64, %66, %cst_32 {dimension_numbers = #tpu.dot_dimension_numbers<[1], [1], [0], [0], [0, 0, 1, 0], [], []>} : vector<8x8xbf16>, vector<8x8xbf16>, vector<8x8xf32> -> vector<8x8xf32>
    %cst_33 = arith.constant 0.353553385 : f32
    %70 = vector.broadcast %cst_33 : f32 to vector<8x8xf32>
    %71 = arith.mulf %69, %70 : vector<8x8xf32>
    %cst_34 = arith.constant dense<0xFF800000> : vector<8xf32>
    %72 = vector.multi_reduction <maximumf>, %71, %cst_34 [1] : vector<8x8xf32> to vector<8xf32>
    %73 = vector.shape_cast %72 : vector<8xf32> to vector<8x1xf32>
    %74 = vector.broadcast %73 : vector<8x1xf32> to vector<8x8xf32>
    %75 = arith.subf %71, %74 : vector<8x8xf32>
    %76 = math.exp %75 : vector<8x8xf32>
    %cst_35 = arith.constant dense<0.000000e+00> : vector<8xf32>
    %77 = vector.multi_reduction <add>, %76, %cst_35 [1] : vector<8x8xf32> to vector<8xf32>
    %78 = vector.shape_cast %77 : vector<8xf32> to vector<8x1xf32>
    %79 = vector.broadcast %78 : vector<8x1xf32> to vector<8x8xf32>
    %80 = arith.divf %76, %79 : vector<8x8xf32>
    %81 = arith.truncf %80 : vector<8x8xf32> to vector<8x8xbf16>
    %cst_36 = arith.constant dense<0.000000e+00> : vector<8x8xf32>
    %82 = tpu.matmul %81, %68, %cst_36 {dimension_numbers = #tpu.dot_dimension_numbers<[1], [0], [0], [1], [0, 0, 1, 1], [], []>} : vector<8x8xbf16>, vector<8x8xbf16>, vector<8x8xf32> -> vector<8x8xf32>
    %c0_37 = arith.constant 0 : index
    %c16 = arith.constant 16 : index
    %83 = vector.load %arg15[%c0_37, %c16] : memref<8x32xf32, #tpu.memory_space<vmem>>, vector<8x8xf32>
    tpu.vector_store %arg15[%c0_37, %c16], %82 {strides = array<i32>} : memref<8x32xf32, #tpu.memory_space<vmem>>, vector<8x8xf32>,
    %84 = vector.extract_strided_slice %10 {offsets = [0, 24], sizes = [8, 8], strides = [1, 1]} : vector<8x32xf32> to vector<8x8xf32>
    %85 = arith.truncf %84 : vector<8x8xf32> to vector<8x8xbf16>
    %86 = vector.extract_strided_slice %15 {offsets = [0, 24], sizes = [8, 8], strides = [1, 1]} : vector<8x32xf32> to vector<8x8xf32>
    %87 = arith.truncf %86 : vector<8x8xf32> to vector<8x8xbf16>
    %88 = vector.extract_strided_slice %20 {offsets = [0, 24], sizes = [8, 8], strides = [1, 1]} : vector<8x32xf32> to vector<8x8xf32>
    %89 = arith.truncf %88 : vector<8x8xf32> to vector<8x8xbf16>
    %cst_38 = arith.constant dense<0.000000e+00> : vector<8x8xf32>
    %90 = tpu.matmul %85, %87, %cst_38 {dimension_numbers = #tpu.dot_dimension_numbers<[1], [1], [0], [0], [0, 0, 1, 0], [], []>} : vector<8x8xbf16>, vector<8x8xbf16>, vector<8x8xf32> -> vector<8x8xf32>
    %cst_39 = arith.constant 0.353553385 : f32
    %91 = vector.broadcast %cst_39 : f32 to vector<8x8xf32>
    %92 = arith.mulf %90, %91 : vector<8x8xf32>
    %cst_40 = arith.constant dense<0xFF800000> : vector<8xf32>
    %93 = vector.multi_reduction <maximumf>, %92, %cst_40 [1] : vector<8x8xf32> to vector<8xf32>
    %94 = vector.shape_cast %93 : vector<8xf32> to vector<8x1xf32>
    %95 = vector.broadcast %94 : vector<8x1xf32> to vector<8x8xf32>
    %96 = arith.subf %92, %95 : vector<8x8xf32>
    %97 = math.exp %96 : vector<8x8xf32>
    %cst_41 = arith.constant dense<0.000000e+00> : vector<8xf32>
    %98 = vector.multi_reduction <add>, %97, %cst_41 [1] : vector<8x8xf32> to vector<8xf32>
    %99 = vector.shape_cast %98 : vector<8xf32> to vector<8x1xf32>
    %100 = vector.broadcast %99 : vector<8x1xf32> to vector<8x8xf32>
    %101 = arith.divf %97, %100 : vector<8x8xf32>
    %102 = arith.truncf %101 : vector<8x8xf32> to vector<8x8xbf16>
    %cst_42 = arith.constant dense<0.000000e+00> : vector<8x8xf32>
    %103 = tpu.matmul %102, %89, %cst_42 {dimension_numbers = #tpu.dot_dimension_numbers<[1], [0], [0], [1], [0, 0, 1, 1], [], []>} : vector<8x8xbf16>, vector<8x8xbf16>, vector<8x8xf32> -> vector<8x8xf32>
    %c0_43 = arith.constant 0 : index
    %c24 = arith.constant 24 : index
    %104 = vector.load %arg15[%c0_43, %c24] : memref<8x32xf32, #tpu.memory_space<vmem>>, vector<8x8xf32>
    tpu.vector_store %arg15[%c0_43, %c24], %103 {strides = array<i32>} : memref<8x32xf32, #tpu.memory_space<vmem>>, vector<8x8xf32>,
    %c0_44 = arith.constant 0 : index
    %c0_45 = arith.constant 0 : index
    %105 = vector.load %arg15[%c0_44, %c0_45] : memref<8x32xf32, #tpu.memory_space<vmem>>, vector<8x32xf32>
    %106 = arith.truncf %105 : vector<8x32xf32> to vector<8x32xbf16>
    %c0_46 = arith.constant 0 : index
    %c0_47 = arith.constant 0 : index
    %107 = vector.load %arg10[%c0_46, %c0_47] : memref<32x32xbf16, #tpu.memory_space<vmem>>, vector<32x32xbf16>
    %cst_48 = arith.constant dense<0.000000e+00> : vector<8x32xf32>
    %108 = tpu.matmul %106, %107, %cst_48 {dimension_numbers = #tpu.dot_dimension_numbers<[1], [0], [0], [1], [0, 0, 1, 1], [], []>} : vector<8x32xbf16>, vector<32x32xbf16>, vector<8x32xf32> -> vector<8x32xf32>
    %c0_49 = arith.constant 0 : index
    %c0_50 = arith.constant 0 : index
    %109 = vector.load %arg11[%c0_49, %c0_50] : memref<1x32xf32, #tpu.memory_space<vmem>>, vector<1x32xf32>
    %110 = vector.broadcast %109 : vector<1x32xf32> to vector<8x32xf32>
    %111 = arith.addf %108, %110 : vector<8x32xf32>
    %112 = arith.addf %1, %111 : vector<8x32xf32>
    %cst_51 = arith.constant dense<0.000000e+00> : vector<8xf32>
    %113 = vector.multi_reduction <add>, %112, %cst_51 [1] : vector<8x32xf32> to vector<8xf32>
    %114 = vector.shape_cast %113 : vector<8xf32> to vector<8x1xf32>
    %cst_52 = arith.constant 3.200000e+01 : f32
    %115 = vector.broadcast %cst_52 : f32 to vector<8x1xf32>
    %116 = arith.divf %114, %115 : vector<8x1xf32>
    %117 = vector.broadcast %116 : vector<8x1xf32> to vector<8x32xf32>
    %118 = arith.subf %112, %117 : vector<8x32xf32>
    %119 = arith.mulf %118, %118 : vector<8x32xf32>
    %cst_53 = arith.constant dense<0.000000e+00> : vector<8xf32>
    %120 = vector.multi_reduction <add>, %119, %cst_53 [1] : vector<8x32xf32> to vector<8xf32>
    %121 = vector.shape_cast %120 : vector<8xf32> to vector<8x1xf32>
    %cst_54 = arith.constant 3.200000e+01 : f32
    %122 = vector.broadcast %cst_54 : f32 to vector<8x1xf32>
    %123 = arith.divf %121, %122 : vector<8x1xf32>
    %124 = vector.broadcast %116 : vector<8x1xf32> to vector<8x32xf32>
    %125 = arith.subf %112, %124 : vector<8x32xf32>
    %cst_55 = arith.constant 9.99999974E-6 : f32
    %126 = vector.broadcast %cst_55 : f32 to vector<8x1xf32>
    %127 = arith.addf %123, %126 : vector<8x1xf32>
    %128 = math.rsqrt %127 : vector<8x1xf32>
    %129 = vector.broadcast %128 : vector<8x1xf32> to vector<8x32xf32>
    %130 = arith.mulf %125, %129 : vector<8x32xf32>
    %c0_56 = arith.constant 0 : index
    %c0_57 = arith.constant 0 : index
    %131 = vector.load %arg12[%c0_56, %c0_57] : memref<1x32xf32, #tpu.memory_space<vmem>>, vector<1x32xf32>
    %132 = vector.broadcast %131 : vector<1x32xf32> to vector<8x32xf32>
    %133 = arith.mulf %130, %132 : vector<8x32xf32>
    %c0_58 = arith.constant 0 : index
    %c0_59 = arith.constant 0 : index
    %134 = vector.load %arg13[%c0_58, %c0_59] : memref<1x32xf32, #tpu.memory_space<vmem>>, vector<1x32xf32>
    %135 = vector.broadcast %134 : vector<1x32xf32> to vector<8x32xf32>
    %136 = arith.addf %133, %135 : vector<8x32xf32>
    %c0_60 = arith.constant 0 : index
    %c0_61 = arith.constant 0 : index
    %c0_62 = arith.constant 0 : index
    %137 = vector.load %arg14[%c0_60, %c0_61, %c0_62] : memref<1x8x32xf32, #tpu.memory_space<vmem>>, vector<1x8x32xf32>
    %138 = vector.shape_cast %137 : vector<1x8x32xf32> to vector<8x32xf32>
    %139 = vector.shape_cast %136 : vector<8x32xf32> to vector<1x8x32xf32>
    tpu.vector_store %arg14[%c0_60, %c0_61, %c0_62], %139 {strides = array<i32>} : memref<1x8x32xf32, #tpu.memory_space<vmem>>, vector<1x8x32xf32>,
    return
  }
  func.func @transform_0(%arg0: i32, %arg1: i32) -> (i32, i32, i32) {
    %c0_i32 = arith.constant 0 : i32
    %c0_i32_0 = arith.constant 0 : i32
    return %arg0, %arg1, %c0_i32 : i32, i32, i32
  }
  func.func @transform_1(%arg0: i32, %arg1: i32) -> (i32, i32, i32) {
    %c0_i32 = arith.constant 0 : i32
    %c0_i32_0 = arith.constant 0 : i32
    %c0_i32_1 = arith.constant 0 : i32
    return %arg0, %c0_i32, %c0_i32_0 : i32, i32, i32
  }
  func.func @transform_2(%arg0: i32, %arg1: i32) -> (i32, i32) {
    %c0_i32 = arith.constant 0 : i32
    %c0_i32_0 = arith.constant 0 : i32
    %c0_i32_1 = arith.constant 0 : i32
    return %c0_i32, %c0_i32_0 : i32, i32
  }
  func.func @transform_3(%arg0: i32, %arg1: i32) -> (i32, i32) {
    %c0_i32 = arith.constant 0 : i32
    %c0_i32_0 = arith.constant 0 : i32
    %c0_i32_1 = arith.constant 0 : i32
    return %c0_i32, %c0_i32_0 : i32, i32
  }
  func.func @transform_4(%arg0: i32, %arg1: i32) -> (i32, i32) {
    %c0_i32 = arith.constant 0 : i32
    %c0_i32_0 = arith.constant 0 : i32
    %c0_i32_1 = arith.constant 0 : i32
    return %c0_i32, %c0_i32_0 : i32, i32
  }
  func.func @transform_5(%arg0: i32, %arg1: i32) -> (i32, i32) {
    %c0_i32 = arith.constant 0 : i32
    %c0_i32_0 = arith.constant 0 : i32
    %c0_i32_1 = arith.constant 0 : i32
    return %c0_i32, %c0_i32_0 : i32, i32
  }
  func.func @transform_6(%arg0: i32, %arg1: i32) -> (i32, i32) {
    %c0_i32 = arith.constant 0 : i32
    %c0_i32_0 = arith.constant 0 : i32
    %c0_i32_1 = arith.constant 0 : i32
    return %c0_i32, %c0_i32_0 : i32, i32
  }
  func.func @transform_7(%arg0: i32, %arg1: i32) -> (i32, i32) {
    %c0_i32 = arith.constant 0 : i32
    %c0_i32_0 = arith.constant 0 : i32
    %c0_i32_1 = arith.constant 0 : i32
    return %c0_i32, %c0_i32_0 : i32, i32
  }
  func.func @transform_8(%arg0: i32, %arg1: i32) -> (i32, i32) {
    %c0_i32 = arith.constant 0 : i32
    %c0_i32_0 = arith.constant 0 : i32
    %c0_i32_1 = arith.constant 0 : i32
    return %c0_i32, %c0_i32_0 : i32, i32
  }
  func.func @transform_9(%arg0: i32, %arg1: i32) -> (i32, i32) {
    %c0_i32 = arith.constant 0 : i32
    %c0_i32_0 = arith.constant 0 : i32
    %c0_i32_1 = arith.constant 0 : i32
    return %c0_i32, %c0_i32_0 : i32, i32
  }
  func.func @transform_10(%arg0: i32, %arg1: i32) -> (i32, i32) {
    %c0_i32 = arith.constant 0 : i32
    %c0_i32_0 = arith.constant 0 : i32
    %c0_i32_1 = arith.constant 0 : i32
    return %c0_i32, %c0_i32_0 : i32, i32
  }
  func.func @transform_11(%arg0: i32, %arg1: i32) -> (i32, i32) {
    %c0_i32 = arith.constant 0 : i32
    %c0_i32_0 = arith.constant 0 : i32
    %c0_i32_1 = arith.constant 0 : i32
    return %c0_i32, %c0_i32_0 : i32, i32
  }
  func.func @transform_12(%arg0: i32, %arg1: i32) -> (i32, i32, i32) {
    %c0_i32 = arith.constant 0 : i32
    %c0_i32_0 = arith.constant 0 : i32
    return %arg0, %arg1, %c0_i32 : i32, i32, i32
  }
}

module attributes {stable_mosaic.version = 11 : i64} {
  func.func @_linear_kernel(%arg0: i32, %arg1: i32, %arg2: i32, %arg3: memref<16x16xf32, #tpu.memory_space<vmem>>, %arg4: memref<16x32xbf16, #tpu.memory_space<vmem>>, %arg5: memref<1x32xf32, #tpu.memory_space<vmem>>, %arg6: memref<16x32xf32, #tpu.memory_space<vmem>>) attributes {dimension_semantics = [#tpu.dimension_semantics<parallel>, #tpu.dimension_semantics<parallel>, #tpu.dimension_semantics<arbitrary>], iteration_bounds = array<i64: 1, 1, 1>, scalar_prefetch = 0 : i64, scratch_operands = 0 : i64, tpu.core_type = #tpu.core_type<tc>, window_params = [{transform_indices = @transform_0, window_bounds = array<i64: 16, 16>}, {transform_indices = @transform_1, window_bounds = array<i64: 16, 32>}, {transform_indices = @transform_2, window_bounds = array<i64: 1, 32>}, {transform_indices = @transform_3, window_bounds = array<i64: 16, 32>}]} {
    %c0_i32 = arith.constant 0 : i32
    %0 = arith.cmpi eq, %arg2, %c0_i32 : i32
    %1 = arith.extui %0 : i1 to i32
    %c0_i32_0 = arith.constant 0 : i32
    %2 = arith.cmpi ne, %1, %c0_i32_0 : i32
    scf.if %2 {
      %cst_10 = arith.constant 0.000000e+00 : f32
      %13 = vector.broadcast %cst_10 : f32 to vector<16x32xf32>
      %c0_11 = arith.constant 0 : index
      %c0_12 = arith.constant 0 : index
      %14 = vector.load %arg6[%c0_11, %c0_12] : memref<16x32xf32, #tpu.memory_space<vmem>>, vector<16x32xf32>
      tpu.vector_store %arg6[%c0_11, %c0_12], %13 {strides = array<i32>} : memref<16x32xf32, #tpu.memory_space<vmem>>, vector<16x32xf32>,
    } else {
    }
    %c0 = arith.constant 0 : index
    %c0_1 = arith.constant 0 : index
    %3 = vector.load %arg6[%c0, %c0_1] : memref<16x32xf32, #tpu.memory_space<vmem>>, vector<16x32xf32>
    %c0_2 = arith.constant 0 : index
    %c0_3 = arith.constant 0 : index
    %4 = vector.load %arg3[%c0_2, %c0_3] : memref<16x16xf32, #tpu.memory_space<vmem>>, vector<16x16xf32>
    %5 = arith.truncf %4 : vector<16x16xf32> to vector<16x16xbf16>
    %c0_4 = arith.constant 0 : index
    %c0_5 = arith.constant 0 : index
    %6 = vector.load %arg4[%c0_4, %c0_5] : memref<16x32xbf16, #tpu.memory_space<vmem>>, vector<16x32xbf16>
    %cst = arith.constant dense<0.000000e+00> : vector<16x32xf32>
    %7 = tpu.matmul %5, %6, %cst {dimension_numbers = #tpu.dot_dimension_numbers<[1], [0], [0], [1], [0, 0, 1, 1], [], []>} : vector<16x16xbf16>, vector<16x32xbf16>, vector<16x32xf32> -> vector<16x32xf32>
    %8 = arith.addf %3, %7 : vector<16x32xf32>
    %c0_6 = arith.constant 0 : index
    %c0_7 = arith.constant 0 : index
    %9 = vector.load %arg6[%c0_6, %c0_7] : memref<16x32xf32, #tpu.memory_space<vmem>>, vector<16x32xf32>
    tpu.vector_store %arg6[%c0_6, %c0_7], %8 {strides = array<i32>} : memref<16x32xf32, #tpu.memory_space<vmem>>, vector<16x32xf32>,
    %c0_i32_8 = arith.constant 0 : i32
    %10 = arith.cmpi eq, %arg2, %c0_i32_8 : i32
    %11 = arith.extui %10 : i1 to i32
    %c0_i32_9 = arith.constant 0 : i32
    %12 = arith.cmpi ne, %11, %c0_i32_9 : i32
    scf.if %12 {
      %c0_10 = arith.constant 0 : index
      %c0_11 = arith.constant 0 : index
      %13 = vector.load %arg6[%c0_10, %c0_11] : memref<16x32xf32, #tpu.memory_space<vmem>>, vector<16x32xf32>
      %c0_12 = arith.constant 0 : index
      %c0_13 = arith.constant 0 : index
      %14 = vector.load %arg5[%c0_12, %c0_13] : memref<1x32xf32, #tpu.memory_space<vmem>>, vector<1x32xf32>
      %15 = vector.broadcast %14 : vector<1x32xf32> to vector<16x32xf32>
      %16 = arith.addf %13, %15 : vector<16x32xf32>
      %cst_14 = arith.constant 5.65685415 : f32
      %17 = vector.broadcast %cst_14 : f32 to vector<16x32xf32>
      %18 = arith.mulf %16, %17 : vector<16x32xf32>
      %c0_15 = arith.constant 0 : index
      %c0_16 = arith.constant 0 : index
      %19 = vector.load %arg6[%c0_15, %c0_16] : memref<16x32xf32, #tpu.memory_space<vmem>>, vector<16x32xf32>
      tpu.vector_store %arg6[%c0_15, %c0_16], %18 {strides = array<i32>} : memref<16x32xf32, #tpu.memory_space<vmem>>, vector<16x32xf32>,
    } else {
    }
    return
  }
  func.func @transform_0(%arg0: i32, %arg1: i32, %arg2: i32) -> (i32, i32) {
    %c0_i32 = arith.constant 0 : i32
    return %arg0, %arg2 : i32, i32
  }
  func.func @transform_1(%arg0: i32, %arg1: i32, %arg2: i32) -> (i32, i32) {
    %c0_i32 = arith.constant 0 : i32
    return %arg2, %arg1 : i32, i32
  }
  func.func @transform_2(%arg0: i32, %arg1: i32, %arg2: i32) -> (i32, i32) {
    %c0_i32 = arith.constant 0 : i32
    %c0_i32_0 = arith.constant 0 : i32
    return %c0_i32, %arg1 : i32, i32
  }
  func.func @transform_3(%arg0: i32, %arg1: i32, %arg2: i32) -> (i32, i32) {
    %c0_i32 = arith.constant 0 : i32
    return %arg0, %arg1 : i32, i32
  }
}

module attributes {stable_mosaic.version = 11 : i64} {
  func.func @_ffn_kernel(%arg0: i32, %arg1: i32, %arg2: memref<16x32xf32, #tpu.memory_space<vmem>>, %arg3: memref<32x512xbf16, #tpu.memory_space<vmem>>, %arg4: memref<1x512xf32, #tpu.memory_space<vmem>>, %arg5: memref<512x32xbf16, #tpu.memory_space<vmem>>, %arg6: memref<1x32xf32, #tpu.memory_space<vmem>>, %arg7: memref<1x32xf32, #tpu.memory_space<vmem>>, %arg8: memref<1x32xf32, #tpu.memory_space<vmem>>, %arg9: memref<16x32xf32, #tpu.memory_space<vmem>>) attributes {dimension_semantics = [#tpu.dimension_semantics<parallel>, #tpu.dimension_semantics<arbitrary>], iteration_bounds = array<i64: 1, 4>, scalar_prefetch = 0 : i64, scratch_operands = 0 : i64, tpu.core_type = #tpu.core_type<tc>, window_params = [{transform_indices = @transform_0, window_bounds = array<i64: 16, 32>}, {transform_indices = @transform_1, window_bounds = array<i64: 32, 512>}, {transform_indices = @transform_2, window_bounds = array<i64: 1, 512>}, {transform_indices = @transform_3, window_bounds = array<i64: 512, 32>}, {pipeline_mode = #tpu.pipeline_mode<synchronous>, transform_indices = @transform_4, window_bounds = array<i64: 1, 32>}, {pipeline_mode = #tpu.pipeline_mode<synchronous>, transform_indices = @transform_5, window_bounds = array<i64: 1, 32>}, {pipeline_mode = #tpu.pipeline_mode<synchronous>, transform_indices = @transform_6, window_bounds = array<i64: 1, 32>}, {transform_indices = @transform_7, window_bounds = array<i64: 16, 32>}]} {
    %c0_i32 = arith.constant 0 : i32
    %0 = arith.cmpi eq, %arg1, %c0_i32 : i32
    %1 = arith.extui %0 : i1 to i32
    %c0_i32_0 = arith.constant 0 : i32
    %2 = arith.cmpi ne, %1, %c0_i32_0 : i32
    scf.if %2 {
      %cst_15 = arith.constant 0.000000e+00 : f32
      %21 = vector.broadcast %cst_15 : f32 to vector<16x32xf32>
      %c0_16 = arith.constant 0 : index
      %c0_17 = arith.constant 0 : index
      %22 = vector.load %arg9[%c0_16, %c0_17] : memref<16x32xf32, #tpu.memory_space<vmem>>, vector<16x32xf32>
      tpu.vector_store %arg9[%c0_16, %c0_17], %21 {strides = array<i32>} : memref<16x32xf32, #tpu.memory_space<vmem>>, vector<16x32xf32>,
    } else {
    }
    %c0 = arith.constant 0 : index
    %c0_1 = arith.constant 0 : index
    %3 = vector.load %arg2[%c0, %c0_1] : memref<16x32xf32, #tpu.memory_space<vmem>>, vector<16x32xf32>
    %4 = arith.truncf %3 : vector<16x32xf32> to vector<16x32xbf16>
    %c0_2 = arith.constant 0 : index
    %c0_3 = arith.constant 0 : index
    %5 = vector.load %arg3[%c0_2, %c0_3] : memref<32x512xbf16, #tpu.memory_space<vmem>>, vector<32x512xbf16>
    %cst = arith.constant dense<0.000000e+00> : vector<16x512xf32>
    %6 = tpu.matmul %4, %5, %cst {dimension_numbers = #tpu.dot_dimension_numbers<[1], [0], [0], [1], [0, 0, 1, 1], [], []>} : vector<16x32xbf16>, vector<32x512xbf16>, vector<16x512xf32> -> vector<16x512xf32>
    %c0_4 = arith.constant 0 : index
    %c0_5 = arith.constant 0 : index
    %7 = vector.load %arg4[%c0_4, %c0_5] : memref<1x512xf32, #tpu.memory_space<vmem>>, vector<1x512xf32>
    %8 = vector.broadcast %7 : vector<1x512xf32> to vector<16x512xf32>
    %9 = arith.addf %6, %8 : vector<16x512xf32>
    %cst_6 = arith.constant 0.000000e+00 : f32
    %10 = vector.broadcast %cst_6 : f32 to vector<16x512xf32>
    %11 = arith.maximumf %9, %10 : vector<16x512xf32>
    %c0_7 = arith.constant 0 : index
    %c0_8 = arith.constant 0 : index
    %12 = vector.load %arg9[%c0_7, %c0_8] : memref<16x32xf32, #tpu.memory_space<vmem>>, vector<16x32xf32>
    %13 = arith.truncf %11 : vector<16x512xf32> to vector<16x512xbf16>
    %c0_9 = arith.constant 0 : index
    %c0_10 = arith.constant 0 : index
    %14 = vector.load %arg5[%c0_9, %c0_10] : memref<512x32xbf16, #tpu.memory_space<vmem>>, vector<512x32xbf16>
    %cst_11 = arith.constant dense<0.000000e+00> : vector<16x32xf32>
    %15 = tpu.matmul %13, %14, %cst_11 {dimension_numbers = #tpu.dot_dimension_numbers<[1], [0], [0], [1], [0, 0, 1, 1], [], []>} : vector<16x512xbf16>, vector<512x32xbf16>, vector<16x32xf32> -> vector<16x32xf32>
    %16 = arith.addf %12, %15 : vector<16x32xf32>
    %c0_12 = arith.constant 0 : index
    %c0_13 = arith.constant 0 : index
    %17 = vector.load %arg9[%c0_12, %c0_13] : memref<16x32xf32, #tpu.memory_space<vmem>>, vector<16x32xf32>
    tpu.vector_store %arg9[%c0_12, %c0_13], %16 {strides = array<i32>} : memref<16x32xf32, #tpu.memory_space<vmem>>, vector<16x32xf32>,
    %c3_i32 = arith.constant 3 : i32
    %18 = arith.cmpi eq, %arg1, %c3_i32 : i32
    %19 = arith.extui %18 : i1 to i32
    %c0_i32_14 = arith.constant 0 : i32
    %20 = arith.cmpi ne, %19, %c0_i32_14 : i32
    scf.if %20 {
      %c0_15 = arith.constant 0 : index
      %c0_16 = arith.constant 0 : index
      %21 = vector.load %arg2[%c0_15, %c0_16] : memref<16x32xf32, #tpu.memory_space<vmem>>, vector<16x32xf32>
      %c0_17 = arith.constant 0 : index
      %c0_18 = arith.constant 0 : index
      %22 = vector.load %arg9[%c0_17, %c0_18] : memref<16x32xf32, #tpu.memory_space<vmem>>, vector<16x32xf32>
      %23 = arith.addf %21, %22 : vector<16x32xf32>
      %c0_19 = arith.constant 0 : index
      %c0_20 = arith.constant 0 : index
      %24 = vector.load %arg6[%c0_19, %c0_20] : memref<1x32xf32, #tpu.memory_space<vmem>>, vector<1x32xf32>
      %25 = vector.broadcast %24 : vector<1x32xf32> to vector<16x32xf32>
      %26 = arith.addf %23, %25 : vector<16x32xf32>
      %cst_21 = arith.constant dense<0.000000e+00> : vector<16xf32>
      %27 = vector.multi_reduction <add>, %26, %cst_21 [1] : vector<16x32xf32> to vector<16xf32>
      %28 = vector.shape_cast %27 : vector<16xf32> to vector<16x1xf32>
      %cst_22 = arith.constant 3.200000e+01 : f32
      %29 = vector.broadcast %cst_22 : f32 to vector<16x1xf32>
      %30 = arith.divf %28, %29 : vector<16x1xf32>
      %31 = vector.broadcast %30 : vector<16x1xf32> to vector<16x32xf32>
      %32 = arith.subf %26, %31 : vector<16x32xf32>
      %33 = arith.mulf %32, %32 : vector<16x32xf32>
      %cst_23 = arith.constant dense<0.000000e+00> : vector<16xf32>
      %34 = vector.multi_reduction <add>, %33, %cst_23 [1] : vector<16x32xf32> to vector<16xf32>
      %35 = vector.shape_cast %34 : vector<16xf32> to vector<16x1xf32>
      %cst_24 = arith.constant 3.200000e+01 : f32
      %36 = vector.broadcast %cst_24 : f32 to vector<16x1xf32>
      %37 = arith.divf %35, %36 : vector<16x1xf32>
      %38 = vector.broadcast %30 : vector<16x1xf32> to vector<16x32xf32>
      %39 = arith.subf %26, %38 : vector<16x32xf32>
      %cst_25 = arith.constant 9.99999974E-6 : f32
      %40 = vector.broadcast %cst_25 : f32 to vector<16x1xf32>
      %41 = arith.addf %37, %40 : vector<16x1xf32>
      %42 = math.rsqrt %41 : vector<16x1xf32>
      %43 = vector.broadcast %42 : vector<16x1xf32> to vector<16x32xf32>
      %44 = arith.mulf %39, %43 : vector<16x32xf32>
      %c0_26 = arith.constant 0 : index
      %c0_27 = arith.constant 0 : index
      %45 = vector.load %arg7[%c0_26, %c0_27] : memref<1x32xf32, #tpu.memory_space<vmem>>, vector<1x32xf32>
      %46 = vector.broadcast %45 : vector<1x32xf32> to vector<16x32xf32>
      %47 = arith.mulf %44, %46 : vector<16x32xf32>
      %c0_28 = arith.constant 0 : index
      %c0_29 = arith.constant 0 : index
      %48 = vector.load %arg8[%c0_28, %c0_29] : memref<1x32xf32, #tpu.memory_space<vmem>>, vector<1x32xf32>
      %49 = vector.broadcast %48 : vector<1x32xf32> to vector<16x32xf32>
      %50 = arith.addf %47, %49 : vector<16x32xf32>
      %c0_30 = arith.constant 0 : index
      %c0_31 = arith.constant 0 : index
      %51 = vector.load %arg9[%c0_30, %c0_31] : memref<16x32xf32, #tpu.memory_space<vmem>>, vector<16x32xf32>
      tpu.vector_store %arg9[%c0_30, %c0_31], %50 {strides = array<i32>} : memref<16x32xf32, #tpu.memory_space<vmem>>, vector<16x32xf32>,
    } else {
    }
    return
  }
  func.func @transform_0(%arg0: i32, %arg1: i32) -> (i32, i32) {
    %c0_i32 = arith.constant 0 : i32
    %c0_i32_0 = arith.constant 0 : i32
    return %arg0, %c0_i32 : i32, i32
  }
  func.func @transform_1(%arg0: i32, %arg1: i32) -> (i32, i32) {
    %c0_i32 = arith.constant 0 : i32
    %c0_i32_0 = arith.constant 0 : i32
    return %c0_i32, %arg1 : i32, i32
  }
  func.func @transform_2(%arg0: i32, %arg1: i32) -> (i32, i32) {
    %c0_i32 = arith.constant 0 : i32
    %c0_i32_0 = arith.constant 0 : i32
    return %c0_i32, %arg1 : i32, i32
  }
  func.func @transform_3(%arg0: i32, %arg1: i32) -> (i32, i32) {
    %c0_i32 = arith.constant 0 : i32
    %c0_i32_0 = arith.constant 0 : i32
    return %arg1, %c0_i32 : i32, i32
  }
  func.func @transform_4(%arg0: i32, %arg1: i32) -> (i32, i32) {
    %c0_i32 = arith.constant 0 : i32
    %c0_i32_0 = arith.constant 0 : i32
    %c0_i32_1 = arith.constant 0 : i32
    return %c0_i32, %c0_i32_0 : i32, i32
  }
  func.func @transform_5(%arg0: i32, %arg1: i32) -> (i32, i32) {
    %c0_i32 = arith.constant 0 : i32
    %c0_i32_0 = arith.constant 0 : i32
    %c0_i32_1 = arith.constant 0 : i32
    return %c0_i32, %c0_i32_0 : i32, i32
  }
  func.func @transform_6(%arg0: i32, %arg1: i32) -> (i32, i32) {
    %c0_i32 = arith.constant 0 : i32
    %c0_i32_0 = arith.constant 0 : i32
    %c0_i32_1 = arith.constant 0 : i32
    return %c0_i32, %c0_i32_0 : i32, i32
  }
  func.func @transform_7(%arg0: i32, %arg1: i32) -> (i32, i32) {
    %c0_i32 = arith.constant 0 : i32
    %c0_i32_0 = arith.constant 0 : i32
    return %arg0, %c0_i32 : i32, i32
  }
}

module attributes {stable_mosaic.version = 11 : i64} {
  func.func @_ln_kernel(%arg0: i32, %arg1: memref<16x32xf32, #tpu.memory_space<vmem>>, %arg2: memref<1x32xf32, #tpu.memory_space<vmem>>, %arg3: memref<1x32xf32, #tpu.memory_space<vmem>>, %arg4: memref<16x32xf32, #tpu.memory_space<vmem>>) attributes {dimension_semantics = [#tpu.dimension_semantics<parallel>], iteration_bounds = array<i64: 1>, scalar_prefetch = 0 : i64, scratch_operands = 0 : i64, tpu.core_type = #tpu.core_type<tc>, window_params = [{transform_indices = @transform_0, window_bounds = array<i64: 16, 32>}, {pipeline_mode = #tpu.pipeline_mode<synchronous>, transform_indices = @transform_1, window_bounds = array<i64: 1, 32>}, {pipeline_mode = #tpu.pipeline_mode<synchronous>, transform_indices = @transform_2, window_bounds = array<i64: 1, 32>}, {transform_indices = @transform_3, window_bounds = array<i64: 16, 32>}]} {
    %c0 = arith.constant 0 : index
    %c0_0 = arith.constant 0 : index
    %0 = vector.load %arg1[%c0, %c0_0] : memref<16x32xf32, #tpu.memory_space<vmem>>, vector<16x32xf32>
    %cst = arith.constant dense<0.000000e+00> : vector<16xf32>
    %1 = vector.multi_reduction <add>, %0, %cst [1] : vector<16x32xf32> to vector<16xf32>
    %2 = vector.shape_cast %1 : vector<16xf32> to vector<16x1xf32>
    %cst_1 = arith.constant 3.200000e+01 : f32
    %3 = vector.broadcast %cst_1 : f32 to vector<16x1xf32>
    %4 = arith.divf %2, %3 : vector<16x1xf32>
    %5 = vector.broadcast %4 : vector<16x1xf32> to vector<16x32xf32>
    %6 = arith.subf %0, %5 : vector<16x32xf32>
    %7 = arith.mulf %6, %6 : vector<16x32xf32>
    %cst_2 = arith.constant dense<0.000000e+00> : vector<16xf32>
    %8 = vector.multi_reduction <add>, %7, %cst_2 [1] : vector<16x32xf32> to vector<16xf32>
    %9 = vector.shape_cast %8 : vector<16xf32> to vector<16x1xf32>
    %cst_3 = arith.constant 3.200000e+01 : f32
    %10 = vector.broadcast %cst_3 : f32 to vector<16x1xf32>
    %11 = arith.divf %9, %10 : vector<16x1xf32>
    %12 = vector.broadcast %4 : vector<16x1xf32> to vector<16x32xf32>
    %13 = arith.subf %0, %12 : vector<16x32xf32>
    %cst_4 = arith.constant 9.99999974E-6 : f32
    %14 = vector.broadcast %cst_4 : f32 to vector<16x1xf32>
    %15 = arith.addf %11, %14 : vector<16x1xf32>
    %16 = math.rsqrt %15 : vector<16x1xf32>
    %17 = vector.broadcast %16 : vector<16x1xf32> to vector<16x32xf32>
    %18 = arith.mulf %13, %17 : vector<16x32xf32>
    %c0_5 = arith.constant 0 : index
    %c0_6 = arith.constant 0 : index
    %19 = vector.load %arg2[%c0_5, %c0_6] : memref<1x32xf32, #tpu.memory_space<vmem>>, vector<1x32xf32>
    %20 = vector.broadcast %19 : vector<1x32xf32> to vector<16x32xf32>
    %21 = arith.mulf %18, %20 : vector<16x32xf32>
    %c0_7 = arith.constant 0 : index
    %c0_8 = arith.constant 0 : index
    %22 = vector.load %arg3[%c0_7, %c0_8] : memref<1x32xf32, #tpu.memory_space<vmem>>, vector<1x32xf32>
    %23 = vector.broadcast %22 : vector<1x32xf32> to vector<16x32xf32>
    %24 = arith.addf %21, %23 : vector<16x32xf32>
    %c0_9 = arith.constant 0 : index
    %c0_10 = arith.constant 0 : index
    %25 = vector.load %arg4[%c0_9, %c0_10] : memref<16x32xf32, #tpu.memory_space<vmem>>, vector<16x32xf32>
    tpu.vector_store %arg4[%c0_9, %c0_10], %24 {strides = array<i32>} : memref<16x32xf32, #tpu.memory_space<vmem>>, vector<16x32xf32>,
    return
  }
  func.func @transform_0(%arg0: i32) -> (i32, i32) {
    %c0_i32 = arith.constant 0 : i32
    %c0_i32_0 = arith.constant 0 : i32
    return %arg0, %c0_i32 : i32, i32
  }
  func.func @transform_1(%arg0: i32) -> (i32, i32) {
    %c0_i32 = arith.constant 0 : i32
    %c0_i32_0 = arith.constant 0 : i32
    %c0_i32_1 = arith.constant 0 : i32
    return %c0_i32, %c0_i32_0 : i32, i32
  }
  func.func @transform_2(%arg0: i32) -> (i32, i32) {
    %c0_i32 = arith.constant 0 : i32
    %c0_i32_0 = arith.constant 0 : i32
    %c0_i32_1 = arith.constant 0 : i32
    return %c0_i32, %c0_i32_0 : i32, i32
  }
  func.func @transform_3(%arg0: i32) -> (i32, i32) {
    %c0_i32 = arith.constant 0 : i32
    %c0_i32_0 = arith.constant 0 : i32
    return %arg0, %c0_i32 : i32, i32
  }
}

module attributes {stable_mosaic.version = 11 : i64} {
  func.func @_mha_kernel(%arg0: i32, %arg1: i32, %arg2: memref<1x8x32xf32, #tpu.memory_space<vmem>>, %arg3: memref<1x8x32xf32, #tpu.memory_space<vmem>>, %arg4: memref<32x32xbf16, #tpu.memory_space<vmem>>, %arg5: memref<32x32xbf16, #tpu.memory_space<vmem>>, %arg6: memref<32x32xbf16, #tpu.memory_space<vmem>>, %arg7: memref<1x32xf32, #tpu.memory_space<vmem>>, %arg8: memref<1x32xf32, #tpu.memory_space<vmem>>, %arg9: memref<1x32xf32, #tpu.memory_space<vmem>>, %arg10: memref<32x32xbf16, #tpu.memory_space<vmem>>, %arg11: memref<1x32xf32, #tpu.memory_space<vmem>>, %arg12: memref<1x32xf32, #tpu.memory_space<vmem>>, %arg13: memref<1x32xf32, #tpu.memory_space<vmem>>, %arg14: memref<1x8x32xf32, #tpu.memory_space<vmem>>, %arg15: memref<8x32xf32, #tpu.memory_space<vmem>>) attributes {dimension_semantics = [#tpu.dimension_semantics<parallel>, #tpu.dimension_semantics<parallel>], iteration_bounds = array<i64: 2, 1>, scalar_prefetch = 0 : i64, scratch_operands = 1 : i64, tpu.core_type = #tpu.core_type<tc>, window_params = [{transform_indices = @transform_0, window_bounds = array<i64: 1, 8, 32>}, {transform_indices = @transform_1, window_bounds = array<i64: 1, 8, 32>}, {pipeline_mode = #tpu.pipeline_mode<synchronous>, transform_indices = @transform_2, window_bounds = array<i64: 32, 32>}, {pipeline_mode = #tpu.pipeline_mode<synchronous>, transform_indices = @transform_3, window_bounds = array<i64: 32, 32>}, {pipeline_mode = #tpu.pipeline_mode<synchronous>, transform_indices = @transform_4, window_bounds = array<i64: 32, 32>}, {pipeline_mode = #tpu.pipeline_mode<synchronous>, transform_indices = @transform_5, window_bounds = array<i64: 1, 32>}, {pipeline_mode = #tpu.pipeline_mode<synchronous>, transform_indices = @transform_6, window_bounds = array<i64: 1, 32>}, {pipeline_mode = #tpu.pipeline_mode<synchronous>, transform_indices = @transform_7, window_bounds = array<i64: 1, 32>}, {pipeline_mode = #tpu.pipeline_mode<synchronous>, transform_indices = @transform_8, window_bounds = array<i64: 32, 32>}, {pipeline_mode = #tpu.pipeline_mode<synchronous>, transform_indices = @transform_9, window_bounds = array<i64: 1, 32>}, {pipeline_mode = #tpu.pipeline_mode<synchronous>, transform_indices = @transform_10, window_bounds = array<i64: 1, 32>}, {pipeline_mode = #tpu.pipeline_mode<synchronous>, transform_indices = @transform_11, window_bounds = array<i64: 1, 32>}, {transform_indices = @transform_12, window_bounds = array<i64: 1, 8, 32>}]} {
    %c0 = arith.constant 0 : index
    %c0_0 = arith.constant 0 : index
    %c0_1 = arith.constant 0 : index
    %0 = vector.load %arg2[%c0, %c0_0, %c0_1] : memref<1x8x32xf32, #tpu.memory_space<vmem>>, vector<1x8x32xf32>
    %1 = vector.shape_cast %0 : vector<1x8x32xf32> to vector<8x32xf32>
    %c0_2 = arith.constant 0 : index
    %c0_3 = arith.constant 0 : index
    %c0_4 = arith.constant 0 : index
    %2 = vector.load %arg3[%c0_2, %c0_3, %c0_4] : memref<1x8x32xf32, #tpu.memory_space<vmem>>, vector<1x8x32xf32>
    %3 = vector.shape_cast %2 : vector<1x8x32xf32> to vector<8x32xf32>
    %4 = arith.truncf %1 : vector<8x32xf32> to vector<8x32xbf16>
    %5 = arith.truncf %3 : vector<8x32xf32> to vector<8x32xbf16>
    %c0_5 = arith.constant 0 : index
    %c0_6 = arith.constant 0 : index
    %6 = vector.load %arg4[%c0_5, %c0_6] : memref<32x32xbf16, #tpu.memory_space<vmem>>, vector<32x32xbf16>
    %cst = arith.constant dense<0.000000e+00> : vector<8x32xf32>
    %7 = tpu.matmul %4, %6, %cst {dimension_numbers = #tpu.dot_dimension_numbers<[1], [0], [0], [1], [0, 0, 1, 1], [], []>} : vector<8x32xbf16>, vector<32x32xbf16>, vector<8x32xf32> -> vector<8x32xf32>
    %c0_7 = arith.constant 0 : index
    %c0_8 = arith.constant 0 : index
    %8 = vector.load %arg7[%c0_7, %c0_8] : memref<1x32xf32, #tpu.memory_space<vmem>>, vector<1x32xf32>
    %9 = vector.broadcast %8 : vector<1x32xf32> to vector<8x32xf32>
    %10 = arith.addf %7, %9 : vector<8x32xf32>
    %c0_9 = arith.constant 0 : index
    %c0_10 = arith.constant 0 : index
    %11 = vector.load %arg5[%c0_9, %c0_10] : memref<32x32xbf16, #tpu.memory_space<vmem>>, vector<32x32xbf16>
    %cst_11 = arith.constant dense<0.000000e+00> : vector<8x32xf32>
    %12 = tpu.matmul %5, %11, %cst_11 {dimension_numbers = #tpu.dot_dimension_numbers<[1], [0], [0], [1], [0, 0, 1, 1], [], []>} : vector<8x32xbf16>, vector<32x32xbf16>, vector<8x32xf32> -> vector<8x32xf32>
    %c0_12 = arith.constant 0 : index
    %c0_13 = arith.constant 0 : index
    %13 = vector.load %arg8[%c0_12, %c0_13] : memref<1x32xf32, #tpu.memory_space<vmem>>, vector<1x32xf32>
    %14 = vector.broadcast %13 : vector<1x32xf32> to vector<8x32xf32>
    %15 = arith.addf %12, %14 : vector<8x32xf32>
    %c0_14 = arith.constant 0 : index
    %c0_15 = arith.constant 0 : index
    %16 = vector.load %arg6[%c0_14, %c0_15] : memref<32x32xbf16, #tpu.memory_space<vmem>>, vector<32x32xbf16>
    %cst_16 = arith.constant dense<0.000000e+00> : vector<8x32xf32>
    %17 = tpu.matmul %5, %16, %cst_16 {dimension_numbers = #tpu.dot_dimension_numbers<[1], [0], [0], [1], [0, 0, 1, 1], [], []>} : vector<8x32xbf16>, vector<32x32xbf16>, vector<8x32xf32> -> vector<8x32xf32>
    %c0_17 = arith.constant 0 : index
    %c0_18 = arith.constant 0 : index
    %18 = vector.load %arg9[%c0_17, %c0_18] : memref<1x32xf32, #tpu.memory_space<vmem>>, vector<1x32xf32>
    %19 = vector.broadcast %18 : vector<1x32xf32> to vector<8x32xf32>
    %20 = arith.addf %17, %19 : vector<8x32xf32>
    %21 = vector.extract_strided_slice %10 {offsets = [0, 0], sizes = [8, 8], strides = [1, 1]} : vector<8x32xf32> to vector<8x8xf32>
    %22 = arith.truncf %21 : vector<8x8xf32> to vector<8x8xbf16>
    %23 = vector.extract_strided_slice %15 {offsets = [0, 0], sizes = [8, 8], strides = [1, 1]} : vector<8x32xf32> to vector<8x8xf32>
    %24 = arith.truncf %23 : vector<8x8xf32> to vector<8x8xbf16>
    %25 = vector.extract_strided_slice %20 {offsets = [0, 0], sizes = [8, 8], strides = [1, 1]} : vector<8x32xf32> to vector<8x8xf32>
    %26 = arith.truncf %25 : vector<8x8xf32> to vector<8x8xbf16>
    %cst_19 = arith.constant dense<0.000000e+00> : vector<8x8xf32>
    %27 = tpu.matmul %22, %24, %cst_19 {dimension_numbers = #tpu.dot_dimension_numbers<[1], [1], [0], [0], [0, 0, 1, 0], [], []>} : vector<8x8xbf16>, vector<8x8xbf16>, vector<8x8xf32> -> vector<8x8xf32>
    %cst_20 = arith.constant 0.353553385 : f32
    %28 = vector.broadcast %cst_20 : f32 to vector<8x8xf32>
    %29 = arith.mulf %27, %28 : vector<8x8xf32>
    %cst_21 = arith.constant dense<0xFF800000> : vector<8xf32>
    %30 = vector.multi_reduction <maximumf>, %29, %cst_21 [1] : vector<8x8xf32> to vector<8xf32>
    %31 = vector.shape_cast %30 : vector<8xf32> to vector<8x1xf32>
    %32 = vector.broadcast %31 : vector<8x1xf32> to vector<8x8xf32>
    %33 = arith.subf %29, %32 : vector<8x8xf32>
    %34 = math.exp %33 : vector<8x8xf32>
    %cst_22 = arith.constant dense<0.000000e+00> : vector<8xf32>
    %35 = vector.multi_reduction <add>, %34, %cst_22 [1] : vector<8x8xf32> to vector<8xf32>
    %36 = vector.shape_cast %35 : vector<8xf32> to vector<8x1xf32>
    %37 = vector.broadcast %36 : vector<8x1xf32> to vector<8x8xf32>
    %38 = arith.divf %34, %37 : vector<8x8xf32>
    %39 = arith.truncf %38 : vector<8x8xf32> to vector<8x8xbf16>
    %cst_23 = arith.constant dense<0.000000e+00> : vector<8x8xf32>
    %40 = tpu.matmul %39, %26, %cst_23 {dimension_numbers = #tpu.dot_dimension_numbers<[1], [0], [0], [1], [0, 0, 1, 1], [], []>} : vector<8x8xbf16>, vector<8x8xbf16>, vector<8x8xf32> -> vector<8x8xf32>
    %c0_24 = arith.constant 0 : index
    %c0_25 = arith.constant 0 : index
    %41 = vector.load %arg15[%c0_24, %c0_25] : memref<8x32xf32, #tpu.memory_space<vmem>>, vector<8x8xf32>
    tpu.vector_store %arg15[%c0_24, %c0_25], %40 {strides = array<i32>} : memref<8x32xf32, #tpu.memory_space<vmem>>, vector<8x8xf32>,
    %42 = vector.extract_strided_slice %10 {offsets = [0, 8], sizes = [8, 8], strides = [1, 1]} : vector<8x32xf32> to vector<8x8xf32>
    %43 = arith.truncf %42 : vector<8x8xf32> to vector<8x8xbf16>
    %44 = vector.extract_strided_slice %15 {offsets = [0, 8], sizes = [8, 8], strides = [1, 1]} : vector<8x32xf32> to vector<8x8xf32>
    %45 = arith.truncf %44 : vector<8x8xf32> to vector<8x8xbf16>
    %46 = vector.extract_strided_slice %20 {offsets = [0, 8], sizes = [8, 8], strides = [1, 1]} : vector<8x32xf32> to vector<8x8xf32>
    %47 = arith.truncf %46 : vector<8x8xf32> to vector<8x8xbf16>
    %cst_26 = arith.constant dense<0.000000e+00> : vector<8x8xf32>
    %48 = tpu.matmul %43, %45, %cst_26 {dimension_numbers = #tpu.dot_dimension_numbers<[1], [1], [0], [0], [0, 0, 1, 0], [], []>} : vector<8x8xbf16>, vector<8x8xbf16>, vector<8x8xf32> -> vector<8x8xf32>
    %cst_27 = arith.constant 0.353553385 : f32
    %49 = vector.broadcast %cst_27 : f32 to vector<8x8xf32>
    %50 = arith.mulf %48, %49 : vector<8x8xf32>
    %cst_28 = arith.constant dense<0xFF800000> : vector<8xf32>
    %51 = vector.multi_reduction <maximumf>, %50, %cst_28 [1] : vector<8x8xf32> to vector<8xf32>
    %52 = vector.shape_cast %51 : vector<8xf32> to vector<8x1xf32>
    %53 = vector.broadcast %52 : vector<8x1xf32> to vector<8x8xf32>
    %54 = arith.subf %50, %53 : vector<8x8xf32>
    %55 = math.exp %54 : vector<8x8xf32>
    %cst_29 = arith.constant dense<0.000000e+00> : vector<8xf32>
    %56 = vector.multi_reduction <add>, %55, %cst_29 [1] : vector<8x8xf32> to vector<8xf32>
    %57 = vector.shape_cast %56 : vector<8xf32> to vector<8x1xf32>
    %58 = vector.broadcast %57 : vector<8x1xf32> to vector<8x8xf32>
    %59 = arith.divf %55, %58 : vector<8x8xf32>
    %60 = arith.truncf %59 : vector<8x8xf32> to vector<8x8xbf16>
    %cst_30 = arith.constant dense<0.000000e+00> : vector<8x8xf32>
    %61 = tpu.matmul %60, %47, %cst_30 {dimension_numbers = #tpu.dot_dimension_numbers<[1], [0], [0], [1], [0, 0, 1, 1], [], []>} : vector<8x8xbf16>, vector<8x8xbf16>, vector<8x8xf32> -> vector<8x8xf32>
    %c0_31 = arith.constant 0 : index
    %c8 = arith.constant 8 : index
    %62 = vector.load %arg15[%c0_31, %c8] : memref<8x32xf32, #tpu.memory_space<vmem>>, vector<8x8xf32>
    tpu.vector_store %arg15[%c0_31, %c8], %61 {strides = array<i32>} : memref<8x32xf32, #tpu.memory_space<vmem>>, vector<8x8xf32>,
    %63 = vector.extract_strided_slice %10 {offsets = [0, 16], sizes = [8, 8], strides = [1, 1]} : vector<8x32xf32> to vector<8x8xf32>
    %64 = arith.truncf %63 : vector<8x8xf32> to vector<8x8xbf16>
    %65 = vector.extract_strided_slice %15 {offsets = [0, 16], sizes = [8, 8], strides = [1, 1]} : vector<8x32xf32> to vector<8x8xf32>
    %66 = arith.truncf %65 : vector<8x8xf32> to vector<8x8xbf16>
    %67 = vector.extract_strided_slice %20 {offsets = [0, 16], sizes = [8, 8], strides = [1, 1]} : vector<8x32xf32> to vector<8x8xf32>
    %68 = arith.truncf %67 : vector<8x8xf32> to vector<8x8xbf16>
    %cst_32 = arith.constant dense<0.000000e+00> : vector<8x8xf32>
    %69 = tpu.matmul %64, %66, %cst_32 {dimension_numbers = #tpu.dot_dimension_numbers<[1], [1], [0], [0], [0, 0, 1, 0], [], []>} : vector<8x8xbf16>, vector<8x8xbf16>, vector<8x8xf32> -> vector<8x8xf32>
    %cst_33 = arith.constant 0.353553385 : f32
    %70 = vector.broadcast %cst_33 : f32 to vector<8x8xf32>
    %71 = arith.mulf %69, %70 : vector<8x8xf32>
    %cst_34 = arith.constant dense<0xFF800000> : vector<8xf32>
    %72 = vector.multi_reduction <maximumf>, %71, %cst_34 [1] : vector<8x8xf32> to vector<8xf32>
    %73 = vector.shape_cast %72 : vector<8xf32> to vector<8x1xf32>
    %74 = vector.broadcast %73 : vector<8x1xf32> to vector<8x8xf32>
    %75 = arith.subf %71, %74 : vector<8x8xf32>
    %76 = math.exp %75 : vector<8x8xf32>
    %cst_35 = arith.constant dense<0.000000e+00> : vector<8xf32>
    %77 = vector.multi_reduction <add>, %76, %cst_35 [1] : vector<8x8xf32> to vector<8xf32>
    %78 = vector.shape_cast %77 : vector<8xf32> to vector<8x1xf32>
    %79 = vector.broadcast %78 : vector<8x1xf32> to vector<8x8xf32>
    %80 = arith.divf %76, %79 : vector<8x8xf32>
    %81 = arith.truncf %80 : vector<8x8xf32> to vector<8x8xbf16>
    %cst_36 = arith.constant dense<0.000000e+00> : vector<8x8xf32>
    %82 = tpu.matmul %81, %68, %cst_36 {dimension_numbers = #tpu.dot_dimension_numbers<[1], [0], [0], [1], [0, 0, 1, 1], [], []>} : vector<8x8xbf16>, vector<8x8xbf16>, vector<8x8xf32> -> vector<8x8xf32>
    %c0_37 = arith.constant 0 : index
    %c16 = arith.constant 16 : index
    %83 = vector.load %arg15[%c0_37, %c16] : memref<8x32xf32, #tpu.memory_space<vmem>>, vector<8x8xf32>
    tpu.vector_store %arg15[%c0_37, %c16], %82 {strides = array<i32>} : memref<8x32xf32, #tpu.memory_space<vmem>>, vector<8x8xf32>,
    %84 = vector.extract_strided_slice %10 {offsets = [0, 24], sizes = [8, 8], strides = [1, 1]} : vector<8x32xf32> to vector<8x8xf32>
    %85 = arith.truncf %84 : vector<8x8xf32> to vector<8x8xbf16>
    %86 = vector.extract_strided_slice %15 {offsets = [0, 24], sizes = [8, 8], strides = [1, 1]} : vector<8x32xf32> to vector<8x8xf32>
    %87 = arith.truncf %86 : vector<8x8xf32> to vector<8x8xbf16>
    %88 = vector.extract_strided_slice %20 {offsets = [0, 24], sizes = [8, 8], strides = [1, 1]} : vector<8x32xf32> to vector<8x8xf32>
    %89 = arith.truncf %88 : vector<8x8xf32> to vector<8x8xbf16>
    %cst_38 = arith.constant dense<0.000000e+00> : vector<8x8xf32>
    %90 = tpu.matmul %85, %87, %cst_38 {dimension_numbers = #tpu.dot_dimension_numbers<[1], [1], [0], [0], [0, 0, 1, 0], [], []>} : vector<8x8xbf16>, vector<8x8xbf16>, vector<8x8xf32> -> vector<8x8xf32>
    %cst_39 = arith.constant 0.353553385 : f32
    %91 = vector.broadcast %cst_39 : f32 to vector<8x8xf32>
    %92 = arith.mulf %90, %91 : vector<8x8xf32>
    %cst_40 = arith.constant dense<0xFF800000> : vector<8xf32>
    %93 = vector.multi_reduction <maximumf>, %92, %cst_40 [1] : vector<8x8xf32> to vector<8xf32>
    %94 = vector.shape_cast %93 : vector<8xf32> to vector<8x1xf32>
    %95 = vector.broadcast %94 : vector<8x1xf32> to vector<8x8xf32>
    %96 = arith.subf %92, %95 : vector<8x8xf32>
    %97 = math.exp %96 : vector<8x8xf32>
    %cst_41 = arith.constant dense<0.000000e+00> : vector<8xf32>
    %98 = vector.multi_reduction <add>, %97, %cst_41 [1] : vector<8x8xf32> to vector<8xf32>
    %99 = vector.shape_cast %98 : vector<8xf32> to vector<8x1xf32>
    %100 = vector.broadcast %99 : vector<8x1xf32> to vector<8x8xf32>
    %101 = arith.divf %97, %100 : vector<8x8xf32>
    %102 = arith.truncf %101 : vector<8x8xf32> to vector<8x8xbf16>
    %cst_42 = arith.constant dense<0.000000e+00> : vector<8x8xf32>
    %103 = tpu.matmul %102, %89, %cst_42 {dimension_numbers = #tpu.dot_dimension_numbers<[1], [0], [0], [1], [0, 0, 1, 1], [], []>} : vector<8x8xbf16>, vector<8x8xbf16>, vector<8x8xf32> -> vector<8x8xf32>
    %c0_43 = arith.constant 0 : index
    %c24 = arith.constant 24 : index
    %104 = vector.load %arg15[%c0_43, %c24] : memref<8x32xf32, #tpu.memory_space<vmem>>, vector<8x8xf32>
    tpu.vector_store %arg15[%c0_43, %c24], %103 {strides = array<i32>} : memref<8x32xf32, #tpu.memory_space<vmem>>, vector<8x8xf32>,
    %c0_44 = arith.constant 0 : index
    %c0_45 = arith.constant 0 : index
    %105 = vector.load %arg15[%c0_44, %c0_45] : memref<8x32xf32, #tpu.memory_space<vmem>>, vector<8x32xf32>
    %106 = arith.truncf %105 : vector<8x32xf32> to vector<8x32xbf16>
    %c0_46 = arith.constant 0 : index
    %c0_47 = arith.constant 0 : index
    %107 = vector.load %arg10[%c0_46, %c0_47] : memref<32x32xbf16, #tpu.memory_space<vmem>>, vector<32x32xbf16>
    %cst_48 = arith.constant dense<0.000000e+00> : vector<8x32xf32>
    %108 = tpu.matmul %106, %107, %cst_48 {dimension_numbers = #tpu.dot_dimension_numbers<[1], [0], [0], [1], [0, 0, 1, 1], [], []>} : vector<8x32xbf16>, vector<32x32xbf16>, vector<8x32xf32> -> vector<8x32xf32>
    %c0_49 = arith.constant 0 : index
    %c0_50 = arith.constant 0 : index
    %109 = vector.load %arg11[%c0_49, %c0_50] : memref<1x32xf32, #tpu.memory_space<vmem>>, vector<1x32xf32>
    %110 = vector.broadcast %109 : vector<1x32xf32> to vector<8x32xf32>
    %111 = arith.addf %108, %110 : vector<8x32xf32>
    %112 = arith.addf %1, %111 : vector<8x32xf32>
    %cst_51 = arith.constant dense<0.000000e+00> : vector<8xf32>
    %113 = vector.multi_reduction <add>, %112, %cst_51 [1] : vector<8x32xf32> to vector<8xf32>
    %114 = vector.shape_cast %113 : vector<8xf32> to vector<8x1xf32>
    %cst_52 = arith.constant 3.200000e+01 : f32
    %115 = vector.broadcast %cst_52 : f32 to vector<8x1xf32>
    %116 = arith.divf %114, %115 : vector<8x1xf32>
    %117 = vector.broadcast %116 : vector<8x1xf32> to vector<8x32xf32>
    %118 = arith.subf %112, %117 : vector<8x32xf32>
    %119 = arith.mulf %118, %118 : vector<8x32xf32>
    %cst_53 = arith.constant dense<0.000000e+00> : vector<8xf32>
    %120 = vector.multi_reduction <add>, %119, %cst_53 [1] : vector<8x32xf32> to vector<8xf32>
    %121 = vector.shape_cast %120 : vector<8xf32> to vector<8x1xf32>
    %cst_54 = arith.constant 3.200000e+01 : f32
    %122 = vector.broadcast %cst_54 : f32 to vector<8x1xf32>
    %123 = arith.divf %121, %122 : vector<8x1xf32>
    %124 = vector.broadcast %116 : vector<8x1xf32> to vector<8x32xf32>
    %125 = arith.subf %112, %124 : vector<8x32xf32>
    %cst_55 = arith.constant 9.99999974E-6 : f32
    %126 = vector.broadcast %cst_55 : f32 to vector<8x1xf32>
    %127 = arith.addf %123, %126 : vector<8x1xf32>
    %128 = math.rsqrt %127 : vector<8x1xf32>
    %129 = vector.broadcast %128 : vector<8x1xf32> to vector<8x32xf32>
    %130 = arith.mulf %125, %129 : vector<8x32xf32>
    %c0_56 = arith.constant 0 : index
    %c0_57 = arith.constant 0 : index
    %131 = vector.load %arg12[%c0_56, %c0_57] : memref<1x32xf32, #tpu.memory_space<vmem>>, vector<1x32xf32>
    %132 = vector.broadcast %131 : vector<1x32xf32> to vector<8x32xf32>
    %133 = arith.mulf %130, %132 : vector<8x32xf32>
    %c0_58 = arith.constant 0 : index
    %c0_59 = arith.constant 0 : index
    %134 = vector.load %arg13[%c0_58, %c0_59] : memref<1x32xf32, #tpu.memory_space<vmem>>, vector<1x32xf32>
    %135 = vector.broadcast %134 : vector<1x32xf32> to vector<8x32xf32>
    %136 = arith.addf %133, %135 : vector<8x32xf32>
    %c0_60 = arith.constant 0 : index
    %c0_61 = arith.constant 0 : index
    %c0_62 = arith.constant 0 : index
    %137 = vector.load %arg14[%c0_60, %c0_61, %c0_62] : memref<1x8x32xf32, #tpu.memory_space<vmem>>, vector<1x8x32xf32>
    %138 = vector.shape_cast %137 : vector<1x8x32xf32> to vector<8x32xf32>
    %139 = vector.shape_cast %136 : vector<8x32xf32> to vector<1x8x32xf32>
    tpu.vector_store %arg14[%c0_60, %c0_61, %c0_62], %139 {strides = array<i32>} : memref<1x8x32xf32, #tpu.memory_space<vmem>>, vector<1x8x32xf32>,
    return
  }
  func.func @transform_0(%arg0: i32, %arg1: i32) -> (i32, i32, i32) {
    %c0_i32 = arith.constant 0 : i32
    %c0_i32_0 = arith.constant 0 : i32
    return %arg0, %arg1, %c0_i32 : i32, i32, i32
  }
  func.func @transform_1(%arg0: i32, %arg1: i32) -> (i32, i32, i32) {
    %c0_i32 = arith.constant 0 : i32
    %c0_i32_0 = arith.constant 0 : i32
    %c0_i32_1 = arith.constant 0 : i32
    return %arg0, %c0_i32, %c0_i32_0 : i32, i32, i32
  }
  func.func @transform_2(%arg0: i32, %arg1: i32) -> (i32, i32) {
    %c0_i32 = arith.constant 0 : i32
    %c0_i32_0 = arith.constant 0 : i32
    %c0_i32_1 = arith.constant 0 : i32
    return %c0_i32, %c0_i32_0 : i32, i32
  }
  func.func @transform_3(%arg0: i32, %arg1: i32) -> (i32, i32) {
    %c0_i32 = arith.constant 0 : i32
    %c0_i32_0 = arith.constant 0 : i32
    %c0_i32_1 = arith.constant 0 : i32
    return %c0_i32, %c0_i32_0 : i32, i32
  }
  func.func @transform_4(%arg0: i32, %arg1: i32) -> (i32, i32) {
    %c0_i32 = arith.constant 0 : i32
    %c0_i32_0 = arith.constant 0 : i32
    %c0_i32_1 = arith.constant 0 : i32
    return %c0_i32, %c0_i32_0 : i32, i32
  }
  func.func @transform_5(%arg0: i32, %arg1: i32) -> (i32, i32) {
    %c0_i32 = arith.constant 0 : i32
    %c0_i32_0 = arith.constant 0 : i32
    %c0_i32_1 = arith.constant 0 : i32
    return %c0_i32, %c0_i32_0 : i32, i32
  }
  func.func @transform_6(%arg0: i32, %arg1: i32) -> (i32, i32) {
    %c0_i32 = arith.constant 0 : i32
    %c0_i32_0 = arith.constant 0 : i32
    %c0_i32_1 = arith.constant 0 : i32
    return %c0_i32, %c0_i32_0 : i32, i32
  }
  func.func @transform_7(%arg0: i32, %arg1: i32) -> (i32, i32) {
    %c0_i32 = arith.constant 0 : i32
    %c0_i32_0 = arith.constant 0 : i32
    %c0_i32_1 = arith.constant 0 : i32
    return %c0_i32, %c0_i32_0 : i32, i32
  }
  func.func @transform_8(%arg0: i32, %arg1: i32) -> (i32, i32) {
    %c0_i32 = arith.constant 0 : i32
    %c0_i32_0 = arith.constant 0 : i32
    %c0_i32_1 = arith.constant 0 : i32
    return %c0_i32, %c0_i32_0 : i32, i32
  }
  func.func @transform_9(%arg0: i32, %arg1: i32) -> (i32, i32) {
    %c0_i32 = arith.constant 0 : i32
    %c0_i32_0 = arith.constant 0 : i32
    %c0_i32_1 = arith.constant 0 : i32
    return %c0_i32, %c0_i32_0 : i32, i32
  }
  func.func @transform_10(%arg0: i32, %arg1: i32) -> (i32, i32) {
    %c0_i32 = arith.constant 0 : i32
    %c0_i32_0 = arith.constant 0 : i32
    %c0_i32_1 = arith.constant 0 : i32
    return %c0_i32, %c0_i32_0 : i32, i32
  }
  func.func @transform_11(%arg0: i32, %arg1: i32) -> (i32, i32) {
    %c0_i32 = arith.constant 0 : i32
    %c0_i32_0 = arith.constant 0 : i32
    %c0_i32_1 = arith.constant 0 : i32
    return %c0_i32, %c0_i32_0 : i32, i32
  }
  func.func @transform_12(%arg0: i32, %arg1: i32) -> (i32, i32, i32) {
    %c0_i32 = arith.constant 0 : i32
    %c0_i32_0 = arith.constant 0 : i32
    return %arg0, %arg1, %c0_i32 : i32, i32, i32
  }
}

module attributes {stable_mosaic.version = 11 : i64} {
  func.func @_linear_kernel(%arg0: i32, %arg1: i32, %arg2: i32, %arg3: memref<12x16xf32, #tpu.memory_space<vmem>>, %arg4: memref<16x32xbf16, #tpu.memory_space<vmem>>, %arg5: memref<1x32xf32, #tpu.memory_space<vmem>>, %arg6: memref<12x32xf32, #tpu.memory_space<vmem>>) attributes {dimension_semantics = [#tpu.dimension_semantics<parallel>, #tpu.dimension_semantics<parallel>, #tpu.dimension_semantics<arbitrary>], iteration_bounds = array<i64: 1, 1, 1>, scalar_prefetch = 0 : i64, scratch_operands = 0 : i64, tpu.core_type = #tpu.core_type<tc>, window_params = [{transform_indices = @transform_0, window_bounds = array<i64: 12, 16>}, {transform_indices = @transform_1, window_bounds = array<i64: 16, 32>}, {transform_indices = @transform_2, window_bounds = array<i64: 1, 32>}, {transform_indices = @transform_3, window_bounds = array<i64: 12, 32>}]} {
    %c0_i32 = arith.constant 0 : i32
    %0 = arith.cmpi eq, %arg2, %c0_i32 : i32
    %1 = arith.extui %0 : i1 to i32
    %c0_i32_0 = arith.constant 0 : i32
    %2 = arith.cmpi ne, %1, %c0_i32_0 : i32
    scf.if %2 {
      %cst_10 = arith.constant 0.000000e+00 : f32
      %13 = vector.broadcast %cst_10 : f32 to vector<12x32xf32>
      %c0_11 = arith.constant 0 : index
      %c0_12 = arith.constant 0 : index
      %14 = vector.load %arg6[%c0_11, %c0_12] : memref<12x32xf32, #tpu.memory_space<vmem>>, vector<12x32xf32>
      tpu.vector_store %arg6[%c0_11, %c0_12], %13 {strides = array<i32>} : memref<12x32xf32, #tpu.memory_space<vmem>>, vector<12x32xf32>,
    } else {
    }
    %c0 = arith.constant 0 : index
    %c0_1 = arith.constant 0 : index
    %3 = vector.load %arg6[%c0, %c0_1] : memref<12x32xf32, #tpu.memory_space<vmem>>, vector<12x32xf32>
    %c0_2 = arith.constant 0 : index
    %c0_3 = arith.constant 0 : index
    %4 = vector.load %arg3[%c0_2, %c0_3] : memref<12x16xf32, #tpu.memory_space<vmem>>, vector<12x16xf32>
    %5 = arith.truncf %4 : vector<12x16xf32> to vector<12x16xbf16>
    %c0_4 = arith.constant 0 : index
    %c0_5 = arith.constant 0 : index
    %6 = vector.load %arg4[%c0_4, %c0_5] : memref<16x32xbf16, #tpu.memory_space<vmem>>, vector<16x32xbf16>
    %cst = arith.constant dense<0.000000e+00> : vector<12x32xf32>
    %7 = tpu.matmul %5, %6, %cst {dimension_numbers = #tpu.dot_dimension_numbers<[1], [0], [0], [1], [0, 0, 1, 1], [], []>} : vector<12x16xbf16>, vector<16x32xbf16>, vector<12x32xf32> -> vector<12x32xf32>
    %8 = arith.addf %3, %7 : vector<12x32xf32>
    %c0_6 = arith.constant 0 : index
    %c0_7 = arith.constant 0 : index
    %9 = vector.load %arg6[%c0_6, %c0_7] : memref<12x32xf32, #tpu.memory_space<vmem>>, vector<12x32xf32>
    tpu.vector_store %arg6[%c0_6, %c0_7], %8 {strides = array<i32>} : memref<12x32xf32, #tpu.memory_space<vmem>>, vector<12x32xf32>,
    %c0_i32_8 = arith.constant 0 : i32
    %10 = arith.cmpi eq, %arg2, %c0_i32_8 : i32
    %11 = arith.extui %10 : i1 to i32
    %c0_i32_9 = arith.constant 0 : i32
    %12 = arith.cmpi ne, %11, %c0_i32_9 : i32
    scf.if %12 {
      %c0_10 = arith.constant 0 : index
      %c0_11 = arith.constant 0 : index
      %13 = vector.load %arg6[%c0_10, %c0_11] : memref<12x32xf32, #tpu.memory_space<vmem>>, vector<12x32xf32>
      %c0_12 = arith.constant 0 : index
      %c0_13 = arith.constant 0 : index
      %14 = vector.load %arg5[%c0_12, %c0_13] : memref<1x32xf32, #tpu.memory_space<vmem>>, vector<1x32xf32>
      %15 = vector.broadcast %14 : vector<1x32xf32> to vector<12x32xf32>
      %16 = arith.addf %13, %15 : vector<12x32xf32>
      %cst_14 = arith.constant 5.65685415 : f32
      %17 = vector.broadcast %cst_14 : f32 to vector<12x32xf32>
      %18 = arith.mulf %16, %17 : vector<12x32xf32>
      %c0_15 = arith.constant 0 : index
      %c0_16 = arith.constant 0 : index
      %19 = vector.load %arg6[%c0_15, %c0_16] : memref<12x32xf32, #tpu.memory_space<vmem>>, vector<12x32xf32>
      tpu.vector_store %arg6[%c0_15, %c0_16], %18 {strides = array<i32>} : memref<12x32xf32, #tpu.memory_space<vmem>>, vector<12x32xf32>,
    } else {
    }
    return
  }
  func.func @transform_0(%arg0: i32, %arg1: i32, %arg2: i32) -> (i32, i32) {
    %c0_i32 = arith.constant 0 : i32
    return %arg0, %arg2 : i32, i32
  }
  func.func @transform_1(%arg0: i32, %arg1: i32, %arg2: i32) -> (i32, i32) {
    %c0_i32 = arith.constant 0 : i32
    return %arg2, %arg1 : i32, i32
  }
  func.func @transform_2(%arg0: i32, %arg1: i32, %arg2: i32) -> (i32, i32) {
    %c0_i32 = arith.constant 0 : i32
    %c0_i32_0 = arith.constant 0 : i32
    return %c0_i32, %arg1 : i32, i32
  }
  func.func @transform_3(%arg0: i32, %arg1: i32, %arg2: i32) -> (i32, i32) {
    %c0_i32 = arith.constant 0 : i32
    return %arg0, %arg1 : i32, i32
  }
}

module attributes {stable_mosaic.version = 11 : i64} {
  func.func @_mha_kernel(%arg0: i32, %arg1: i32, %arg2: memref<1x6x32xf32, #tpu.memory_space<vmem>>, %arg3: memref<1x6x32xf32, #tpu.memory_space<vmem>>, %arg4: memref<32x32xbf16, #tpu.memory_space<vmem>>, %arg5: memref<32x32xbf16, #tpu.memory_space<vmem>>, %arg6: memref<32x32xbf16, #tpu.memory_space<vmem>>, %arg7: memref<1x32xf32, #tpu.memory_space<vmem>>, %arg8: memref<1x32xf32, #tpu.memory_space<vmem>>, %arg9: memref<1x32xf32, #tpu.memory_space<vmem>>, %arg10: memref<32x32xbf16, #tpu.memory_space<vmem>>, %arg11: memref<1x32xf32, #tpu.memory_space<vmem>>, %arg12: memref<1x32xf32, #tpu.memory_space<vmem>>, %arg13: memref<1x32xf32, #tpu.memory_space<vmem>>, %arg14: memref<1x6x32xf32, #tpu.memory_space<vmem>>, %arg15: memref<6x32xf32, #tpu.memory_space<vmem>>) attributes {dimension_semantics = [#tpu.dimension_semantics<parallel>, #tpu.dimension_semantics<parallel>], iteration_bounds = array<i64: 2, 1>, scalar_prefetch = 0 : i64, scratch_operands = 1 : i64, tpu.core_type = #tpu.core_type<tc>, window_params = [{transform_indices = @transform_0, window_bounds = array<i64: 1, 6, 32>}, {transform_indices = @transform_1, window_bounds = array<i64: 1, 6, 32>}, {pipeline_mode = #tpu.pipeline_mode<synchronous>, transform_indices = @transform_2, window_bounds = array<i64: 32, 32>}, {pipeline_mode = #tpu.pipeline_mode<synchronous>, transform_indices = @transform_3, window_bounds = array<i64: 32, 32>}, {pipeline_mode = #tpu.pipeline_mode<synchronous>, transform_indices = @transform_4, window_bounds = array<i64: 32, 32>}, {pipeline_mode = #tpu.pipeline_mode<synchronous>, transform_indices = @transform_5, window_bounds = array<i64: 1, 32>}, {pipeline_mode = #tpu.pipeline_mode<synchronous>, transform_indices = @transform_6, window_bounds = array<i64: 1, 32>}, {pipeline_mode = #tpu.pipeline_mode<synchronous>, transform_indices = @transform_7, window_bounds = array<i64: 1, 32>}, {pipeline_mode = #tpu.pipeline_mode<synchronous>, transform_indices = @transform_8, window_bounds = array<i64: 32, 32>}, {pipeline_mode = #tpu.pipeline_mode<synchronous>, transform_indices = @transform_9, window_bounds = array<i64: 1, 32>}, {pipeline_mode = #tpu.pipeline_mode<synchronous>, transform_indices = @transform_10, window_bounds = array<i64: 1, 32>}, {pipeline_mode = #tpu.pipeline_mode<synchronous>, transform_indices = @transform_11, window_bounds = array<i64: 1, 32>}, {transform_indices = @transform_12, window_bounds = array<i64: 1, 6, 32>}]} {
    %c0 = arith.constant 0 : index
    %c0_0 = arith.constant 0 : index
    %c0_1 = arith.constant 0 : index
    %0 = vector.load %arg2[%c0, %c0_0, %c0_1] : memref<1x6x32xf32, #tpu.memory_space<vmem>>, vector<1x6x32xf32>
    %1 = vector.shape_cast %0 : vector<1x6x32xf32> to vector<6x32xf32>
    %c0_2 = arith.constant 0 : index
    %c0_3 = arith.constant 0 : index
    %c0_4 = arith.constant 0 : index
    %2 = vector.load %arg3[%c0_2, %c0_3, %c0_4] : memref<1x6x32xf32, #tpu.memory_space<vmem>>, vector<1x6x32xf32>
    %3 = vector.shape_cast %2 : vector<1x6x32xf32> to vector<6x32xf32>
    %4 = arith.truncf %1 : vector<6x32xf32> to vector<6x32xbf16>
    %5 = arith.truncf %3 : vector<6x32xf32> to vector<6x32xbf16>
    %c0_5 = arith.constant 0 : index
    %c0_6 = arith.constant 0 : index
    %6 = vector.load %arg4[%c0_5, %c0_6] : memref<32x32xbf16, #tpu.memory_space<vmem>>, vector<32x32xbf16>
    %cst = arith.constant dense<0.000000e+00> : vector<6x32xf32>
    %7 = tpu.matmul %4, %6, %cst {dimension_numbers = #tpu.dot_dimension_numbers<[1], [0], [0], [1], [0, 0, 1, 1], [], []>} : vector<6x32xbf16>, vector<32x32xbf16>, vector<6x32xf32> -> vector<6x32xf32>
    %c0_7 = arith.constant 0 : index
    %c0_8 = arith.constant 0 : index
    %8 = vector.load %arg7[%c0_7, %c0_8] : memref<1x32xf32, #tpu.memory_space<vmem>>, vector<1x32xf32>
    %9 = vector.broadcast %8 : vector<1x32xf32> to vector<6x32xf32>
    %10 = arith.addf %7, %9 : vector<6x32xf32>
    %c0_9 = arith.constant 0 : index
    %c0_10 = arith.constant 0 : index
    %11 = vector.load %arg5[%c0_9, %c0_10] : memref<32x32xbf16, #tpu.memory_space<vmem>>, vector<32x32xbf16>
    %cst_11 = arith.constant dense<0.000000e+00> : vector<6x32xf32>
    %12 = tpu.matmul %5, %11, %cst_11 {dimension_numbers = #tpu.dot_dimension_numbers<[1], [0], [0], [1], [0, 0, 1, 1], [], []>} : vector<6x32xbf16>, vector<32x32xbf16>, vector<6x32xf32> -> vector<6x32xf32>
    %c0_12 = arith.constant 0 : index
    %c0_13 = arith.constant 0 : index
    %13 = vector.load %arg8[%c0_12, %c0_13] : memref<1x32xf32, #tpu.memory_space<vmem>>, vector<1x32xf32>
    %14 = vector.broadcast %13 : vector<1x32xf32> to vector<6x32xf32>
    %15 = arith.addf %12, %14 : vector<6x32xf32>
    %c0_14 = arith.constant 0 : index
    %c0_15 = arith.constant 0 : index
    %16 = vector.load %arg6[%c0_14, %c0_15] : memref<32x32xbf16, #tpu.memory_space<vmem>>, vector<32x32xbf16>
    %cst_16 = arith.constant dense<0.000000e+00> : vector<6x32xf32>
    %17 = tpu.matmul %5, %16, %cst_16 {dimension_numbers = #tpu.dot_dimension_numbers<[1], [0], [0], [1], [0, 0, 1, 1], [], []>} : vector<6x32xbf16>, vector<32x32xbf16>, vector<6x32xf32> -> vector<6x32xf32>
    %c0_17 = arith.constant 0 : index
    %c0_18 = arith.constant 0 : index
    %18 = vector.load %arg9[%c0_17, %c0_18] : memref<1x32xf32, #tpu.memory_space<vmem>>, vector<1x32xf32>
    %19 = vector.broadcast %18 : vector<1x32xf32> to vector<6x32xf32>
    %20 = arith.addf %17, %19 : vector<6x32xf32>
    %21 = vector.extract_strided_slice %10 {offsets = [0, 0], sizes = [6, 8], strides = [1, 1]} : vector<6x32xf32> to vector<6x8xf32>
    %22 = arith.truncf %21 : vector<6x8xf32> to vector<6x8xbf16>
    %23 = vector.extract_strided_slice %15 {offsets = [0, 0], sizes = [6, 8], strides = [1, 1]} : vector<6x32xf32> to vector<6x8xf32>
    %24 = arith.truncf %23 : vector<6x8xf32> to vector<6x8xbf16>
    %25 = vector.extract_strided_slice %20 {offsets = [0, 0], sizes = [6, 8], strides = [1, 1]} : vector<6x32xf32> to vector<6x8xf32>
    %26 = arith.truncf %25 : vector<6x8xf32> to vector<6x8xbf16>
    %cst_19 = arith.constant dense<0.000000e+00> : vector<6x6xf32>
    %27 = tpu.matmul %22, %24, %cst_19 {dimension_numbers = #tpu.dot_dimension_numbers<[1], [1], [0], [0], [0, 0, 1, 0], [], []>} : vector<6x8xbf16>, vector<6x8xbf16>, vector<6x6xf32> -> vector<6x6xf32>
    %cst_20 = arith.constant 0.353553385 : f32
    %28 = vector.broadcast %cst_20 : f32 to vector<6x6xf32>
    %29 = arith.mulf %27, %28 : vector<6x6xf32>
    %cst_21 = arith.constant dense<0xFF800000> : vector<6xf32>
    %30 = vector.multi_reduction <maximumf>, %29, %cst_21 [1] : vector<6x6xf32> to vector<6xf32>
    %31 = vector.shape_cast %30 : vector<6xf32> to vector<6x1xf32>
    %32 = vector.broadcast %31 : vector<6x1xf32> to vector<6x6xf32>
    %33 = arith.subf %29, %32 : vector<6x6xf32>
    %34 = math.exp %33 : vector<6x6xf32>
    %cst_22 = arith.constant dense<0.000000e+00> : vector<6xf32>
    %35 = vector.multi_reduction <add>, %34, %cst_22 [1] : vector<6x6xf32> to vector<6xf32>
    %36 = vector.shape_cast %35 : vector<6xf32> to vector<6x1xf32>
    %37 = vector.broadcast %36 : vector<6x1xf32> to vector<6x6xf32>
    %38 = arith.divf %34, %37 : vector<6x6xf32>
    %39 = arith.truncf %38 : vector<6x6xf32> to vector<6x6xbf16>
    %cst_23 = arith.constant dense<0.000000e+00> : vector<6x8xf32>
    %40 = tpu.matmul %39, %26, %cst_23 {dimension_numbers = #tpu.dot_dimension_numbers<[1], [0], [0], [1], [0, 0, 1, 1], [], []>} : vector<6x6xbf16>, vector<6x8xbf16>, vector<6x8xf32> -> vector<6x8xf32>
    %c0_24 = arith.constant 0 : index
    %c0_25 = arith.constant 0 : index
    %41 = vector.load %arg15[%c0_24, %c0_25] : memref<6x32xf32, #tpu.memory_space<vmem>>, vector<6x8xf32>
    tpu.vector_store %arg15[%c0_24, %c0_25], %40 {strides = array<i32>} : memref<6x32xf32, #tpu.memory_space<vmem>>, vector<6x8xf32>,
    %42 = vector.extract_strided_slice %10 {offsets = [0, 8], sizes = [6, 8], strides = [1, 1]} : vector<6x32xf32> to vector<6x8xf32>
    %43 = arith.truncf %42 : vector<6x8xf32> to vector<6x8xbf16>
    %44 = vector.extract_strided_slice %15 {offsets = [0, 8], sizes = [6, 8], strides = [1, 1]} : vector<6x32xf32> to vector<6x8xf32>
    %45 = arith.truncf %44 : vector<6x8xf32> to vector<6x8xbf16>
    %46 = vector.extract_strided_slice %20 {offsets = [0, 8], sizes = [6, 8], strides = [1, 1]} : vector<6x32xf32> to vector<6x8xf32>
    %47 = arith.truncf %46 : vector<6x8xf32> to vector<6x8xbf16>
    %cst_26 = arith.constant dense<0.000000e+00> : vector<6x6xf32>
    %48 = tpu.matmul %43, %45, %cst_26 {dimension_numbers = #tpu.dot_dimension_numbers<[1], [1], [0], [0], [0, 0, 1, 0], [], []>} : vector<6x8xbf16>, vector<6x8xbf16>, vector<6x6xf32> -> vector<6x6xf32>
    %cst_27 = arith.constant 0.353553385 : f32
    %49 = vector.broadcast %cst_27 : f32 to vector<6x6xf32>
    %50 = arith.mulf %48, %49 : vector<6x6xf32>
    %cst_28 = arith.constant dense<0xFF800000> : vector<6xf32>
    %51 = vector.multi_reduction <maximumf>, %50, %cst_28 [1] : vector<6x6xf32> to vector<6xf32>
    %52 = vector.shape_cast %51 : vector<6xf32> to vector<6x1xf32>
    %53 = vector.broadcast %52 : vector<6x1xf32> to vector<6x6xf32>
    %54 = arith.subf %50, %53 : vector<6x6xf32>
    %55 = math.exp %54 : vector<6x6xf32>
    %cst_29 = arith.constant dense<0.000000e+00> : vector<6xf32>
    %56 = vector.multi_reduction <add>, %55, %cst_29 [1] : vector<6x6xf32> to vector<6xf32>
    %57 = vector.shape_cast %56 : vector<6xf32> to vector<6x1xf32>
    %58 = vector.broadcast %57 : vector<6x1xf32> to vector<6x6xf32>
    %59 = arith.divf %55, %58 : vector<6x6xf32>
    %60 = arith.truncf %59 : vector<6x6xf32> to vector<6x6xbf16>
    %cst_30 = arith.constant dense<0.000000e+00> : vector<6x8xf32>
    %61 = tpu.matmul %60, %47, %cst_30 {dimension_numbers = #tpu.dot_dimension_numbers<[1], [0], [0], [1], [0, 0, 1, 1], [], []>} : vector<6x6xbf16>, vector<6x8xbf16>, vector<6x8xf32> -> vector<6x8xf32>
    %c0_31 = arith.constant 0 : index
    %c8 = arith.constant 8 : index
    %62 = vector.load %arg15[%c0_31, %c8] : memref<6x32xf32, #tpu.memory_space<vmem>>, vector<6x8xf32>
    tpu.vector_store %arg15[%c0_31, %c8], %61 {strides = array<i32>} : memref<6x32xf32, #tpu.memory_space<vmem>>, vector<6x8xf32>,
    %63 = vector.extract_strided_slice %10 {offsets = [0, 16], sizes = [6, 8], strides = [1, 1]} : vector<6x32xf32> to vector<6x8xf32>
    %64 = arith.truncf %63 : vector<6x8xf32> to vector<6x8xbf16>
    %65 = vector.extract_strided_slice %15 {offsets = [0, 16], sizes = [6, 8], strides = [1, 1]} : vector<6x32xf32> to vector<6x8xf32>
    %66 = arith.truncf %65 : vector<6x8xf32> to vector<6x8xbf16>
    %67 = vector.extract_strided_slice %20 {offsets = [0, 16], sizes = [6, 8], strides = [1, 1]} : vector<6x32xf32> to vector<6x8xf32>
    %68 = arith.truncf %67 : vector<6x8xf32> to vector<6x8xbf16>
    %cst_32 = arith.constant dense<0.000000e+00> : vector<6x6xf32>
    %69 = tpu.matmul %64, %66, %cst_32 {dimension_numbers = #tpu.dot_dimension_numbers<[1], [1], [0], [0], [0, 0, 1, 0], [], []>} : vector<6x8xbf16>, vector<6x8xbf16>, vector<6x6xf32> -> vector<6x6xf32>
    %cst_33 = arith.constant 0.353553385 : f32
    %70 = vector.broadcast %cst_33 : f32 to vector<6x6xf32>
    %71 = arith.mulf %69, %70 : vector<6x6xf32>
    %cst_34 = arith.constant dense<0xFF800000> : vector<6xf32>
    %72 = vector.multi_reduction <maximumf>, %71, %cst_34 [1] : vector<6x6xf32> to vector<6xf32>
    %73 = vector.shape_cast %72 : vector<6xf32> to vector<6x1xf32>
    %74 = vector.broadcast %73 : vector<6x1xf32> to vector<6x6xf32>
    %75 = arith.subf %71, %74 : vector<6x6xf32>
    %76 = math.exp %75 : vector<6x6xf32>
    %cst_35 = arith.constant dense<0.000000e+00> : vector<6xf32>
    %77 = vector.multi_reduction <add>, %76, %cst_35 [1] : vector<6x6xf32> to vector<6xf32>
    %78 = vector.shape_cast %77 : vector<6xf32> to vector<6x1xf32>
    %79 = vector.broadcast %78 : vector<6x1xf32> to vector<6x6xf32>
    %80 = arith.divf %76, %79 : vector<6x6xf32>
    %81 = arith.truncf %80 : vector<6x6xf32> to vector<6x6xbf16>
    %cst_36 = arith.constant dense<0.000000e+00> : vector<6x8xf32>
    %82 = tpu.matmul %81, %68, %cst_36 {dimension_numbers = #tpu.dot_dimension_numbers<[1], [0], [0], [1], [0, 0, 1, 1], [], []>} : vector<6x6xbf16>, vector<6x8xbf16>, vector<6x8xf32> -> vector<6x8xf32>
    %c0_37 = arith.constant 0 : index
    %c16 = arith.constant 16 : index
    %83 = vector.load %arg15[%c0_37, %c16] : memref<6x32xf32, #tpu.memory_space<vmem>>, vector<6x8xf32>
    tpu.vector_store %arg15[%c0_37, %c16], %82 {strides = array<i32>} : memref<6x32xf32, #tpu.memory_space<vmem>>, vector<6x8xf32>,
    %84 = vector.extract_strided_slice %10 {offsets = [0, 24], sizes = [6, 8], strides = [1, 1]} : vector<6x32xf32> to vector<6x8xf32>
    %85 = arith.truncf %84 : vector<6x8xf32> to vector<6x8xbf16>
    %86 = vector.extract_strided_slice %15 {offsets = [0, 24], sizes = [6, 8], strides = [1, 1]} : vector<6x32xf32> to vector<6x8xf32>
    %87 = arith.truncf %86 : vector<6x8xf32> to vector<6x8xbf16>
    %88 = vector.extract_strided_slice %20 {offsets = [0, 24], sizes = [6, 8], strides = [1, 1]} : vector<6x32xf32> to vector<6x8xf32>
    %89 = arith.truncf %88 : vector<6x8xf32> to vector<6x8xbf16>
    %cst_38 = arith.constant dense<0.000000e+00> : vector<6x6xf32>
    %90 = tpu.matmul %85, %87, %cst_38 {dimension_numbers = #tpu.dot_dimension_numbers<[1], [1], [0], [0], [0, 0, 1, 0], [], []>} : vector<6x8xbf16>, vector<6x8xbf16>, vector<6x6xf32> -> vector<6x6xf32>
    %cst_39 = arith.constant 0.353553385 : f32
    %91 = vector.broadcast %cst_39 : f32 to vector<6x6xf32>
    %92 = arith.mulf %90, %91 : vector<6x6xf32>
    %cst_40 = arith.constant dense<0xFF800000> : vector<6xf32>
    %93 = vector.multi_reduction <maximumf>, %92, %cst_40 [1] : vector<6x6xf32> to vector<6xf32>
    %94 = vector.shape_cast %93 : vector<6xf32> to vector<6x1xf32>
    %95 = vector.broadcast %94 : vector<6x1xf32> to vector<6x6xf32>
    %96 = arith.subf %92, %95 : vector<6x6xf32>
    %97 = math.exp %96 : vector<6x6xf32>
    %cst_41 = arith.constant dense<0.000000e+00> : vector<6xf32>
    %98 = vector.multi_reduction <add>, %97, %cst_41 [1] : vector<6x6xf32> to vector<6xf32>
    %99 = vector.shape_cast %98 : vector<6xf32> to vector<6x1xf32>
    %100 = vector.broadcast %99 : vector<6x1xf32> to vector<6x6xf32>
    %101 = arith.divf %97, %100 : vector<6x6xf32>
    %102 = arith.truncf %101 : vector<6x6xf32> to vector<6x6xbf16>
    %cst_42 = arith.constant dense<0.000000e+00> : vector<6x8xf32>
    %103 = tpu.matmul %102, %89, %cst_42 {dimension_numbers = #tpu.dot_dimension_numbers<[1], [0], [0], [1], [0, 0, 1, 1], [], []>} : vector<6x6xbf16>, vector<6x8xbf16>, vector<6x8xf32> -> vector<6x8xf32>
    %c0_43 = arith.constant 0 : index
    %c24 = arith.constant 24 : index
    %104 = vector.load %arg15[%c0_43, %c24] : memref<6x32xf32, #tpu.memory_space<vmem>>, vector<6x8xf32>
    tpu.vector_store %arg15[%c0_43, %c24], %103 {strides = array<i32>} : memref<6x32xf32, #tpu.memory_space<vmem>>, vector<6x8xf32>,
    %c0_44 = arith.constant 0 : index
    %c0_45 = arith.constant 0 : index
    %105 = vector.load %arg15[%c0_44, %c0_45] : memref<6x32xf32, #tpu.memory_space<vmem>>, vector<6x32xf32>
    %106 = arith.truncf %105 : vector<6x32xf32> to vector<6x32xbf16>
    %c0_46 = arith.constant 0 : index
    %c0_47 = arith.constant 0 : index
    %107 = vector.load %arg10[%c0_46, %c0_47] : memref<32x32xbf16, #tpu.memory_space<vmem>>, vector<32x32xbf16>
    %cst_48 = arith.constant dense<0.000000e+00> : vector<6x32xf32>
    %108 = tpu.matmul %106, %107, %cst_48 {dimension_numbers = #tpu.dot_dimension_numbers<[1], [0], [0], [1], [0, 0, 1, 1], [], []>} : vector<6x32xbf16>, vector<32x32xbf16>, vector<6x32xf32> -> vector<6x32xf32>
    %c0_49 = arith.constant 0 : index
    %c0_50 = arith.constant 0 : index
    %109 = vector.load %arg11[%c0_49, %c0_50] : memref<1x32xf32, #tpu.memory_space<vmem>>, vector<1x32xf32>
    %110 = vector.broadcast %109 : vector<1x32xf32> to vector<6x32xf32>
    %111 = arith.addf %108, %110 : vector<6x32xf32>
    %112 = arith.addf %1, %111 : vector<6x32xf32>
    %cst_51 = arith.constant dense<0.000000e+00> : vector<6xf32>
    %113 = vector.multi_reduction <add>, %112, %cst_51 [1] : vector<6x32xf32> to vector<6xf32>
    %114 = vector.shape_cast %113 : vector<6xf32> to vector<6x1xf32>
    %cst_52 = arith.constant 3.200000e+01 : f32
    %115 = vector.broadcast %cst_52 : f32 to vector<6x1xf32>
    %116 = arith.divf %114, %115 : vector<6x1xf32>
    %117 = vector.broadcast %116 : vector<6x1xf32> to vector<6x32xf32>
    %118 = arith.subf %112, %117 : vector<6x32xf32>
    %119 = arith.mulf %118, %118 : vector<6x32xf32>
    %cst_53 = arith.constant dense<0.000000e+00> : vector<6xf32>
    %120 = vector.multi_reduction <add>, %119, %cst_53 [1] : vector<6x32xf32> to vector<6xf32>
    %121 = vector.shape_cast %120 : vector<6xf32> to vector<6x1xf32>
    %cst_54 = arith.constant 3.200000e+01 : f32
    %122 = vector.broadcast %cst_54 : f32 to vector<6x1xf32>
    %123 = arith.divf %121, %122 : vector<6x1xf32>
    %124 = vector.broadcast %116 : vector<6x1xf32> to vector<6x32xf32>
    %125 = arith.subf %112, %124 : vector<6x32xf32>
    %cst_55 = arith.constant 9.99999974E-6 : f32
    %126 = vector.broadcast %cst_55 : f32 to vector<6x1xf32>
    %127 = arith.addf %123, %126 : vector<6x1xf32>
    %128 = math.rsqrt %127 : vector<6x1xf32>
    %129 = vector.broadcast %128 : vector<6x1xf32> to vector<6x32xf32>
    %130 = arith.mulf %125, %129 : vector<6x32xf32>
    %c0_56 = arith.constant 0 : index
    %c0_57 = arith.constant 0 : index
    %131 = vector.load %arg12[%c0_56, %c0_57] : memref<1x32xf32, #tpu.memory_space<vmem>>, vector<1x32xf32>
    %132 = vector.broadcast %131 : vector<1x32xf32> to vector<6x32xf32>
    %133 = arith.mulf %130, %132 : vector<6x32xf32>
    %c0_58 = arith.constant 0 : index
    %c0_59 = arith.constant 0 : index
    %134 = vector.load %arg13[%c0_58, %c0_59] : memref<1x32xf32, #tpu.memory_space<vmem>>, vector<1x32xf32>
    %135 = vector.broadcast %134 : vector<1x32xf32> to vector<6x32xf32>
    %136 = arith.addf %133, %135 : vector<6x32xf32>
    %c0_60 = arith.constant 0 : index
    %c0_61 = arith.constant 0 : index
    %c0_62 = arith.constant 0 : index
    %137 = vector.load %arg14[%c0_60, %c0_61, %c0_62] : memref<1x6x32xf32, #tpu.memory_space<vmem>>, vector<1x6x32xf32>
    %138 = vector.shape_cast %137 : vector<1x6x32xf32> to vector<6x32xf32>
    %139 = vector.shape_cast %136 : vector<6x32xf32> to vector<1x6x32xf32>
    tpu.vector_store %arg14[%c0_60, %c0_61, %c0_62], %139 {strides = array<i32>} : memref<1x6x32xf32, #tpu.memory_space<vmem>>, vector<1x6x32xf32>,
    return
  }
  func.func @transform_0(%arg0: i32, %arg1: i32) -> (i32, i32, i32) {
    %c0_i32 = arith.constant 0 : i32
    %c0_i32_0 = arith.constant 0 : i32
    return %arg0, %arg1, %c0_i32 : i32, i32, i32
  }
  func.func @transform_1(%arg0: i32, %arg1: i32) -> (i32, i32, i32) {
    %c0_i32 = arith.constant 0 : i32
    %c0_i32_0 = arith.constant 0 : i32
    %c0_i32_1 = arith.constant 0 : i32
    return %arg0, %c0_i32, %c0_i32_0 : i32, i32, i32
  }
  func.func @transform_2(%arg0: i32, %arg1: i32) -> (i32, i32) {
    %c0_i32 = arith.constant 0 : i32
    %c0_i32_0 = arith.constant 0 : i32
    %c0_i32_1 = arith.constant 0 : i32
    return %c0_i32, %c0_i32_0 : i32, i32
  }
  func.func @transform_3(%arg0: i32, %arg1: i32) -> (i32, i32) {
    %c0_i32 = arith.constant 0 : i32
    %c0_i32_0 = arith.constant 0 : i32
    %c0_i32_1 = arith.constant 0 : i32
    return %c0_i32, %c0_i32_0 : i32, i32
  }
  func.func @transform_4(%arg0: i32, %arg1: i32) -> (i32, i32) {
    %c0_i32 = arith.constant 0 : i32
    %c0_i32_0 = arith.constant 0 : i32
    %c0_i32_1 = arith.constant 0 : i32
    return %c0_i32, %c0_i32_0 : i32, i32
  }
  func.func @transform_5(%arg0: i32, %arg1: i32) -> (i32, i32) {
    %c0_i32 = arith.constant 0 : i32
    %c0_i32_0 = arith.constant 0 : i32
    %c0_i32_1 = arith.constant 0 : i32
    return %c0_i32, %c0_i32_0 : i32, i32
  }
  func.func @transform_6(%arg0: i32, %arg1: i32) -> (i32, i32) {
    %c0_i32 = arith.constant 0 : i32
    %c0_i32_0 = arith.constant 0 : i32
    %c0_i32_1 = arith.constant 0 : i32
    return %c0_i32, %c0_i32_0 : i32, i32
  }
  func.func @transform_7(%arg0: i32, %arg1: i32) -> (i32, i32) {
    %c0_i32 = arith.constant 0 : i32
    %c0_i32_0 = arith.constant 0 : i32
    %c0_i32_1 = arith.constant 0 : i32
    return %c0_i32, %c0_i32_0 : i32, i32
  }
  func.func @transform_8(%arg0: i32, %arg1: i32) -> (i32, i32) {
    %c0_i32 = arith.constant 0 : i32
    %c0_i32_0 = arith.constant 0 : i32
    %c0_i32_1 = arith.constant 0 : i32
    return %c0_i32, %c0_i32_0 : i32, i32
  }
  func.func @transform_9(%arg0: i32, %arg1: i32) -> (i32, i32) {
    %c0_i32 = arith.constant 0 : i32
    %c0_i32_0 = arith.constant 0 : i32
    %c0_i32_1 = arith.constant 0 : i32
    return %c0_i32, %c0_i32_0 : i32, i32
  }
  func.func @transform_10(%arg0: i32, %arg1: i32) -> (i32, i32) {
    %c0_i32 = arith.constant 0 : i32
    %c0_i32_0 = arith.constant 0 : i32
    %c0_i32_1 = arith.constant 0 : i32
    return %c0_i32, %c0_i32_0 : i32, i32
  }
  func.func @transform_11(%arg0: i32, %arg1: i32) -> (i32, i32) {
    %c0_i32 = arith.constant 0 : i32
    %c0_i32_0 = arith.constant 0 : i32
    %c0_i32_1 = arith.constant 0 : i32
    return %c0_i32, %c0_i32_0 : i32, i32
  }
  func.func @transform_12(%arg0: i32, %arg1: i32) -> (i32, i32, i32) {
    %c0_i32 = arith.constant 0 : i32
    %c0_i32_0 = arith.constant 0 : i32
    return %arg0, %arg1, %c0_i32 : i32, i32, i32
  }
}

module attributes {stable_mosaic.version = 11 : i64} {
  func.func @_mha_kernel(%arg0: i32, %arg1: i32, %arg2: memref<1x6x32xf32, #tpu.memory_space<vmem>>, %arg3: memref<1x8x32xf32, #tpu.memory_space<vmem>>, %arg4: memref<32x32xbf16, #tpu.memory_space<vmem>>, %arg5: memref<32x32xbf16, #tpu.memory_space<vmem>>, %arg6: memref<32x32xbf16, #tpu.memory_space<vmem>>, %arg7: memref<1x32xf32, #tpu.memory_space<vmem>>, %arg8: memref<1x32xf32, #tpu.memory_space<vmem>>, %arg9: memref<1x32xf32, #tpu.memory_space<vmem>>, %arg10: memref<32x32xbf16, #tpu.memory_space<vmem>>, %arg11: memref<1x32xf32, #tpu.memory_space<vmem>>, %arg12: memref<1x32xf32, #tpu.memory_space<vmem>>, %arg13: memref<1x32xf32, #tpu.memory_space<vmem>>, %arg14: memref<1x6x32xf32, #tpu.memory_space<vmem>>, %arg15: memref<6x32xf32, #tpu.memory_space<vmem>>) attributes {dimension_semantics = [#tpu.dimension_semantics<parallel>, #tpu.dimension_semantics<parallel>], iteration_bounds = array<i64: 2, 1>, scalar_prefetch = 0 : i64, scratch_operands = 1 : i64, tpu.core_type = #tpu.core_type<tc>, window_params = [{transform_indices = @transform_0, window_bounds = array<i64: 1, 6, 32>}, {transform_indices = @transform_1, window_bounds = array<i64: 1, 8, 32>}, {pipeline_mode = #tpu.pipeline_mode<synchronous>, transform_indices = @transform_2, window_bounds = array<i64: 32, 32>}, {pipeline_mode = #tpu.pipeline_mode<synchronous>, transform_indices = @transform_3, window_bounds = array<i64: 32, 32>}, {pipeline_mode = #tpu.pipeline_mode<synchronous>, transform_indices = @transform_4, window_bounds = array<i64: 32, 32>}, {pipeline_mode = #tpu.pipeline_mode<synchronous>, transform_indices = @transform_5, window_bounds = array<i64: 1, 32>}, {pipeline_mode = #tpu.pipeline_mode<synchronous>, transform_indices = @transform_6, window_bounds = array<i64: 1, 32>}, {pipeline_mode = #tpu.pipeline_mode<synchronous>, transform_indices = @transform_7, window_bounds = array<i64: 1, 32>}, {pipeline_mode = #tpu.pipeline_mode<synchronous>, transform_indices = @transform_8, window_bounds = array<i64: 32, 32>}, {pipeline_mode = #tpu.pipeline_mode<synchronous>, transform_indices = @transform_9, window_bounds = array<i64: 1, 32>}, {pipeline_mode = #tpu.pipeline_mode<synchronous>, transform_indices = @transform_10, window_bounds = array<i64: 1, 32>}, {pipeline_mode = #tpu.pipeline_mode<synchronous>, transform_indices = @transform_11, window_bounds = array<i64: 1, 32>}, {transform_indices = @transform_12, window_bounds = array<i64: 1, 6, 32>}]} {
    %c0 = arith.constant 0 : index
    %c0_0 = arith.constant 0 : index
    %c0_1 = arith.constant 0 : index
    %0 = vector.load %arg2[%c0, %c0_0, %c0_1] : memref<1x6x32xf32, #tpu.memory_space<vmem>>, vector<1x6x32xf32>
    %1 = vector.shape_cast %0 : vector<1x6x32xf32> to vector<6x32xf32>
    %c0_2 = arith.constant 0 : index
    %c0_3 = arith.constant 0 : index
    %c0_4 = arith.constant 0 : index
    %2 = vector.load %arg3[%c0_2, %c0_3, %c0_4] : memref<1x8x32xf32, #tpu.memory_space<vmem>>, vector<1x8x32xf32>
    %3 = vector.shape_cast %2 : vector<1x8x32xf32> to vector<8x32xf32>
    %4 = arith.truncf %1 : vector<6x32xf32> to vector<6x32xbf16>
    %5 = arith.truncf %3 : vector<8x32xf32> to vector<8x32xbf16>
    %c0_5 = arith.constant 0 : index
    %c0_6 = arith.constant 0 : index
    %6 = vector.load %arg4[%c0_5, %c0_6] : memref<32x32xbf16, #tpu.memory_space<vmem>>, vector<32x32xbf16>
    %cst = arith.constant dense<0.000000e+00> : vector<6x32xf32>
    %7 = tpu.matmul %4, %6, %cst {dimension_numbers = #tpu.dot_dimension_numbers<[1], [0], [0], [1], [0, 0, 1, 1], [], []>} : vector<6x32xbf16>, vector<32x32xbf16>, vector<6x32xf32> -> vector<6x32xf32>
    %c0_7 = arith.constant 0 : index
    %c0_8 = arith.constant 0 : index
    %8 = vector.load %arg7[%c0_7, %c0_8] : memref<1x32xf32, #tpu.memory_space<vmem>>, vector<1x32xf32>
    %9 = vector.broadcast %8 : vector<1x32xf32> to vector<6x32xf32>
    %10 = arith.addf %7, %9 : vector<6x32xf32>
    %c0_9 = arith.constant 0 : index
    %c0_10 = arith.constant 0 : index
    %11 = vector.load %arg5[%c0_9, %c0_10] : memref<32x32xbf16, #tpu.memory_space<vmem>>, vector<32x32xbf16>
    %cst_11 = arith.constant dense<0.000000e+00> : vector<8x32xf32>
    %12 = tpu.matmul %5, %11, %cst_11 {dimension_numbers = #tpu.dot_dimension_numbers<[1], [0], [0], [1], [0, 0, 1, 1], [], []>} : vector<8x32xbf16>, vector<32x32xbf16>, vector<8x32xf32> -> vector<8x32xf32>
    %c0_12 = arith.constant 0 : index
    %c0_13 = arith.constant 0 : index
    %13 = vector.load %arg8[%c0_12, %c0_13] : memref<1x32xf32, #tpu.memory_space<vmem>>, vector<1x32xf32>
    %14 = vector.broadcast %13 : vector<1x32xf32> to vector<8x32xf32>
    %15 = arith.addf %12, %14 : vector<8x32xf32>
    %c0_14 = arith.constant 0 : index
    %c0_15 = arith.constant 0 : index
    %16 = vector.load %arg6[%c0_14, %c0_15] : memref<32x32xbf16, #tpu.memory_space<vmem>>, vector<32x32xbf16>
    %cst_16 = arith.constant dense<0.000000e+00> : vector<8x32xf32>
    %17 = tpu.matmul %5, %16, %cst_16 {dimension_numbers = #tpu.dot_dimension_numbers<[1], [0], [0], [1], [0, 0, 1, 1], [], []>} : vector<8x32xbf16>, vector<32x32xbf16>, vector<8x32xf32> -> vector<8x32xf32>
    %c0_17 = arith.constant 0 : index
    %c0_18 = arith.constant 0 : index
    %18 = vector.load %arg9[%c0_17, %c0_18] : memref<1x32xf32, #tpu.memory_space<vmem>>, vector<1x32xf32>
    %19 = vector.broadcast %18 : vector<1x32xf32> to vector<8x32xf32>
    %20 = arith.addf %17, %19 : vector<8x32xf32>
    %21 = vector.extract_strided_slice %10 {offsets = [0, 0], sizes = [6, 8], strides = [1, 1]} : vector<6x32xf32> to vector<6x8xf32>
    %22 = arith.truncf %21 : vector<6x8xf32> to vector<6x8xbf16>
    %23 = vector.extract_strided_slice %15 {offsets = [0, 0], sizes = [8, 8], strides = [1, 1]} : vector<8x32xf32> to vector<8x8xf32>
    %24 = arith.truncf %23 : vector<8x8xf32> to vector<8x8xbf16>
    %25 = vector.extract_strided_slice %20 {offsets = [0, 0], sizes = [8, 8], strides = [1, 1]} : vector<8x32xf32> to vector<8x8xf32>
    %26 = arith.truncf %25 : vector<8x8xf32> to vector<8x8xbf16>
    %cst_19 = arith.constant dense<0.000000e+00> : vector<6x8xf32>
    %27 = tpu.matmul %22, %24, %cst_19 {dimension_numbers = #tpu.dot_dimension_numbers<[1], [1], [0], [0], [0, 0, 1, 0], [], []>} : vector<6x8xbf16>, vector<8x8xbf16>, vector<6x8xf32> -> vector<6x8xf32>
    %cst_20 = arith.constant 0.353553385 : f32
    %28 = vector.broadcast %cst_20 : f32 to vector<6x8xf32>
    %29 = arith.mulf %27, %28 : vector<6x8xf32>
    %cst_21 = arith.constant dense<0xFF800000> : vector<6xf32>
    %30 = vector.multi_reduction <maximumf>, %29, %cst_21 [1] : vector<6x8xf32> to vector<6xf32>
    %31 = vector.shape_cast %30 : vector<6xf32> to vector<6x1xf32>
    %32 = vector.broadcast %31 : vector<6x1xf32> to vector<6x8xf32>
    %33 = arith.subf %29, %32 : vector<6x8xf32>
    %34 = math.exp %33 : vector<6x8xf32>
    %cst_22 = arith.constant dense<0.000000e+00> : vector<6xf32>
    %35 = vector.multi_reduction <add>, %34, %cst_22 [1] : vector<6x8xf32> to vector<6xf32>
    %36 = vector.shape_cast %35 : vector<6xf32> to vector<6x1xf32>
    %37 = vector.broadcast %36 : vector<6x1xf32> to vector<6x8xf32>
    %38 = arith.divf %34, %37 : vector<6x8xf32>
    %39 = arith.truncf %38 : vector<6x8xf32> to vector<6x8xbf16>
    %cst_23 = arith.constant dense<0.000000e+00> : vector<6x8xf32>
    %40 = tpu.matmul %39, %26, %cst_23 {dimension_numbers = #tpu.dot_dimension_numbers<[1], [0], [0], [1], [0, 0, 1, 1], [], []>} : vector<6x8xbf16>, vector<8x8xbf16>, vector<6x8xf32> -> vector<6x8xf32>
    %c0_24 = arith.constant 0 : index
    %c0_25 = arith.constant 0 : index
    %41 = vector.load %arg15[%c0_24, %c0_25] : memref<6x32xf32, #tpu.memory_space<vmem>>, vector<6x8xf32>
    tpu.vector_store %arg15[%c0_24, %c0_25], %40 {strides = array<i32>} : memref<6x32xf32, #tpu.memory_space<vmem>>, vector<6x8xf32>,
    %42 = vector.extract_strided_slice %10 {offsets = [0, 8], sizes = [6, 8], strides = [1, 1]} : vector<6x32xf32> to vector<6x8xf32>
    %43 = arith.truncf %42 : vector<6x8xf32> to vector<6x8xbf16>
    %44 = vector.extract_strided_slice %15 {offsets = [0, 8], sizes = [8, 8], strides = [1, 1]} : vector<8x32xf32> to vector<8x8xf32>
    %45 = arith.truncf %44 : vector<8x8xf32> to vector<8x8xbf16>
    %46 = vector.extract_strided_slice %20 {offsets = [0, 8], sizes = [8, 8], strides = [1, 1]} : vector<8x32xf32> to vector<8x8xf32>
    %47 = arith.truncf %46 : vector<8x8xf32> to vector<8x8xbf16>
    %cst_26 = arith.constant dense<0.000000e+00> : vector<6x8xf32>
    %48 = tpu.matmul %43, %45, %cst_26 {dimension_numbers = #tpu.dot_dimension_numbers<[1], [1], [0], [0], [0, 0, 1, 0], [], []>} : vector<6x8xbf16>, vector<8x8xbf16>, vector<6x8xf32> -> vector<6x8xf32>
    %cst_27 = arith.constant 0.353553385 : f32
    %49 = vector.broadcast %cst_27 : f32 to vector<6x8xf32>
    %50 = arith.mulf %48, %49 : vector<6x8xf32>
    %cst_28 = arith.constant dense<0xFF800000> : vector<6xf32>
    %51 = vector.multi_reduction <maximumf>, %50, %cst_28 [1] : vector<6x8xf32> to vector<6xf32>
    %52 = vector.shape_cast %51 : vector<6xf32> to vector<6x1xf32>
    %53 = vector.broadcast %52 : vector<6x1xf32> to vector<6x8xf32>
    %54 = arith.subf %50, %53 : vector<6x8xf32>
    %55 = math.exp %54 : vector<6x8xf32>
    %cst_29 = arith.constant dense<0.000000e+00> : vector<6xf32>
    %56 = vector.multi_reduction <add>, %55, %cst_29 [1] : vector<6x8xf32> to vector<6xf32>
    %57 = vector.shape_cast %56 : vector<6xf32> to vector<6x1xf32>
    %58 = vector.broadcast %57 : vector<6x1xf32> to vector<6x8xf32>
    %59 = arith.divf %55, %58 : vector<6x8xf32>
    %60 = arith.truncf %59 : vector<6x8xf32> to vector<6x8xbf16>
    %cst_30 = arith.constant dense<0.000000e+00> : vector<6x8xf32>
    %61 = tpu.matmul %60, %47, %cst_30 {dimension_numbers = #tpu.dot_dimension_numbers<[1], [0], [0], [1], [0, 0, 1, 1], [], []>} : vector<6x8xbf16>, vector<8x8xbf16>, vector<6x8xf32> -> vector<6x8xf32>
    %c0_31 = arith.constant 0 : index
    %c8 = arith.constant 8 : index
    %62 = vector.load %arg15[%c0_31, %c8] : memref<6x32xf32, #tpu.memory_space<vmem>>, vector<6x8xf32>
    tpu.vector_store %arg15[%c0_31, %c8], %61 {strides = array<i32>} : memref<6x32xf32, #tpu.memory_space<vmem>>, vector<6x8xf32>,
    %63 = vector.extract_strided_slice %10 {offsets = [0, 16], sizes = [6, 8], strides = [1, 1]} : vector<6x32xf32> to vector<6x8xf32>
    %64 = arith.truncf %63 : vector<6x8xf32> to vector<6x8xbf16>
    %65 = vector.extract_strided_slice %15 {offsets = [0, 16], sizes = [8, 8], strides = [1, 1]} : vector<8x32xf32> to vector<8x8xf32>
    %66 = arith.truncf %65 : vector<8x8xf32> to vector<8x8xbf16>
    %67 = vector.extract_strided_slice %20 {offsets = [0, 16], sizes = [8, 8], strides = [1, 1]} : vector<8x32xf32> to vector<8x8xf32>
    %68 = arith.truncf %67 : vector<8x8xf32> to vector<8x8xbf16>
    %cst_32 = arith.constant dense<0.000000e+00> : vector<6x8xf32>
    %69 = tpu.matmul %64, %66, %cst_32 {dimension_numbers = #tpu.dot_dimension_numbers<[1], [1], [0], [0], [0, 0, 1, 0], [], []>} : vector<6x8xbf16>, vector<8x8xbf16>, vector<6x8xf32> -> vector<6x8xf32>
    %cst_33 = arith.constant 0.353553385 : f32
    %70 = vector.broadcast %cst_33 : f32 to vector<6x8xf32>
    %71 = arith.mulf %69, %70 : vector<6x8xf32>
    %cst_34 = arith.constant dense<0xFF800000> : vector<6xf32>
    %72 = vector.multi_reduction <maximumf>, %71, %cst_34 [1] : vector<6x8xf32> to vector<6xf32>
    %73 = vector.shape_cast %72 : vector<6xf32> to vector<6x1xf32>
    %74 = vector.broadcast %73 : vector<6x1xf32> to vector<6x8xf32>
    %75 = arith.subf %71, %74 : vector<6x8xf32>
    %76 = math.exp %75 : vector<6x8xf32>
    %cst_35 = arith.constant dense<0.000000e+00> : vector<6xf32>
    %77 = vector.multi_reduction <add>, %76, %cst_35 [1] : vector<6x8xf32> to vector<6xf32>
    %78 = vector.shape_cast %77 : vector<6xf32> to vector<6x1xf32>
    %79 = vector.broadcast %78 : vector<6x1xf32> to vector<6x8xf32>
    %80 = arith.divf %76, %79 : vector<6x8xf32>
    %81 = arith.truncf %80 : vector<6x8xf32> to vector<6x8xbf16>
    %cst_36 = arith.constant dense<0.000000e+00> : vector<6x8xf32>
    %82 = tpu.matmul %81, %68, %cst_36 {dimension_numbers = #tpu.dot_dimension_numbers<[1], [0], [0], [1], [0, 0, 1, 1], [], []>} : vector<6x8xbf16>, vector<8x8xbf16>, vector<6x8xf32> -> vector<6x8xf32>
    %c0_37 = arith.constant 0 : index
    %c16 = arith.constant 16 : index
    %83 = vector.load %arg15[%c0_37, %c16] : memref<6x32xf32, #tpu.memory_space<vmem>>, vector<6x8xf32>
    tpu.vector_store %arg15[%c0_37, %c16], %82 {strides = array<i32>} : memref<6x32xf32, #tpu.memory_space<vmem>>, vector<6x8xf32>,
    %84 = vector.extract_strided_slice %10 {offsets = [0, 24], sizes = [6, 8], strides = [1, 1]} : vector<6x32xf32> to vector<6x8xf32>
    %85 = arith.truncf %84 : vector<6x8xf32> to vector<6x8xbf16>
    %86 = vector.extract_strided_slice %15 {offsets = [0, 24], sizes = [8, 8], strides = [1, 1]} : vector<8x32xf32> to vector<8x8xf32>
    %87 = arith.truncf %86 : vector<8x8xf32> to vector<8x8xbf16>
    %88 = vector.extract_strided_slice %20 {offsets = [0, 24], sizes = [8, 8], strides = [1, 1]} : vector<8x32xf32> to vector<8x8xf32>
    %89 = arith.truncf %88 : vector<8x8xf32> to vector<8x8xbf16>
    %cst_38 = arith.constant dense<0.000000e+00> : vector<6x8xf32>
    %90 = tpu.matmul %85, %87, %cst_38 {dimension_numbers = #tpu.dot_dimension_numbers<[1], [1], [0], [0], [0, 0, 1, 0], [], []>} : vector<6x8xbf16>, vector<8x8xbf16>, vector<6x8xf32> -> vector<6x8xf32>
    %cst_39 = arith.constant 0.353553385 : f32
    %91 = vector.broadcast %cst_39 : f32 to vector<6x8xf32>
    %92 = arith.mulf %90, %91 : vector<6x8xf32>
    %cst_40 = arith.constant dense<0xFF800000> : vector<6xf32>
    %93 = vector.multi_reduction <maximumf>, %92, %cst_40 [1] : vector<6x8xf32> to vector<6xf32>
    %94 = vector.shape_cast %93 : vector<6xf32> to vector<6x1xf32>
    %95 = vector.broadcast %94 : vector<6x1xf32> to vector<6x8xf32>
    %96 = arith.subf %92, %95 : vector<6x8xf32>
    %97 = math.exp %96 : vector<6x8xf32>
    %cst_41 = arith.constant dense<0.000000e+00> : vector<6xf32>
    %98 = vector.multi_reduction <add>, %97, %cst_41 [1] : vector<6x8xf32> to vector<6xf32>
    %99 = vector.shape_cast %98 : vector<6xf32> to vector<6x1xf32>
    %100 = vector.broadcast %99 : vector<6x1xf32> to vector<6x8xf32>
    %101 = arith.divf %97, %100 : vector<6x8xf32>
    %102 = arith.truncf %101 : vector<6x8xf32> to vector<6x8xbf16>
    %cst_42 = arith.constant dense<0.000000e+00> : vector<6x8xf32>
    %103 = tpu.matmul %102, %89, %cst_42 {dimension_numbers = #tpu.dot_dimension_numbers<[1], [0], [0], [1], [0, 0, 1, 1], [], []>} : vector<6x8xbf16>, vector<8x8xbf16>, vector<6x8xf32> -> vector<6x8xf32>
    %c0_43 = arith.constant 0 : index
    %c24 = arith.constant 24 : index
    %104 = vector.load %arg15[%c0_43, %c24] : memref<6x32xf32, #tpu.memory_space<vmem>>, vector<6x8xf32>
    tpu.vector_store %arg15[%c0_43, %c24], %103 {strides = array<i32>} : memref<6x32xf32, #tpu.memory_space<vmem>>, vector<6x8xf32>,
    %c0_44 = arith.constant 0 : index
    %c0_45 = arith.constant 0 : index
    %105 = vector.load %arg15[%c0_44, %c0_45] : memref<6x32xf32, #tpu.memory_space<vmem>>, vector<6x32xf32>
    %106 = arith.truncf %105 : vector<6x32xf32> to vector<6x32xbf16>
    %c0_46 = arith.constant 0 : index
    %c0_47 = arith.constant 0 : index
    %107 = vector.load %arg10[%c0_46, %c0_47] : memref<32x32xbf16, #tpu.memory_space<vmem>>, vector<32x32xbf16>
    %cst_48 = arith.constant dense<0.000000e+00> : vector<6x32xf32>
    %108 = tpu.matmul %106, %107, %cst_48 {dimension_numbers = #tpu.dot_dimension_numbers<[1], [0], [0], [1], [0, 0, 1, 1], [], []>} : vector<6x32xbf16>, vector<32x32xbf16>, vector<6x32xf32> -> vector<6x32xf32>
    %c0_49 = arith.constant 0 : index
    %c0_50 = arith.constant 0 : index
    %109 = vector.load %arg11[%c0_49, %c0_50] : memref<1x32xf32, #tpu.memory_space<vmem>>, vector<1x32xf32>
    %110 = vector.broadcast %109 : vector<1x32xf32> to vector<6x32xf32>
    %111 = arith.addf %108, %110 : vector<6x32xf32>
    %112 = arith.addf %1, %111 : vector<6x32xf32>
    %cst_51 = arith.constant dense<0.000000e+00> : vector<6xf32>
    %113 = vector.multi_reduction <add>, %112, %cst_51 [1] : vector<6x32xf32> to vector<6xf32>
    %114 = vector.shape_cast %113 : vector<6xf32> to vector<6x1xf32>
    %cst_52 = arith.constant 3.200000e+01 : f32
    %115 = vector.broadcast %cst_52 : f32 to vector<6x1xf32>
    %116 = arith.divf %114, %115 : vector<6x1xf32>
    %117 = vector.broadcast %116 : vector<6x1xf32> to vector<6x32xf32>
    %118 = arith.subf %112, %117 : vector<6x32xf32>
    %119 = arith.mulf %118, %118 : vector<6x32xf32>
    %cst_53 = arith.constant dense<0.000000e+00> : vector<6xf32>
    %120 = vector.multi_reduction <add>, %119, %cst_53 [1] : vector<6x32xf32> to vector<6xf32>
    %121 = vector.shape_cast %120 : vector<6xf32> to vector<6x1xf32>
    %cst_54 = arith.constant 3.200000e+01 : f32
    %122 = vector.broadcast %cst_54 : f32 to vector<6x1xf32>
    %123 = arith.divf %121, %122 : vector<6x1xf32>
    %124 = vector.broadcast %116 : vector<6x1xf32> to vector<6x32xf32>
    %125 = arith.subf %112, %124 : vector<6x32xf32>
    %cst_55 = arith.constant 9.99999974E-6 : f32
    %126 = vector.broadcast %cst_55 : f32 to vector<6x1xf32>
    %127 = arith.addf %123, %126 : vector<6x1xf32>
    %128 = math.rsqrt %127 : vector<6x1xf32>
    %129 = vector.broadcast %128 : vector<6x1xf32> to vector<6x32xf32>
    %130 = arith.mulf %125, %129 : vector<6x32xf32>
    %c0_56 = arith.constant 0 : index
    %c0_57 = arith.constant 0 : index
    %131 = vector.load %arg12[%c0_56, %c0_57] : memref<1x32xf32, #tpu.memory_space<vmem>>, vector<1x32xf32>
    %132 = vector.broadcast %131 : vector<1x32xf32> to vector<6x32xf32>
    %133 = arith.mulf %130, %132 : vector<6x32xf32>
    %c0_58 = arith.constant 0 : index
    %c0_59 = arith.constant 0 : index
    %134 = vector.load %arg13[%c0_58, %c0_59] : memref<1x32xf32, #tpu.memory_space<vmem>>, vector<1x32xf32>
    %135 = vector.broadcast %134 : vector<1x32xf32> to vector<6x32xf32>
    %136 = arith.addf %133, %135 : vector<6x32xf32>
    %c0_60 = arith.constant 0 : index
    %c0_61 = arith.constant 0 : index
    %c0_62 = arith.constant 0 : index
    %137 = vector.load %arg14[%c0_60, %c0_61, %c0_62] : memref<1x6x32xf32, #tpu.memory_space<vmem>>, vector<1x6x32xf32>
    %138 = vector.shape_cast %137 : vector<1x6x32xf32> to vector<6x32xf32>
    %139 = vector.shape_cast %136 : vector<6x32xf32> to vector<1x6x32xf32>
    tpu.vector_store %arg14[%c0_60, %c0_61, %c0_62], %139 {strides = array<i32>} : memref<1x6x32xf32, #tpu.memory_space<vmem>>, vector<1x6x32xf32>,
    return
  }
  func.func @transform_0(%arg0: i32, %arg1: i32) -> (i32, i32, i32) {
    %c0_i32 = arith.constant 0 : i32
    %c0_i32_0 = arith.constant 0 : i32
    return %arg0, %arg1, %c0_i32 : i32, i32, i32
  }
  func.func @transform_1(%arg0: i32, %arg1: i32) -> (i32, i32, i32) {
    %c0_i32 = arith.constant 0 : i32
    %c0_i32_0 = arith.constant 0 : i32
    %c0_i32_1 = arith.constant 0 : i32
    return %arg0, %c0_i32, %c0_i32_0 : i32, i32, i32
  }
  func.func @transform_2(%arg0: i32, %arg1: i32) -> (i32, i32) {
    %c0_i32 = arith.constant 0 : i32
    %c0_i32_0 = arith.constant 0 : i32
    %c0_i32_1 = arith.constant 0 : i32
    return %c0_i32, %c0_i32_0 : i32, i32
  }
  func.func @transform_3(%arg0: i32, %arg1: i32) -> (i32, i32) {
    %c0_i32 = arith.constant 0 : i32
    %c0_i32_0 = arith.constant 0 : i32
    %c0_i32_1 = arith.constant 0 : i32
    return %c0_i32, %c0_i32_0 : i32, i32
  }
  func.func @transform_4(%arg0: i32, %arg1: i32) -> (i32, i32) {
    %c0_i32 = arith.constant 0 : i32
    %c0_i32_0 = arith.constant 0 : i32
    %c0_i32_1 = arith.constant 0 : i32
    return %c0_i32, %c0_i32_0 : i32, i32
  }
  func.func @transform_5(%arg0: i32, %arg1: i32) -> (i32, i32) {
    %c0_i32 = arith.constant 0 : i32
    %c0_i32_0 = arith.constant 0 : i32
    %c0_i32_1 = arith.constant 0 : i32
    return %c0_i32, %c0_i32_0 : i32, i32
  }
  func.func @transform_6(%arg0: i32, %arg1: i32) -> (i32, i32) {
    %c0_i32 = arith.constant 0 : i32
    %c0_i32_0 = arith.constant 0 : i32
    %c0_i32_1 = arith.constant 0 : i32
    return %c0_i32, %c0_i32_0 : i32, i32
  }
  func.func @transform_7(%arg0: i32, %arg1: i32) -> (i32, i32) {
    %c0_i32 = arith.constant 0 : i32
    %c0_i32_0 = arith.constant 0 : i32
    %c0_i32_1 = arith.constant 0 : i32
    return %c0_i32, %c0_i32_0 : i32, i32
  }
  func.func @transform_8(%arg0: i32, %arg1: i32) -> (i32, i32) {
    %c0_i32 = arith.constant 0 : i32
    %c0_i32_0 = arith.constant 0 : i32
    %c0_i32_1 = arith.constant 0 : i32
    return %c0_i32, %c0_i32_0 : i32, i32
  }
  func.func @transform_9(%arg0: i32, %arg1: i32) -> (i32, i32) {
    %c0_i32 = arith.constant 0 : i32
    %c0_i32_0 = arith.constant 0 : i32
    %c0_i32_1 = arith.constant 0 : i32
    return %c0_i32, %c0_i32_0 : i32, i32
  }
  func.func @transform_10(%arg0: i32, %arg1: i32) -> (i32, i32) {
    %c0_i32 = arith.constant 0 : i32
    %c0_i32_0 = arith.constant 0 : i32
    %c0_i32_1 = arith.constant 0 : i32
    return %c0_i32, %c0_i32_0 : i32, i32
  }
  func.func @transform_11(%arg0: i32, %arg1: i32) -> (i32, i32) {
    %c0_i32 = arith.constant 0 : i32
    %c0_i32_0 = arith.constant 0 : i32
    %c0_i32_1 = arith.constant 0 : i32
    return %c0_i32, %c0_i32_0 : i32, i32
  }
  func.func @transform_12(%arg0: i32, %arg1: i32) -> (i32, i32, i32) {
    %c0_i32 = arith.constant 0 : i32
    %c0_i32_0 = arith.constant 0 : i32
    return %arg0, %arg1, %c0_i32 : i32, i32, i32
  }
}

module attributes {stable_mosaic.version = 11 : i64} {
  func.func @_ffn_kernel(%arg0: i32, %arg1: i32, %arg2: memref<12x32xf32, #tpu.memory_space<vmem>>, %arg3: memref<32x512xbf16, #tpu.memory_space<vmem>>, %arg4: memref<1x512xf32, #tpu.memory_space<vmem>>, %arg5: memref<512x32xbf16, #tpu.memory_space<vmem>>, %arg6: memref<1x32xf32, #tpu.memory_space<vmem>>, %arg7: memref<1x32xf32, #tpu.memory_space<vmem>>, %arg8: memref<1x32xf32, #tpu.memory_space<vmem>>, %arg9: memref<12x32xf32, #tpu.memory_space<vmem>>) attributes {dimension_semantics = [#tpu.dimension_semantics<parallel>, #tpu.dimension_semantics<arbitrary>], iteration_bounds = array<i64: 1, 4>, scalar_prefetch = 0 : i64, scratch_operands = 0 : i64, tpu.core_type = #tpu.core_type<tc>, window_params = [{transform_indices = @transform_0, window_bounds = array<i64: 12, 32>}, {transform_indices = @transform_1, window_bounds = array<i64: 32, 512>}, {transform_indices = @transform_2, window_bounds = array<i64: 1, 512>}, {transform_indices = @transform_3, window_bounds = array<i64: 512, 32>}, {pipeline_mode = #tpu.pipeline_mode<synchronous>, transform_indices = @transform_4, window_bounds = array<i64: 1, 32>}, {pipeline_mode = #tpu.pipeline_mode<synchronous>, transform_indices = @transform_5, window_bounds = array<i64: 1, 32>}, {pipeline_mode = #tpu.pipeline_mode<synchronous>, transform_indices = @transform_6, window_bounds = array<i64: 1, 32>}, {transform_indices = @transform_7, window_bounds = array<i64: 12, 32>}]} {
    %c0_i32 = arith.constant 0 : i32
    %0 = arith.cmpi eq, %arg1, %c0_i32 : i32
    %1 = arith.extui %0 : i1 to i32
    %c0_i32_0 = arith.constant 0 : i32
    %2 = arith.cmpi ne, %1, %c0_i32_0 : i32
    scf.if %2 {
      %cst_15 = arith.constant 0.000000e+00 : f32
      %21 = vector.broadcast %cst_15 : f32 to vector<12x32xf32>
      %c0_16 = arith.constant 0 : index
      %c0_17 = arith.constant 0 : index
      %22 = vector.load %arg9[%c0_16, %c0_17] : memref<12x32xf32, #tpu.memory_space<vmem>>, vector<12x32xf32>
      tpu.vector_store %arg9[%c0_16, %c0_17], %21 {strides = array<i32>} : memref<12x32xf32, #tpu.memory_space<vmem>>, vector<12x32xf32>,
    } else {
    }
    %c0 = arith.constant 0 : index
    %c0_1 = arith.constant 0 : index
    %3 = vector.load %arg2[%c0, %c0_1] : memref<12x32xf32, #tpu.memory_space<vmem>>, vector<12x32xf32>
    %4 = arith.truncf %3 : vector<12x32xf32> to vector<12x32xbf16>
    %c0_2 = arith.constant 0 : index
    %c0_3 = arith.constant 0 : index
    %5 = vector.load %arg3[%c0_2, %c0_3] : memref<32x512xbf16, #tpu.memory_space<vmem>>, vector<32x512xbf16>
    %cst = arith.constant dense<0.000000e+00> : vector<12x512xf32>
    %6 = tpu.matmul %4, %5, %cst {dimension_numbers = #tpu.dot_dimension_numbers<[1], [0], [0], [1], [0, 0, 1, 1], [], []>} : vector<12x32xbf16>, vector<32x512xbf16>, vector<12x512xf32> -> vector<12x512xf32>
    %c0_4 = arith.constant 0 : index
    %c0_5 = arith.constant 0 : index
    %7 = vector.load %arg4[%c0_4, %c0_5] : memref<1x512xf32, #tpu.memory_space<vmem>>, vector<1x512xf32>
    %8 = vector.broadcast %7 : vector<1x512xf32> to vector<12x512xf32>
    %9 = arith.addf %6, %8 : vector<12x512xf32>
    %cst_6 = arith.constant 0.000000e+00 : f32
    %10 = vector.broadcast %cst_6 : f32 to vector<12x512xf32>
    %11 = arith.maximumf %9, %10 : vector<12x512xf32>
    %c0_7 = arith.constant 0 : index
    %c0_8 = arith.constant 0 : index
    %12 = vector.load %arg9[%c0_7, %c0_8] : memref<12x32xf32, #tpu.memory_space<vmem>>, vector<12x32xf32>
    %13 = arith.truncf %11 : vector<12x512xf32> to vector<12x512xbf16>
    %c0_9 = arith.constant 0 : index
    %c0_10 = arith.constant 0 : index
    %14 = vector.load %arg5[%c0_9, %c0_10] : memref<512x32xbf16, #tpu.memory_space<vmem>>, vector<512x32xbf16>
    %cst_11 = arith.constant dense<0.000000e+00> : vector<12x32xf32>
    %15 = tpu.matmul %13, %14, %cst_11 {dimension_numbers = #tpu.dot_dimension_numbers<[1], [0], [0], [1], [0, 0, 1, 1], [], []>} : vector<12x512xbf16>, vector<512x32xbf16>, vector<12x32xf32> -> vector<12x32xf32>
    %16 = arith.addf %12, %15 : vector<12x32xf32>
    %c0_12 = arith.constant 0 : index
    %c0_13 = arith.constant 0 : index
    %17 = vector.load %arg9[%c0_12, %c0_13] : memref<12x32xf32, #tpu.memory_space<vmem>>, vector<12x32xf32>
    tpu.vector_store %arg9[%c0_12, %c0_13], %16 {strides = array<i32>} : memref<12x32xf32, #tpu.memory_space<vmem>>, vector<12x32xf32>,
    %c3_i32 = arith.constant 3 : i32
    %18 = arith.cmpi eq, %arg1, %c3_i32 : i32
    %19 = arith.extui %18 : i1 to i32
    %c0_i32_14 = arith.constant 0 : i32
    %20 = arith.cmpi ne, %19, %c0_i32_14 : i32
    scf.if %20 {
      %c0_15 = arith.constant 0 : index
      %c0_16 = arith.constant 0 : index
      %21 = vector.load %arg2[%c0_15, %c0_16] : memref<12x32xf32, #tpu.memory_space<vmem>>, vector<12x32xf32>
      %c0_17 = arith.constant 0 : index
      %c0_18 = arith.constant 0 : index
      %22 = vector.load %arg9[%c0_17, %c0_18] : memref<12x32xf32, #tpu.memory_space<vmem>>, vector<12x32xf32>
      %23 = arith.addf %21, %22 : vector<12x32xf32>
      %c0_19 = arith.constant 0 : index
      %c0_20 = arith.constant 0 : index
      %24 = vector.load %arg6[%c0_19, %c0_20] : memref<1x32xf32, #tpu.memory_space<vmem>>, vector<1x32xf32>
      %25 = vector.broadcast %24 : vector<1x32xf32> to vector<12x32xf32>
      %26 = arith.addf %23, %25 : vector<12x32xf32>
      %cst_21 = arith.constant dense<0.000000e+00> : vector<12xf32>
      %27 = vector.multi_reduction <add>, %26, %cst_21 [1] : vector<12x32xf32> to vector<12xf32>
      %28 = vector.shape_cast %27 : vector<12xf32> to vector<12x1xf32>
      %cst_22 = arith.constant 3.200000e+01 : f32
      %29 = vector.broadcast %cst_22 : f32 to vector<12x1xf32>
      %30 = arith.divf %28, %29 : vector<12x1xf32>
      %31 = vector.broadcast %30 : vector<12x1xf32> to vector<12x32xf32>
      %32 = arith.subf %26, %31 : vector<12x32xf32>
      %33 = arith.mulf %32, %32 : vector<12x32xf32>
      %cst_23 = arith.constant dense<0.000000e+00> : vector<12xf32>
      %34 = vector.multi_reduction <add>, %33, %cst_23 [1] : vector<12x32xf32> to vector<12xf32>
      %35 = vector.shape_cast %34 : vector<12xf32> to vector<12x1xf32>
      %cst_24 = arith.constant 3.200000e+01 : f32
      %36 = vector.broadcast %cst_24 : f32 to vector<12x1xf32>
      %37 = arith.divf %35, %36 : vector<12x1xf32>
      %38 = vector.broadcast %30 : vector<12x1xf32> to vector<12x32xf32>
      %39 = arith.subf %26, %38 : vector<12x32xf32>
      %cst_25 = arith.constant 9.99999974E-6 : f32
      %40 = vector.broadcast %cst_25 : f32 to vector<12x1xf32>
      %41 = arith.addf %37, %40 : vector<12x1xf32>
      %42 = math.rsqrt %41 : vector<12x1xf32>
      %43 = vector.broadcast %42 : vector<12x1xf32> to vector<12x32xf32>
      %44 = arith.mulf %39, %43 : vector<12x32xf32>
      %c0_26 = arith.constant 0 : index
      %c0_27 = arith.constant 0 : index
      %45 = vector.load %arg7[%c0_26, %c0_27] : memref<1x32xf32, #tpu.memory_space<vmem>>, vector<1x32xf32>
      %46 = vector.broadcast %45 : vector<1x32xf32> to vector<12x32xf32>
      %47 = arith.mulf %44, %46 : vector<12x32xf32>
      %c0_28 = arith.constant 0 : index
      %c0_29 = arith.constant 0 : index
      %48 = vector.load %arg8[%c0_28, %c0_29] : memref<1x32xf32, #tpu.memory_space<vmem>>, vector<1x32xf32>
      %49 = vector.broadcast %48 : vector<1x32xf32> to vector<12x32xf32>
      %50 = arith.addf %47, %49 : vector<12x32xf32>
      %c0_30 = arith.constant 0 : index
      %c0_31 = arith.constant 0 : index
      %51 = vector.load %arg9[%c0_30, %c0_31] : memref<12x32xf32, #tpu.memory_space<vmem>>, vector<12x32xf32>
      tpu.vector_store %arg9[%c0_30, %c0_31], %50 {strides = array<i32>} : memref<12x32xf32, #tpu.memory_space<vmem>>, vector<12x32xf32>,
    } else {
    }
    return
  }
  func.func @transform_0(%arg0: i32, %arg1: i32) -> (i32, i32) {
    %c0_i32 = arith.constant 0 : i32
    %c0_i32_0 = arith.constant 0 : i32
    return %arg0, %c0_i32 : i32, i32
  }
  func.func @transform_1(%arg0: i32, %arg1: i32) -> (i32, i32) {
    %c0_i32 = arith.constant 0 : i32
    %c0_i32_0 = arith.constant 0 : i32
    return %c0_i32, %arg1 : i32, i32
  }
  func.func @transform_2(%arg0: i32, %arg1: i32) -> (i32, i32) {
    %c0_i32 = arith.constant 0 : i32
    %c0_i32_0 = arith.constant 0 : i32
    return %c0_i32, %arg1 : i32, i32
  }
  func.func @transform_3(%arg0: i32, %arg1: i32) -> (i32, i32) {
    %c0_i32 = arith.constant 0 : i32
    %c0_i32_0 = arith.constant 0 : i32
    return %arg1, %c0_i32 : i32, i32
  }
  func.func @transform_4(%arg0: i32, %arg1: i32) -> (i32, i32) {
    %c0_i32 = arith.constant 0 : i32
    %c0_i32_0 = arith.constant 0 : i32
    %c0_i32_1 = arith.constant 0 : i32
    return %c0_i32, %c0_i32_0 : i32, i32
  }
  func.func @transform_5(%arg0: i32, %arg1: i32) -> (i32, i32) {
    %c0_i32 = arith.constant 0 : i32
    %c0_i32_0 = arith.constant 0 : i32
    %c0_i32_1 = arith.constant 0 : i32
    return %c0_i32, %c0_i32_0 : i32, i32
  }
  func.func @transform_6(%arg0: i32, %arg1: i32) -> (i32, i32) {
    %c0_i32 = arith.constant 0 : i32
    %c0_i32_0 = arith.constant 0 : i32
    %c0_i32_1 = arith.constant 0 : i32
    return %c0_i32, %c0_i32_0 : i32, i32
  }
  func.func @transform_7(%arg0: i32, %arg1: i32) -> (i32, i32) {
    %c0_i32 = arith.constant 0 : i32
    %c0_i32_0 = arith.constant 0 : i32
    return %arg0, %c0_i32 : i32, i32
  }
}

module attributes {stable_mosaic.version = 11 : i64} {
  func.func @_ln_linear_kernel(%arg0: i32, %arg1: memref<12x32xf32, #tpu.memory_space<vmem>>, %arg2: memref<1x32xf32, #tpu.memory_space<vmem>>, %arg3: memref<1x32xf32, #tpu.memory_space<vmem>>, %arg4: memref<32x128xbf16, #tpu.memory_space<vmem>>, %arg5: memref<1x128xf32, #tpu.memory_space<vmem>>, %arg6: memref<12x128xf32, #tpu.memory_space<vmem>>) attributes {dimension_semantics = [#tpu.dimension_semantics<parallel>], iteration_bounds = array<i64: 1>, scalar_prefetch = 0 : i64, scratch_operands = 0 : i64, tpu.core_type = #tpu.core_type<tc>, window_params = [{transform_indices = @transform_0, window_bounds = array<i64: 12, 32>}, {pipeline_mode = #tpu.pipeline_mode<synchronous>, transform_indices = @transform_1, window_bounds = array<i64: 1, 32>}, {pipeline_mode = #tpu.pipeline_mode<synchronous>, transform_indices = @transform_2, window_bounds = array<i64: 1, 32>}, {pipeline_mode = #tpu.pipeline_mode<synchronous>, transform_indices = @transform_3, window_bounds = array<i64: 32, 128>}, {pipeline_mode = #tpu.pipeline_mode<synchronous>, transform_indices = @transform_4, window_bounds = array<i64: 1, 128>}, {transform_indices = @transform_5, window_bounds = array<i64: 12, 128>}]} {
    %c0 = arith.constant 0 : index
    %c0_0 = arith.constant 0 : index
    %0 = vector.load %arg1[%c0, %c0_0] : memref<12x32xf32, #tpu.memory_space<vmem>>, vector<12x32xf32>
    %cst = arith.constant dense<0.000000e+00> : vector<12xf32>
    %1 = vector.multi_reduction <add>, %0, %cst [1] : vector<12x32xf32> to vector<12xf32>
    %2 = vector.shape_cast %1 : vector<12xf32> to vector<12x1xf32>
    %cst_1 = arith.constant 3.200000e+01 : f32
    %3 = vector.broadcast %cst_1 : f32 to vector<12x1xf32>
    %4 = arith.divf %2, %3 : vector<12x1xf32>
    %5 = vector.broadcast %4 : vector<12x1xf32> to vector<12x32xf32>
    %6 = arith.subf %0, %5 : vector<12x32xf32>
    %7 = arith.mulf %6, %6 : vector<12x32xf32>
    %cst_2 = arith.constant dense<0.000000e+00> : vector<12xf32>
    %8 = vector.multi_reduction <add>, %7, %cst_2 [1] : vector<12x32xf32> to vector<12xf32>
    %9 = vector.shape_cast %8 : vector<12xf32> to vector<12x1xf32>
    %cst_3 = arith.constant 3.200000e+01 : f32
    %10 = vector.broadcast %cst_3 : f32 to vector<12x1xf32>
    %11 = arith.divf %9, %10 : vector<12x1xf32>
    %12 = vector.broadcast %4 : vector<12x1xf32> to vector<12x32xf32>
    %13 = arith.subf %0, %12 : vector<12x32xf32>
    %cst_4 = arith.constant 9.99999974E-6 : f32
    %14 = vector.broadcast %cst_4 : f32 to vector<12x1xf32>
    %15 = arith.addf %11, %14 : vector<12x1xf32>
    %16 = math.rsqrt %15 : vector<12x1xf32>
    %17 = vector.broadcast %16 : vector<12x1xf32> to vector<12x32xf32>
    %18 = arith.mulf %13, %17 : vector<12x32xf32>
    %c0_5 = arith.constant 0 : index
    %c0_6 = arith.constant 0 : index
    %19 = vector.load %arg2[%c0_5, %c0_6] : memref<1x32xf32, #tpu.memory_space<vmem>>, vector<1x32xf32>
    %20 = vector.broadcast %19 : vector<1x32xf32> to vector<12x32xf32>
    %21 = arith.mulf %18, %20 : vector<12x32xf32>
    %c0_7 = arith.constant 0 : index
    %c0_8 = arith.constant 0 : index
    %22 = vector.load %arg3[%c0_7, %c0_8] : memref<1x32xf32, #tpu.memory_space<vmem>>, vector<1x32xf32>
    %23 = vector.broadcast %22 : vector<1x32xf32> to vector<12x32xf32>
    %24 = arith.addf %21, %23 : vector<12x32xf32>
    %25 = arith.truncf %24 : vector<12x32xf32> to vector<12x32xbf16>
    %c0_9 = arith.constant 0 : index
    %c0_10 = arith.constant 0 : index
    %26 = vector.load %arg4[%c0_9, %c0_10] : memref<32x128xbf16, #tpu.memory_space<vmem>>, vector<32x128xbf16>
    %cst_11 = arith.constant dense<0.000000e+00> : vector<12x128xf32>
    %27 = tpu.matmul %25, %26, %cst_11 {dimension_numbers = #tpu.dot_dimension_numbers<[1], [0], [0], [1], [0, 0, 1, 1], [], []>} : vector<12x32xbf16>, vector<32x128xbf16>, vector<12x128xf32> -> vector<12x128xf32>
    %c0_12 = arith.constant 0 : index
    %c0_13 = arith.constant 0 : index
    %28 = vector.load %arg5[%c0_12, %c0_13] : memref<1x128xf32, #tpu.memory_space<vmem>>, vector<1x128xf32>
    %29 = vector.broadcast %28 : vector<1x128xf32> to vector<12x128xf32>
    %30 = arith.addf %27, %29 : vector<12x128xf32>
    %c0_14 = arith.constant 0 : index
    %c0_15 = arith.constant 0 : index
    %31 = vector.load %arg6[%c0_14, %c0_15] : memref<12x128xf32, #tpu.memory_space<vmem>>, vector<12x128xf32>
    tpu.vector_store %arg6[%c0_14, %c0_15], %30 {strides = array<i32>} : memref<12x128xf32, #tpu.memory_space<vmem>>, vector<12x128xf32>,
    return
  }
  func.func @transform_0(%arg0: i32) -> (i32, i32) {
    %c0_i32 = arith.constant 0 : i32
    %c0_i32_0 = arith.constant 0 : i32
    return %arg0, %c0_i32 : i32, i32
  }
  func.func @transform_1(%arg0: i32) -> (i32, i32) {
    %c0_i32 = arith.constant 0 : i32
    %c0_i32_0 = arith.constant 0 : i32
    %c0_i32_1 = arith.constant 0 : i32
    return %c0_i32, %c0_i32_0 : i32, i32
  }
  func.func @transform_2(%arg0: i32) -> (i32, i32) {
    %c0_i32 = arith.constant 0 : i32
    %c0_i32_0 = arith.constant 0 : i32
    %c0_i32_1 = arith.constant 0 : i32
    return %c0_i32, %c0_i32_0 : i32, i32
  }
  func.func @transform_3(%arg0: i32) -> (i32, i32) {
    %c0_i32 = arith.constant 0 : i32
    %c0_i32_0 = arith.constant 0 : i32
    %c0_i32_1 = arith.constant 0 : i32
    return %c0_i32, %c0_i32_0 : i32, i32
  }
  func.func @transform_4(%arg0: i32) -> (i32, i32) {
    %c0_i32 = arith.constant 0 : i32
    %c0_i32_0 = arith.constant 0 : i32
    %c0_i32_1 = arith.constant 0 : i32
    return %c0_i32, %c0_i32_0 : i32, i32
  }
  func.func @transform_5(%arg0: i32) -> (i32, i32) {
    %c0_i32 = arith.constant 0 : i32
    %c0_i32_0 = arith.constant 0 : i32
    return %arg0, %c0_i32 : i32, i32
  }
}

</mosaic_0001>

<bundles_post_ra>
// kernel: transformer_model_forward.14
= control target key start
LH: loop header
LB: loop body
LE: loop exit
PB: predicated region body
PF: predicated region fallthrough
CT: control target
= control target key end

     0   :  { %vm19_vm0 = vcmask 261120   ;;  %v121_v0 = vmov 0.0   ;;  %vm122_vm1 = vmmov 0   ;;  %vm35_vm2 = vcmask 130048   ;;  %s191_s3 = inlined_call_operand.vmem [shape: f32[16,32], index: 3, kind: output, shape index: {}]   ;;  %s192_s1 = inlined_call_operand.vmem [shape: bf16[16,32], index: 1, kind: input, shape index: {}]   ;;  %s193_s0 = inlined_call_operand.vmem [shape: f32[16,16], index: 0, kind: input, shape index: {}]   ;;  %s194_s2 = inlined_call_operand.vmem [shape: f32[1,32], index: 2, kind: input, shape index: {}]  }
   0x1   :  { %20 = vst.msk [vmem:[%s191_s3] sm:$0xff] %vm19_vm0, %v121_v0  ;;  %21 = vst.msk [vmem:[%s191_s3 + $0x8] sm:$0xff] %vm19_vm0, %v121_v0  ;;  %112 = vmatprep.subr.bf16.mxu0 %v121_v0  ;;  %v120_v1 = vld [vmem:[%s192_s1] sm:$0xff]   ;;  %114 = vmatprep.mubr.msk.bf16.mxu0 %vm122_vm1, %v121_v0  ;;  %v25_v3 = vld [vmem:[%s193_s0 + $0x8] sm:$0xff] }
   0x2   :  { %v24_v2 = vld [vmem:[%s193_s0] sm:$0xff]  ;;  %113 = vmatpush3.bf16.msra.mxu0 %v120_v1 }
   0x3   :  { %v26_v4 = vpack.c.bf16 %v25_v3, %v24_v2  ;;  %v109_v13 = vld [vmem:[%s194_s2] ss:$0 sm:$0xff] }
   0x5   :  { %115 = vmatmul.mubr.msk.bf16.vlgmr.msra.gmra.mxu0 %vm35_vm2, %v26_v4 }
   0x8   :  { %v22_v5 = vld [vmem:[%s191_s3] sm:$0xff]  ;;  %v23_v9 = vld [vmem:[%s191_s3 + $0x8] sm:$0xff] }
  0xc5   :  { %v73_v6 = vpop.f32.mrf.mxu0 }
  0xc6   :  { %v80_v7 = vadd.f32 %v73_v6, %v22_v5 }
  0xc7   :  { %v116_v8 = vpop.f32.mrf.mxu0 }
  0xc8   :  { %83 = vst.msk [vmem:[%s191_s3] sm:$0xff] %vm19_vm0, %v80_v7 }
  0xc9   :  { %v76_v10 = vpop.f32.mrf.mxu0 }
  0xca   :  { %v81_v11 = vadd.f32 %v76_v10, %v23_v9 }
  0xcb   :  { %v117_v12 = vpop.f32.mrf.mxu0 }
  0xcc   :  { %84 = vst.msk [vmem:[%s191_s3 + $0x8] sm:$0xff] %vm19_vm0, %v81_v11 }
  0xcf   :  { %v88_v14 = vld [vmem:[%s191_s3] sm:$0xff] }
  0xd0   :  { %v97_v15 = vadd.f32 %v109_v13, %v88_v14 }
  0xd2   :  { %v99_v16 = vmul.f32 5.656854, %v97_v15 }
  0xd3   :  { %v89_v17 = vld [vmem:[%s191_s3 + $0x8] sm:$0xff] }
  0xd4   :  { %101 = vst.msk [vmem:[%s191_s3] sm:$0xff] %vm19_vm0, %v99_v16  ;;  %v98_v18 = vadd.f32 %v109_v13, %v89_v17 }
  0xd6   :  { %v100_v19 = vmul.f32 5.656854, %v98_v18 }
  0xd8   :  { %102 = vst.msk [vmem:[%s191_s3 + $0x8] sm:$0xff] %vm19_vm0, %v100_v19 }

// kernel: transformer_model_forward.16
= control target key start
LH: loop header
LB: loop body
LE: loop exit
PB: predicated region body
PF: predicated region fallthrough
CT: control target
= control target key end

     0   :  { %17 = vsyncpa [#allocation4], 0  ;;  %s1684_s21 = smov 0   ;;  %s1686_s22 = smov 0   ;;  %s1873_s0 = inlined_call_operand.vmem [shape: f32[2,8,32], index: 0, kind: input, shape index: {}, may-alias: {0,1}]   ;;  %s1874_s1 = inlined_call_operand.vmem [shape: f32[2,8,32], index: 1, kind: input, shape index: {}, may-alias: {0,1}]   ;;  %s1875_s2 = inlined_call_operand.vmem [shape: bf16[32,32], index: 2, kind: input, shape index: {}]   ;;  %s1876_s3 = inlined_call_operand.vmem [shape: bf16[32,32], index: 3, kind: input, shape index: {}]   ;;  %s1877_s4 = inlined_call_operand.hbm [shape: bf16[32,32], index: 4, kind: input, shape index: {}]   ;;  %s1878_s5 = inlined_call_operand.vmem [shape: f32[1,32], index: 5, kind: input, shape index: {}]   ;;  %s1879_s6 = inlined_call_operand.vmem [shape: f32[1,32], index: 6, kind: input, shape index: {}]   ;;  %s1880_s7 = inlined_call_operand.vmem [shape: f32[1,32], index: 7, kind: input, shape index: {}]   ;;  %s1881_s8 = inlined_call_operand.vmem [shape: bf16[32,32], index: 8, kind: input, shape index: {}]   ;;  %s1882_s9 = inlined_call_operand.vmem [shape: f32[1,32], index: 9, kind: input, shape index: {}]   ;;  %s1883_s10 = inlined_call_operand.vmem [shape: f32[1,32], index: 10, kind: input, shape index: {}]   ;;  %s1884_s11 = inlined_call_operand.vmem [shape: f32[1,32], index: 11, kind: input, shape index: {}]   ;;  %s1885_s12 = inlined_call_operand.vmem [shape: f32[2,8,32], index: 12, kind: output, shape index: {}]  }
   0x1   :  { %s1688_s23 = smov 0  }
   0x2 LB: > { %s1337_s24 = sadd.s32 4294967295, %s1606_s23   ;;  %s35_s25 = sadd.s32 1, %s1602_s22  ;;  %s1606_s23 = sphi %s1688_s23, %s23_s23   ;;  %s1602_s22 = sphi %s1686_s22, %s1889_s22   ;;  %s1598_s21 = sphi %s1684_s21, %s1888_s21  }
   0x3   : > { %p37_p0 = scmp.ge.s32.totalorder %s35_s25, 2  ;;  %p1339_p1 = scmp.ge.s32.totalorder %s1606_s23, 1 }
   0x4   : > { %p332_p2 = scmp.lt.s32.totalorder %s1606_s23, 3  ;;  %p1709_p4 = scmp.eq.s32.totalorder %s1337_s24, 0 }
   0x5   : > { %s1891_s25 = smov (%p37_p0, %s35_s25), 0  ;;  %s1608_s28 = smov [#allocation3]  }
   0x6   : > { %p1705_p3 = pnand %p1339_p1, %p332_p2  ;;  %s350_s29 = sshll.u32 %s1608_s28, 4  ;;  %s351_s29 = int_to_ptr.vmem [resolvable:$true] %s350_s29 }
   0x7   : > { %s1565_s30 = scalar_lea.vmem %s351_s29, 256  ;;  %p1573_p11 = scmp.lt.s32.totalorder %s351_s29, %s351_s29 }
   0x8   : > { %p1487_p5 = pneg %p1705_p3  ;;  %p1566_p8 = scmp.ne.s32.totalorder %s351_s29, %s1565_s30 }
   0x9   : > { %p1574_p12 = scmp.lt.s32.totalorder %s1565_s30, %s1565_s30 }
   0xa   : > { %p1488_p6 = pnand %p1709_p4, %p1487_p5 }
   0xb   : > { %p1575_p13 = por %p1574_p12, %p1573_p11 }
   0xc   : > { %p1556_p7 = pneg %p1488_p6 }
   0xe   : > { %p1568_p9 = pnand %p1566_p8, %p1556_p7 }
  0x10   : > { %p1569_p10 = pneg %p1568_p9 }
  0x12   : > { %p1576_p0 = pnand %p1575_p13, %p1569_p10 }
  0x14   : > { %1579 = shalt.err (!%p1576_p0)
}
  0x15   : > { %s1609_s13 = smov 64   ;;  %s1610_s14 = smov 4  }
  0x16   : > { %1490 = dma.hbm_to_vmem [thread:$0]  (!%p1488_p6), %s1877_s4, 256, %s351_s29, [#allocation4], %s1609_s13, %s1609_s13, %s1610_s14  }
  0x17   : > { %404 = sbr.rel (%p1705_p3) target bundleno = 1708 (0x6ac), region = 68 }
  0x1c   : > { %1593 = dma.done.wait (%p1709_p4), [#allocation4], 256  }
  0x1d   : > { %1595 = vsyncadd (%p1709_p4), [#allocation4], 4294967040  ;;  %p454_p1 = scmp.lt.s32.totalorder %s1598_s21, 1  ;;  %v1611_v0 = vmov 0.0   ;;  %vm1612_vm0 = vmmov 0   ;;  %v1528_v1 = vld [vmem:[%s1876_s3 + $0x8] sm:$0xff]  }
  0x1e   : > { %1411 = vmatprep.subr.bf16.mxu1 %v1611_v0  ;;  %1403 = vmatprep.subr.bf16.mxu0 %v1611_v0  ;;  %v1529_v2 = vld [vmem:[%s1875_s2 + $0x8] sm:$0xff]   ;;  %v1530_v3 = vld [vmem:[%s1876_s3] sm:$0xff]   ;;  %vm500_vm1 = vcmask 261120   ;;  %vm676_vm2 = vcmask 64512   ;;  %s1613_s26 = smov 112   ;;  %s1614_s27 = smov 120  }
  0x1f   : > { %1415 = vmatprep.mubr.msk.bf16.mxu1 %vm1612_vm0, %v1611_v0  ;;  %s1893_s21 = smov (!%p454_p1, %s1598_s21), 1  ;;  %1407 = vmatprep.mubr.msk.bf16.mxu0 %vm1612_vm0, %v1611_v0  ;;  %v1531_v4 = vld [vmem:[%s1875_s2] sm:$0xff]   ;;  %v1532_v24 = vld [vmem:[#allocation3 + $0x8] sm:$0xff]   ;;  %v1533_v25 = vld [vmem:[#allocation3] sm:$0xff]   ;;  %vm739_vm3 = vcmask 1043456   ;;  %s1617_s18 = smov 16  }
  0x20   : > { %s1734_s17 = sshll.u32 %s1893_s21, 3  ;;  %1412 = vmatpush3.bf16.msra.mxu1 %v1528_v1  ;;  %1404 = vmatpush3.bf16.msra.mxu0 %v1529_v2  ;;  %v1351_v9 = vld [vmem:[%s1879_s6] ss:$0 sm:$0xff]  ;;  %s1618_s19 = smov 24   ;;  %vm902_vm4 = vcmask 130112   ;;  %vm1019_vm5 = vcmask 195712  }
  0x21   : > { %s464_s28 = scalar_lea.vmem %s1874_s1, %s1734_s17  ;;  %s460_s13 = scalar_lea.vmem %s1873_s0, %s1734_s17  ;;  %1413 = vmatprep.subr.bf16.mxu1 %v1611_v0  ;;  %1405 = vmatprep.subr.bf16.mxu0 %v1611_v0  ;;  %v1347_v10 = vld [vmem:[%s1878_s5] ss:$0 sm:$0xff]  ;;  %vm1136_vm6 = vcmask 261312  }
  0x22   : > { %v474_v5 = vld [vmem:[%s464_s28] sm:$0xff]  ;;  %s1615_s28 = smov 104   ;;  %s471_s21 = scalar_lea.vmem %s1885_s12, %s1734_s17 }
  0x23   : > { %v1758_v6 = vld [vmem:[%s460_s13] sm:$0xff]  ;;  %v476_v7 = vpack.c.bf16 %v474_v5, %v474_v5  ;;  %s1616_s13 = smov 8  }
  0x24   : > { %1414 = vmatpush3.bf16.msra.mxu1 %v1530_v3  ;;  %v475_v8 = vpack.c.bf16 %v1758_v6, %v1758_v6  ;;  %1406 = vmatpush3.bf16.msra.mxu0 %v1531_v4  ;;  %v1355_v41 = vld [vmem:[%s1880_s7] ss:$0 sm:$0xff] }
  0x25   : > { %1427 = vmatprep.subr.bf16.mxu1 %v1611_v0  ;;  %1419 = vmatprep.subr.bf16.mxu0 %v1611_v0 }
  0x27   : > { %1416 = vmatmul.mubr.msk.bf16.vlgmr.msra.gmra.mxu1 %vm500_vm1, %v476_v7  ;;  %1408 = vmatmul.mubr.msk.bf16.vlgmr.msra.gmra.mxu0 %vm500_vm1, %v475_v8 }
  0x28   : > { %1429 = vmatprep.mubr.msk.bf16.mxu1 %vm1612_vm0, %v1611_v0  ;;  %1423 = vmatprep.mubr.msk.bf16.mxu0 %vm1612_vm0, %v1611_v0 }
  0x29   : > { %1420 = vmatpush3.bf16.msra.mxu0 %v1532_v24 }
  0x2a   : > { %1421 = vmatprep.subr.bf16.mxu0 %v1611_v0 }
  0x2d   : > { %1422 = vmatpush3.bf16.msra.mxu0 %v1533_v25 }
  0x2e   : > { %1433 = vmatprep.subr.bf16.mxu0 %v1611_v0 }
  0x30   : > { %1424 = vmatmul.mubr.msk.bf16.vlgmr.msra.gmra.mxu0 %vm500_vm1, %v476_v7 }
  0x31   : > { %1435 = vmatprep.mubr.msk.bf16.mxu0 %vm1612_vm0, %v1611_v0 }
  0xe7   : > { %v604_v11 = vpop.f32.mrf.mxu1  ;;  %v538_v13 = vpop.f32.mrf.mxu0 }
  0xe8   : > { %v605_v12 = vadd.f32 %v1351_v9, %v604_v11  ;;  %v539_v14 = vadd.f32 %v1347_v10, %v538_v13 }
  0xe9   : > { %v1417_v15 = vpop.f32.mrf.mxu1  ;;  %v1409_v17 = vpop.f32.mrf.mxu0 }
  0xea   : > { %v674_v16 = vpack.c.bf16 %v605_v12, %v605_v12  ;;  %v673_v19 = vpack.c.bf16 %v539_v14, %v539_v14 }
  0xeb   : > { %v607_v18 = vpop.f32.mrf.mxu1  ;;  %v541_v20 = vpop.f32.mrf.mxu0 }
  0xec   : > { %906 = vrot.lane.b32.xlu1 %v674_v16, %s1613_s26  ;;  %788 = vrot.lane.b32.xlu0 %v674_v16, %s1614_s27  ;;  %v681_v21 = vsel %vm676_vm2, %v674_v16, 0 }
  0xed   : > { %v1418_v22 = vpop.f32.mrf.mxu1  ;;  %1428 = vmatpush3.bf16.xpose.msra.mxu1 %v681_v21  ;;  %v1410_v23 = vpop.f32.mrf.mxu0 }
  0xee   : > { %1439 = vmatprep.subr.bf16.mxu1 %v1611_v0 }
  0xf0   : > { %904 = vrot.lane.b32.xlu1 %v673_v19, %s1613_s26  ;;  %785 = vrot.lane.b32.xlu0 %v673_v19, %s1614_s27  ;;  %v667_v42 = vpop.f32.mrf.mxu0 }
  0xf1   : > { %v668_v43 = vadd.f32 %v1355_v41, %v667_v42 }
  0xf2   : > { %v1425_v44 = vpop.f32.mrf.mxu0 }
  0xf3   : > { %v675_v45 = vpack.c.bf16 %v668_v43, %v668_v43 }
  0xf4   : > { %1021 = vrot.lane.b32.xlu1 %v673_v19, %s1615_s28  ;;  %1023 = vrot.lane.b32.xlu0 %v674_v16, %s1615_s28  ;;  %v670_v46 = vpop.f32.mrf.mxu0 }
  0xf5   : > { %1430 = vmatmul.mubr.msk.bf16.vlgmr.msra.gmra.mxu1 %vm676_vm2, %v673_v19  ;;  %v741_v47 = vsel %vm739_vm3, %v675_v45, 0 }
  0xf6   : > { %1441 = vmatprep.mubr.msk.bf16.mxu1 %vm1612_vm0, %v1611_v0  ;;  %v1426_v48 = vpop.f32.mrf.mxu0  ;;  %1434 = vmatpush3.bf16.msra.mxu0 %v741_v47 }
  0xf7   : > { %1445 = vmatprep.subr.bf16.mxu0 %v1611_v0 }
 0x15e   : > { %v789_v26 = vpop.permute.xlu0 %788  ;;  %v907_v28 = vpop.permute.xlu1 %906 }
 0x15f   : > { %v794_v27 = vsel %vm676_vm2, %v789_v26, 0  ;;  %v912_v30 = vsel %vm676_vm2, %v907_v28, 0 }
 0x160   : > { %1440 = vmatpush3.bf16.xpose.msra.mxu1 %v794_v27 }
 0x161   : > { %1451 = vmatprep.subr.bf16.mxu1 %v1611_v0 }
 0x162   : > { %v786_v29 = vpop.permute.xlu0 %785  ;;  %v905_v32 = vpop.permute.xlu1 %904 }
 0x166   : > { %v1024_v31 = vpop.permute.xlu0 %1023  ;;  %v1022_v34 = vpop.permute.xlu1 %1021 }
 0x167   : > { %1442 = vmatmul.mubr.msk.bf16.vlgmr.msra.gmra.mxu1 %vm676_vm2, %v786_v29  ;;  %v1029_v33 = vsel %vm676_vm2, %v1024_v31, 0 }
 0x168   : > { %1452 = vmatpush3.bf16.xpose.msra.mxu1 %v912_v30  ;;  %1453 = vmatprep.mubr.msk.bf16.mxu1 %vm1612_vm0, %v1611_v0 }
 0x169   : > { %1463 = vmatprep.subr.bf16.mxu1 %v1611_v0 }
 0x16f   : > { %1454 = vmatmul.mubr.msk.bf16.vlgmr.msra.gmra.mxu1 %vm676_vm2, %v905_v32 }
 0x170   : > { %1464 = vmatpush3.bf16.xpose.msra.mxu1 %v1029_v33  ;;  %1465 = vmatprep.mubr.msk.bf16.mxu1 %vm1612_vm0, %v1611_v0 }
 0x171   : > { %1475 = vmatprep.subr.bf16.mxu1 %v1611_v0 }
 0x177   : > { %1466 = vmatmul.mubr.msk.bf16.vlgmr.msra.gmra.mxu1 %vm676_vm2, %v1022_v34 }
 0x178   : > { %1479 = vmatprep.mubr.msk.bf16.mxu1 %vm1612_vm0, %v1611_v0 }
 0x1b5   : > { %v717_v35 = vpop.f32.mrf.mxu1 }
 0x1b6   : > { %v723_v36 = vmul.f32 0.35355338, %v717_v35 }
 0x1b7   : > { %v1431_v37 = vpop.f32.mrf.mxu1 }
 0x1b8   : > { %v724_v38 = vsel %vm676_vm2, %v723_v36, -inf }
 0x1b9   : > { %725 = vmax.xlane.f32.xlu0 %v724_v38  ;;  %v720_v39 = vpop.f32.mrf.mxu1 }
 0x1bb   : > { %v1432_v40 = vpop.f32.mrf.mxu1 }
 0x227   : > { %v830_v49 = vpop.f32.mrf.mxu1 }
 0x228   : > { %v836_v50 = vmul.f32 0.35355338, %v830_v49 }
 0x229   : > { %v1443_v51 = vpop.f32.mrf.mxu1 }
 0x22a   : > { %v837_v52 = vsel %vm676_vm2, %v836_v50, -inf }
 0x22b   : > { %838 = vmax.xlane.f32.xlu1 %v837_v52  ;;  %v833_v53 = vpop.f32.mrf.mxu1 }
 0x22d   : > { %v1444_v54 = vpop.f32.mrf.mxu1 }
 0x22e   : > { %v1534_v54 = vld [vmem:[%s1881_s8 + $0x8] sm:$0xff]  }
 0x22f   : > { %v948_v55 = vpop.f32.mrf.mxu1  ;;  %1476 = vmatpush3.bf16.msra.mxu1 %v1534_v54 }
 0x230   : > { %v954_v56 = vmul.f32 0.35355338, %v948_v55  ;;  %1477 = vmatprep.subr.bf16.mxu1 %v1611_v0 }
 0x231   : > { %v1455_v57 = vpop.f32.mrf.mxu1 }
 0x232   : > { %v955_v58 = vsel %vm676_vm2, %v954_v56, -inf }
 0x233   : > { %956 = vmax.xlane.f32.xlu0 %v955_v58  ;;  %v951_v59 = vpop.f32.mrf.mxu1 }
 0x235   : > { %v1456_v60 = vpop.f32.mrf.mxu1 }
 0x237   : > { %v1065_v61 = vpop.f32.mrf.mxu1 }
 0x238   : > { %v1071_v62 = vmul.f32 0.35355338, %v1065_v61 }
 0x239   : > { %v1467_v63 = vpop.f32.mrf.mxu1 }
 0x23a   : > { %v1072_v1 = vsel %vm676_vm2, %v1071_v62, -inf }
 0x23b   : > { %1073 = vmax.xlane.f32.xlu0 %v1072_v1  ;;  %v1068_v2 = vpop.f32.mrf.mxu1 }
 0x23d   : > { %v1468_v3 = vpop.f32.mrf.mxu1 }
 0x242   : > { %v726_v4 = vpop.xlane.xlu0 %725 }
 0x243   : > { %v727_v5 = vsub.f32 %v723_v36, %v726_v4 }
 0x245   : > { %v728_v7 = vmul.f32 1.442695, %v727_v5 }
 0x247   : > { %1536 = vpow2.f32 %v728_v7  ;;  %v1367_v7 = vld [vmem:[%s1882_s9] ss:$0 sm:$0xff] }
 0x254   : > { %v1537_v8 = vpop.eup %1536 }
 0x255   : > { %v730_v9 = vsel %vm676_vm2, %v1537_v8, 0.0 }
 0x256   : > { %731 = vadd.xlane.f32.xlu1 %v730_v9 }
 0x267   : > { %850 = vrot.lane.b32.xlu1 %v675_v45, %s1614_s27 }
 0x2b4   : > { %v839_v10 = vpop.xlane.xlu1 %838 }
 0x2b5   : > { %v840_v11 = vsub.f32 %v836_v50, %v839_v10 }
 0x2b7   : > { %v841_v12 = vmul.f32 1.442695, %v840_v11 }
 0x2b9   : > { %1538 = vpow2.f32 %v841_v12 }
 0x2bc   : > { %v957_v13 = vpop.xlane.xlu0 %956 }
 0x2bd   : > { %v958_v14 = vsub.f32 %v954_v56, %v957_v13  ;;  %v1535_v56 = vld [vmem:[%s1881_s8] sm:$0xff]  }
 0x2be   : > { %1478 = vmatpush3.bf16.msra.mxu1 %v1535_v56 }
 0x2bf   : > { %v959_v15 = vmul.f32 1.442695, %v958_v14 }
 0x2c1   : > { %1540 = vpow2.f32 %v959_v15 }
 0x2c4   : > { %v1074_v16 = vpop.xlane.xlu0 %1073 }
 0x2c5   : > { %v1075_v17 = vsub.f32 %v1071_v62, %v1074_v16 }
 0x2c6   : > { %v1539_v18 = vpop.eup %1538 }
 0x2c7   : > { %v1076_v19 = vmul.f32 1.442695, %v1075_v17  ;;  %v843_v20 = vsel %vm676_vm2, %v1539_v18, 0.0 }
 0x2c8   : > { %844 = vadd.xlane.f32.xlu0 %v843_v20 }
 0x2c9   : > { %1542 = vpow2.f32 %v1076_v19 }
 0x2ce   : > { %v1541_v21 = vpop.eup %1540 }
 0x2cf   : > { %v961_v22 = vsel %vm676_vm2, %v1541_v21, 0.0 }
 0x2d0   : > { %962 = vadd.xlane.f32.xlu1 %v961_v22 }
 0x2d6   : > { %v1543_v23 = vpop.eup %1542 }
 0x2d7   : > { %v1078_v24 = vsel %vm676_vm2, %v1543_v23, 0.0 }
 0x2d8   : > { %1079 = vadd.xlane.f32.xlu0 %v1078_v24 }
 0x2df   : > { %v732_v25 = vpop.xlane.xlu1 %731 }
 0x2e0   : > { %1544 = vrcp.f32 %v732_v25  ;;  %v1372_v25 = vld [vmem:[%s1884_s11] ss:$0 sm:$0xff] }
 0x2e1   : > { %1084 = vrot.lane.b32.xlu1 %v675_v45, %s1615_s28 }
 0x2e3   : > { %v851_v27 = vpop.permute.xlu1 %850 }
 0x2e4   : > { %v856_v30 = vsel %vm739_vm3, %v851_v27, 0 }
 0x2ed   : > { %v1545_v26 = vpop.eup %1544 }
 0x2ee   : > { %967 = vrot.lane.b32.xlu0 %v675_v45, %s1613_s26  ;;  %v734_v28 = vmul.f32 %v1545_v26, %v1537_v8 }
 0x2f0   : > { %v735_v29 = vpack.c.bf16 %v734_v28, %v734_v28 }
 0x2f2   : > { %1436 = vmatmul.mubr.msk.bf16.vlgmr.msra.gmra.mxu0 %vm676_vm2, %v735_v29 }
 0x2f3   : > { %1446 = vmatpush3.bf16.msra.mxu0 %v856_v30  ;;  %1447 = vmatprep.mubr.msk.bf16.mxu0 %vm1612_vm0, %v1611_v0 }
 0x2f4   : > { %1457 = vmatprep.subr.bf16.mxu0 %v1611_v0 }
 0x351   : > { %v845_v31 = vpop.xlane.xlu0 %844 }
 0x352   : > { %1546 = vrcp.f32 %v845_v31 }
 0x359   : > { %v963_v32 = vpop.xlane.xlu1 %962 }
 0x35a   : > { %1548 = vrcp.f32 %v963_v32 }
 0x35d   : > { %v1085_v41 = vpop.permute.xlu1 %1084 }
 0x35e   : > { %v1090_v43 = vsel %vm739_vm3, %v1085_v41, 0 }
 0x35f   : > { %v1547_v33 = vpop.eup %1546 }
 0x360   : > { %v847_v34 = vmul.f32 %v1547_v33, %v1539_v18 }
 0x361   : > { %v1080_v35 = vpop.xlane.xlu0 %1079 }
 0x362   : > { %1550 = vrcp.f32 %v1080_v35  ;;  %v848_v36 = vpack.c.bf16 %v847_v34, %v847_v34 }
 0x364   : > { %1448 = vmatmul.mubr.msk.bf16.vlgmr.msra.gmra.mxu0 %vm676_vm2, %v848_v36 }
 0x365   : > { %v968_v37 = vpop.permute.xlu0 %967  ;;  %1459 = vmatprep.mubr.msk.bf16.mxu0 %vm1612_vm0, %v1611_v0 }
 0x366   : > { %v973_v38 = vsel %vm739_vm3, %v968_v37, 0 }
 0x367   : > { %v1549_v39 = vpop.eup %1548  ;;  %1458 = vmatpush3.bf16.msra.mxu0 %v973_v38 }
 0x368   : > { %1469 = vmatprep.subr.bf16.mxu0 %v1611_v0  ;;  %v965_v40 = vmul.f32 %v1549_v39, %v1541_v21 }
 0x36a   : > { %v966_v42 = vpack.c.bf16 %v965_v40, %v965_v40 }
 0x36c   : > { %1460 = vmatmul.mubr.msk.bf16.vlgmr.msra.gmra.mxu0 %vm676_vm2, %v966_v42 }
 0x36d   : > { %1470 = vmatpush3.bf16.msra.mxu0 %v1090_v43  ;;  %1471 = vmatprep.mubr.msk.bf16.mxu0 %vm1612_vm0, %v1611_v0 }
 0x36f   : > { %v1551_v44 = vpop.eup %1550 }
 0x370   : > { %v1082_v45 = vmul.f32 %v1551_v44, %v1543_v23 }
 0x372   : > { %v1083_v46 = vpack.c.bf16 %v1082_v45, %v1082_v45 }
 0x374   : > { %1472 = vmatmul.mubr.msk.bf16.vlgmr.msra.gmra.mxu0 %vm676_vm2, %v1083_v46 }
 0x3b2   : > { %v777_v47 = vpop.f32.mrf.mxu0 }
 0x3b3   : > { %783 = vst.msk [vmem:[#allocation2] sm:$0xff] %vm676_vm2, %v777_v47 }
 0x3b4   : > { %v1437_v48 = vpop.f32.mrf.mxu0 }
 0x3b6   : > { %v780_v49 = vpop.f32.mrf.mxu0 }
 0x3b8   : > { %v1438_v50 = vpop.f32.mrf.mxu0 }
 0x424   : > { %v892_v51 = vpop.f32.mrf.mxu0 }
 0x425   : > { %899 = vrot.lane.b32.xlu1 %v892_v51, %s1616_s13 }
 0x426   : > { %v1449_v52 = vpop.f32.mrf.mxu0 }
 0x428   : > { %v895_v53 = vpop.f32.mrf.mxu0 }
 0x42a   : > { %v1450_v55 = vpop.f32.mrf.mxu0 }
 0x42c   : > { %v1009_v57 = vpop.f32.mrf.mxu0 }
 0x42d   : > { %1016 = vrot.lane.b32.xlu0 %v1009_v57, %s1617_s18 }
 0x42e   : > { %v1461_v58 = vpop.f32.mrf.mxu0 }
 0x430   : > { %v1012_v59 = vpop.f32.mrf.mxu0 }
 0x432   : > { %v1462_v60 = vpop.f32.mrf.mxu0 }
 0x434   : > { %v1126_v61 = vpop.f32.mrf.mxu0 }
 0x435   : > { %1133 = vrot.lane.b32.xlu1 %v1126_v61, %s1618_s19 }
 0x436   : > { %v1473_v62 = vpop.f32.mrf.mxu0 }
 0x438   : > { %v1129_v63 = vpop.f32.mrf.mxu0 }
 0x43a   : > { %v1474_v1 = vpop.f32.mrf.mxu0 }
 0x497   : > { %v900_v2 = vpop.permute.xlu1 %899 }
 0x498   : > { %903 = vst.msk [vmem:[#allocation2] sm:$0xff] %vm902_vm4, %v900_v2 }
 0x49f   : > { %v1017_v3 = vpop.permute.xlu0 %1016 }
 0x4a0   : > { %1020 = vst.msk [vmem:[#allocation2] sm:$0xff] %vm1019_vm5, %v1017_v3 }
 0x4a7   : > { %v1134_v0 = vpop.permute.xlu1 %1133 }
 0x4a8   : > { %1137 = vst.msk [vmem:[#allocation2] sm:$0xff] %vm1136_vm6, %v1134_v0 }
 0x4af   : > { %v1138_v4 = vld [vmem:[#allocation2] sm:$0xff] }
 0x4b0   : > { %v1139_v5 = vpack.c.bf16 %v1138_v4, %v1138_v4 }
 0x4b2   : > { %1480 = vmatmul.mubr.msk.bf16.vlgmr.msra.gmra.mxu1 %vm500_vm1, %v1139_v5 }
 0x572   : > { %v1200_v8 = vpop.f32.mrf.mxu1 }
 0x573   : > { %v1201_v9 = vadd.f32 %v1367_v7, %v1200_v8 }
 0x574   : > { %v1481_v10 = vpop.f32.mrf.mxu1 }
 0x575   : > { %v1206_v11 = vadd.f32 %v1201_v9, %v1758_v6  ;;  %v1371_v6 = vld [vmem:[%s1883_s10] ss:$0 sm:$0xff] }
 0x576   : > { %v1203_v12 = vpop.f32.mrf.mxu1 }
 0x577   : > { %v1207_v13 = vsel %vm500_vm1, %v1206_v11, 0.0 }
 0x578   : > { %1208 = vadd.xlane.f32.xlu0 %v1207_v13  ;;  %v1482_v14 = vpop.f32.mrf.mxu1 }
 0x601   : > { %v1209_v15 = vpop.xlane.xlu0 %1208 }
 0x602   : > { %v1211_v16 = vmul.f32 0.03125, %v1209_v15 }
 0x604   : > { %v1212_v17 = vsub.f32 %v1206_v11, %v1211_v16 }
 0x606   : > { %v1213_v18 = vmul.f32 %v1212_v17, %v1212_v17 }
 0x608   : > { %v1214_v19 = vsel %vm500_vm1, %v1213_v18, 0.0 }
 0x609   : > { %1215 = vadd.xlane.f32.xlu1 %v1214_v19 }
 0x692   : > { %v1216_v20 = vpop.xlane.xlu1 %1215 }
 0x693   : > { %v1217_v21 = vmul.f32 0.03125, %v1216_v20 }
 0x695   : > { %v1218_v22 = vadd.f32 1e-05, %v1217_v21 }
 0x697   : > { %1552 = vrsqrt.f32 %v1218_v22 }
 0x6a4   : > { %v1553_v23 = vpop.eup %1552 }
 0x6a5   : > { %v1220_v24 = vmul.f32 %v1553_v23, %v1212_v17 }
 0x6a7   : > { %v1228_v26 = vmul.f32 %v1371_v6, %v1220_v24 }
 0x6a9   : > { %v1236_v27 = vadd.f32 %v1372_v25, %v1228_v26 }
 0x6ab   : > { %1237 = vst.msk [vmem:[%s471_s21] sm:$0xff] %vm500_vm1, %v1236_v27 }
 0x6ac PF: > { %s23_s23 = sadd.s32 1, %s1606_s23   ;;  %s1888_s21 = smov %s1602_s22 }
 0x6ad   : > { %p20_p2 = scmp.ge.s32.totalorder %s23_s23, 4   ;;  %s1889_s22 = smov %s1891_s25 }
 0x6af   :  { %22 = sbr.rel (!%p20_p2) target bundleno = 2 (0x2), region = 106 }
 0x6b4   :  { %1263 = vsyncpa [#allocation4], 1 }
 0x6b5   :  { %1265 = vsyncpa [#allocation4 + $0x1], 1 }

// kernel: transformer_model_forward.17
= control target key start
LH: loop header
LB: loop body
LE: loop exit
PB: predicated region body
PF: predicated region fallthrough
CT: control target
= control target key end

     0   :  { %s1367_s24 = smov 0   ;;  %s1369_s25 = smov 0   ;;  %s1541_s0 = inlined_call_operand.vmem [shape: f32[16,32], index: 0, kind: input, shape index: {}]   ;;  %s1542_s1 = inlined_call_operand.vmem [shape: bf16[32,2048], index: 1, kind: input, shape index: {}]   ;;  %s1543_s2 = inlined_call_operand.vmem [shape: f32[1,2048], index: 2, kind: input, shape index: {}]   ;;  %s1544_s3 = inlined_call_operand.vmem [shape: bf16[2048,32], index: 3, kind: input, shape index: {}]   ;;  %s1545_s4 = inlined_call_operand.vmem [shape: f32[1,32], index: 4, kind: input, shape index: {}]   ;;  %s1546_s5 = inlined_call_operand.vmem [shape: f32[1,32], index: 5, kind: input, shape index: {}]   ;;  %s1547_s6 = inlined_call_operand.vmem [shape: f32[1,32], index: 6, kind: input, shape index: {}]   ;;  %s1548_s7 = inlined_call_operand.vmem [shape: f32[16,32], index: 7, kind: output, shape index: {}]  }
   0x1   :  { %s1371_s26 = smov 0   ;;  %s1373_s27 = smov 0  }
   0x2   :  { %s1375_s28 = smov 0  }
   0x3 LB: > { %s26_s29 = sadd.s32 1, %s1319_s27  ;;  %p69_p1 = scmp.ne.s32.totalorder %s1311_s25, %s1307_s24  ;;  %s1323_s28 = sphi %s1375_s28, %s17_s28   ;;  %s1319_s27 = sphi %s1373_s27, %s1552_s27   ;;  %s1315_s26 = sphi %s1371_s26, %s1551_s26   ;;  %s1311_s25 = sphi %s1369_s25, %s1550_s25   ;;  %s1307_s24 = sphi %s1367_s24, %s1549_s24  }
   0x4   : > { %p27_p0 = scmp.ge.s32.totalorder %s26_s29, 4  ;;  %p70_p2 = scmp.eq.s32.totalorder %s1323_s28, 0 }
   0x5   : > { %s62_s8 = sadd.s32 1, %s1311_s25  ;;  %p1090_p5 = scmp.ge.s32.totalorder %s1323_s28, 4 }
   0x6   : > { %s1554_s29 = smov (%p27_p0, %s26_s29), 0  ;;  %p71_p3 = por %p70_p2, %p69_p1 }
   0x7   : > { %s59_s30 = ssub.s32 %s1319_s27, %s1554_s29  ;;  %254 = sbr.rel (%p1090_p5) target bundleno = 20 (0x14), region = 32 }
   0x8   : > { %p60_p4 = scmp.eq.s32.totalorder %s59_s30, 0 }
   0xa   : > { %s1402_s9 = scalar_select %p60_p4, %s1311_s25, %s62_s8  }
   0xc   : > { %257 = sbr.rel (!%p71_p3) target bundleno = 20 (0x14), region = 36  ;;  %s259_s10 = sand.u32 (%p71_p3), 1, %s1311_s25  }
   0xd   : > { %s1150_s11 = sshll.u32 (%p71_p3), %s1319_s27, 4  ;;  %s1091_s12 = sshll.u32 (%p71_p3), %s259_s10, 6 }
   0xe   : > { %s264_s15 = scalar_lea.vmem (%p71_p3), %s1542_s1, %s1150_s11  ;;  %s261_s16 = scalar_lea.vmem (%p71_p3), [#allocation2], %s1091_s12 }
   0xf   : > { %v277_v0 = vld [vmem:[%s264_s15] sm:$0xff] (%p71_p3)  ;;  %v279_v1 = vld [vmem:[%s264_s15 + $0x8] sm:$0xff] (%p71_p3) }
  0x10   : > { %v281_v2 = vld [vmem:[%s264_s15 + $0x40] sm:$0xff] (%p71_p3)  ;;  %278 = vst [vmem:[%s261_s16] sm:$0xff] (%p71_p3), %v277_v0  ;;  %280 = vst [vmem:[%s261_s16 + $0x8] sm:$0xff] (%p71_p3), %v279_v1  ;;  %v283_v3 = vld [vmem:[%s264_s15 + $0x48] sm:$0xff] (%p71_p3) }
  0x11   : > { %282 = vst [vmem:[%s261_s16 + $0x10] sm:$0xff] %v281_v2  ;;  %v285_v4 = vld [vmem:[%s264_s15 + $0x80] sm:$0xff]  ;;  %v287_v5 = vld [vmem:[%s264_s15 + $0x88] sm:$0xff]  ;;  %284 = vst [vmem:[%s261_s16 + $0x18] sm:$0xff] %v283_v3 }
  0x12   : > { %286 = vst [vmem:[%s261_s16 + $0x20] sm:$0xff] %v285_v4  ;;  %288 = vst [vmem:[%s261_s16 + $0x28] sm:$0xff] %v287_v5  ;;  %v289_v6 = vld [vmem:[%s264_s15 + $0xc0] sm:$0xff]  ;;  %v291_v7 = vld [vmem:[%s264_s15 + $0xc8] sm:$0xff] }
  0x13   : > { %290 = vst [vmem:[%s261_s16 + $0x30] sm:$0xff] %v289_v6  ;;  %292 = vst [vmem:[%s261_s16 + $0x38] sm:$0xff] %v291_v7 }
  0x14 PF: > { %p1094_p6 = scmp.ge.s32.totalorder %s1323_s28, 1  ;;  %p314_p7 = scmp.lt.s32.totalorder %s1323_s28, 5 }
  0x16   : > { %p315_p8 = pnand %p1094_p6, %p314_p7 }
  0x17   : > { %s321_s17 = sand.u32 (!%p315_p8), 1, %s1307_s24   ;;  %s1096_s18 = sshll.u32 (!%p315_p8), %s1315_s26, 2 }
  0x18   : > { %318 = sbr.rel (%p315_p8) target bundleno = 780 (0x30c), region = 67  ;;  %s1095_s19 = sshll.u32 (!%p315_p8), %s321_s17, 6 }
  0x19   : > { %p374_p9 = scmp.lt.s32.totalorder (!%p315_p8), %s1096_s18, 15  ;;  %s1097_s20 = sshll.u32 (!%p315_p8), %s1315_s26, 6 }
  0x1a   : > { %p379_p10 = scmp.lt.s32.totalorder (!%p315_p8), %s1097_s20, 255  ;;  %s323_s24 = scalar_lea.vmem (!%p315_p8), [#allocation2], %s1095_s19 }
  0x1b   : > { %p1099_p11 = scmp.ne.s32.totalorder (!%p315_p8), %s1315_s26, 0 }
  0x1d   : > { %s1556_s18 = smov (!%p374_p9, %s1096_s18), 15  ;;  %s1558_s20 = smov (!%p379_p10, %s1097_s20), 255 }
  0x1e   : > { %s376_s23 = scalar_lea.vmem %s1543_s2, %s1556_s18  ;;  %s1098_s30 = sshll.u32 %s1558_s20, 2 }
  0x1f   : > { %s1424_s11 = scalar_lea.vmem %s1544_s3, %s1098_s30  ;;  %394 = sbr.rel (%p1099_p11) target bundleno = 38 (0x26), region = 75 }
  0x24   : > { %vm395_vm0 = vcmask 261120   ;;  %v1325_v8 = vmov 0.0  }
  0x25   : > { %396 = vst.msk [vmem:[%s1548_s7] sm:$0xff] %vm395_vm0, %v1325_v8  ;;  %397 = vst.msk [vmem:[%s1548_s7 + $0x8] sm:$0xff] %vm395_vm0, %v1325_v8 }
  0x26 PF: > { %v1237_v9 = vld [vmem:[%s323_s24 + $0x24] ss:$16 sps:$4 sm:$0xff]   ;;  %v1239_v10 = vld [vmem:[%s323_s24 + $0x2c] ss:$16 sps:$4 sm:$0xff]   ;;  %v1326_v11 = vmov 0   ;;  %vm471_vm1 = vcmask 261120   ;;  %v411_v53 = vlaneseq }
  0x27   : > { %507 = vmatprep.mubr.bf16.mxu0 %v1326_v11  ;;  %550 = vmatprep.mubr.bf16.mxu1 %v1326_v11  ;;  %v1241_v12 = vld [vmem:[%s323_s24 + $0x20] ss:$16 sps:$4 sm:$0xff]   ;;  %v1242_v13 = vld [vmem:[%s323_s24 + $0x28] ss:$16 sps:$4 sm:$0xff]   ;;  %v1243_v14 = vld [vmem:[%s323_s24 + $0x4] ss:$16 sps:$4 sm:$0xff]  }
  0x28   : > { %487 = vmatprep.subr.bf16.mxu0 %v1237_v9  ;;  %530 = vmatprep.subr.bf16.mxu1 %v1239_v10  ;;  %v1245_v15 = vld [vmem:[%s323_s24 + $0xc] ss:$16 sps:$4 sm:$0xff]   ;;  %v1247_v16 = vld [vmem:[%s323_s24] ss:$16 sps:$4 sm:$0xff]   ;;  %v1248_v17 = vld [vmem:[%s323_s24 + $0x8] ss:$16 sps:$4 sm:$0xff]  }
  0x29   : > { %488 = vmatpush1.bf16.msra.mxu0 %v1241_v12  ;;  %531 = vmatpush1.bf16.msra.mxu1 %v1242_v13  ;;  %v398_v18 = vld [vmem:[%s1541_s0] sm:$0xff]  ;;  %v399_v19 = vld [vmem:[%s1541_s0 + $0x8] sm:$0xff]  ;;  %v1249_v20 = vld [vmem:[%s1424_s11 + $0x78] sm:$0xff]   ;;  %v412_v54 = vshrl.u32 %v411_v53, 7  ;;  %p1142_p12 = scmp.ne.s32.totalorder %s1315_s26, 3 }
  0x2a   : > { %489 = vmatprep.subr.bf16.mxu0 %v1243_v14  ;;  %532 = vmatprep.subr.bf16.mxu1 %v1245_v15  ;;  %v400_v21 = vpack.c.bf16 %v399_v19, %v398_v18  ;;  %v1250_v22 = vld [vmem:[%s1424_s11 + $0xf8] sm:$0xff]   ;;  %v1253_v25 = vld [vmem:[%s1424_s11 + $0x70] sm:$0xff]   ;;  %v1257_v29 = vld [vmem:[%s1424_s11 + $0x68] sm:$0xff]  }
  0x2b   : > { %v1251_v23 = vld [vmem:[%s1424_s11 + $0x38] sm:$0xff]   ;;  %v1254_v26 = vld [vmem:[%s1424_s11 + $0xf0] sm:$0xff]   ;;  %v1258_v30 = vld [vmem:[%s1424_s11 + $0xe8] sm:$0xff]   ;;  %v417_v55 = vsub.s32 1, %v412_v54  ;;  %v425_v56 = vsub.s32 3, %v412_v54  ;;  %v413_v57 = vsub.s32 0, %v412_v54 }
  0x2c   : > { %v1252_v24 = vld [vmem:[%s1424_s11 + $0xb8] sm:$0xff]   ;;  %v1255_v27 = vld [vmem:[%s1424_s11 + $0x30] sm:$0xff]   ;;  %v1259_v31 = vld [vmem:[%s1424_s11 + $0x28] sm:$0xff]   ;;  %v421_v58 = vsub.s32 2, %v412_v54 }
  0x2d   : > { %490 = vmatpush1.bf16.msra.mxu0 %v1247_v16  ;;  %533 = vmatpush1.bf16.msra.mxu1 %v1248_v17  ;;  %v1256_v28 = vld [vmem:[%s1424_s11 + $0xb0] sm:$0xff]   ;;  %v1260_v32 = vld [vmem:[%s1424_s11 + $0xa8] sm:$0xff]   ;;  %v1261_v33 = vld [vmem:[%s1424_s11 + $0x60] sm:$0xff]  }
  0x2e   : > { %1151 = vmatprep.subr.bf16.mxu0 %v1249_v20  ;;  %1173 = vmatprep.subr.bf16.mxu1 %v1250_v22  ;;  %v1262_v34 = vld [vmem:[%s1424_s11 + $0xe0] sm:$0xff]   ;;  %v1265_v37 = vld [vmem:[%s1424_s11 + $0x58] sm:$0xff]   ;;  %v1269_v41 = vld [vmem:[%s1424_s11 + $0x50] sm:$0xff]  }
  0x2f   : > { %v1263_v35 = vld [vmem:[%s1424_s11 + $0x20] sm:$0xff]   ;;  %v1266_v38 = vld [vmem:[%s1424_s11 + $0xd8] sm:$0xff]   ;;  %v1270_v42 = vld [vmem:[%s1424_s11 + $0xd0] sm:$0xff]  }
  0x30   : > { %1108 = vmatmul.mubr.msk.bf16.vlgmr.msra.gmra.mxu0 %vm471_vm1, %v400_v21  ;;  %1109 = vmatmul.mubr.msk.bf16.vlgmr.msra.gmra.mxu1 %vm471_vm1, %v400_v21  ;;  %v1264_v36 = vld [vmem:[%s1424_s11 + $0xa0] sm:$0xff]   ;;  %v1267_v39 = vld [vmem:[%s1424_s11 + $0x18] sm:$0xff]   ;;  %v1271_v43 = vld [vmem:[%s1424_s11 + $0x10] sm:$0xff]  }
  0x31   : > { %1152 = vmatpush3.bf16.msra.mxu0 %v1251_v23  ;;  %1174 = vmatpush3.bf16.msra.mxu1 %v1252_v24  ;;  %v1268_v40 = vld [vmem:[%s1424_s11 + $0x98] sm:$0xff]   ;;  %v1272_v44 = vld [vmem:[%s1424_s11 + $0x90] sm:$0xff]   ;;  %v1273_v45 = vld [vmem:[%s1424_s11 + $0x48] sm:$0xff]  }
  0x32   : > { %1153 = vmatprep.subr.bf16.mxu0 %v1253_v25  ;;  %1175 = vmatprep.subr.bf16.mxu1 %v1254_v26  ;;  %v1274_v46 = vld [vmem:[%s1424_s11 + $0xc8] sm:$0xff]   ;;  %v1277_v49 = vld [vmem:[%s1424_s11 + $0x40] sm:$0xff]  }
  0x33   : > { %v1275_v47 = vld [vmem:[%s1424_s11 + $0x8] sm:$0xff]   ;;  %v1278_v50 = vld [vmem:[%s1424_s11 + $0xc0] sm:$0xff]  }
  0x34   : > { %v1276_v48 = vld [vmem:[%s1424_s11 + $0x88] sm:$0xff]   ;;  %v1279_v51 = vld [vmem:[%s1424_s11] sm:$0xff]  }
  0x35   : > { %1154 = vmatpush3.bf16.msra.mxu0 %v1255_v27  ;;  %1176 = vmatpush3.bf16.msra.mxu1 %v1256_v28  ;;  %v1280_v52 = vld [vmem:[%s1424_s11 + $0x80] sm:$0xff]  }
  0x36   : > { %1155 = vmatprep.subr.bf16.mxu0 %v1257_v29  ;;  %1177 = vmatprep.subr.bf16.mxu1 %v1258_v30  ;;  %v409_v59 = vld [vmem:[%s376_s23] sm:$0xf] }
  0x37   : > { %v418_v62 = vrot.slane %v409_v59, %v417_v55  ;;  %v426_v63 = vrot.slane %v409_v59, %v425_v56  ;;  %v414_v0 = vrot.slane %v409_v59, %v413_v57  ;;  %v422_v1 = vrot.slane %v409_v59, %v421_v58 }
  0x39   : > { %1156 = vmatpush3.bf16.msra.mxu0 %v1259_v31  ;;  %1178 = vmatpush3.bf16.msra.mxu1 %v1260_v32 }
  0x3a   : > { %1157 = vmatprep.subr.bf16.mxu0 %v1261_v33  ;;  %1179 = vmatprep.subr.bf16.mxu1 %v1262_v34  ;;  %v569_v34 = vld [vmem:[%s1548_s7] sm:$0xff] }
  0x3d   : > { %1158 = vmatpush3.bf16.msra.mxu0 %v1263_v35  ;;  %1180 = vmatpush3.bf16.msra.mxu1 %v1264_v36 }
  0x3e   : > { %1159 = vmatprep.subr.bf16.mxu0 %v1265_v37  ;;  %1181 = vmatprep.subr.bf16.mxu1 %v1266_v38 }
  0x41   : > { %1160 = vmatpush3.bf16.msra.mxu0 %v1267_v39  ;;  %1182 = vmatpush3.bf16.msra.mxu1 %v1268_v40 }
  0x42   : > { %1161 = vmatprep.subr.bf16.mxu0 %v1269_v41  ;;  %1183 = vmatprep.subr.bf16.mxu1 %v1270_v42 }
  0x45   : > { %1162 = vmatpush3.bf16.msra.mxu0 %v1271_v43  ;;  %1184 = vmatpush3.bf16.msra.mxu1 %v1272_v44  ;;  %v570_v43 = vld [vmem:[%s1548_s7 + $0x8] sm:$0xff] }
  0x46   : > { %1163 = vmatprep.subr.bf16.mxu0 %v1273_v45  ;;  %1185 = vmatprep.subr.bf16.mxu1 %v1274_v46 }
  0x49   : > { %1164 = vmatpush3.bf16.msra.mxu0 %v1275_v47  ;;  %1186 = vmatpush3.bf16.msra.mxu1 %v1276_v48 }
  0x4a   : > { %1165 = vmatprep.subr.bf16.mxu0 %v1277_v49  ;;  %1187 = vmatprep.subr.bf16.mxu1 %v1278_v50 }
  0x4d   : > { %1166 = vmatpush3.bf16.msra.mxu0 %v1279_v51  ;;  %1188 = vmatpush3.bf16.msra.mxu1 %v1280_v52 }
  0xf0   : > { %v509_v60 = vpop.f32.mrf.mxu0  ;;  %v552_v61 = vpop.f32.mrf.mxu1 }
  0xf1   : > { %v510_v10 = vadd.f32 %v509_v60, %v414_v0  ;;  %v553_v11 = vadd.f32 %v552_v61, %v422_v1 }
  0xf2   : > { %v511_v2 = vpop.f32.mrf.mxu0  ;;  %v554_v3 = vpop.f32.mrf.mxu1 }
  0xf3   : > { %v512_v6 = vadd.f32 %v511_v2, %v418_v62  ;;  %v555_v7 = vadd.f32 %v554_v3, %v426_v63  ;;  %v561_v22 = vmax.f32 %v510_v10, 0.0  ;;  %v563_v23 = vmax.f32 %v553_v11, 0.0 }
  0xf4   : > { %v513_v4 = vpop.f32.mrf.mxu0  ;;  %v556_v5 = vpop.f32.mrf.mxu1 }
  0xf5   : > { %v514_v8 = vadd.f32 %v513_v4, %v414_v0  ;;  %v557_v9 = vadd.f32 %v556_v5, %v422_v1  ;;  %v562_v18 = vmax.f32 %v512_v6, 0.0  ;;  %v564_v19 = vmax.f32 %v555_v7, 0.0 }
  0xf6   : > { %v515_v12 = vpop.f32.mrf.mxu0  ;;  %v558_v13 = vpop.f32.mrf.mxu1 }
  0xf7   : > { %v516_v14 = vadd.f32 %v515_v12, %v418_v62  ;;  %v559_v15 = vadd.f32 %v558_v13, %v426_v63  ;;  %v565_v16 = vmax.f32 %v514_v8, 0.0  ;;  %v567_v17 = vmax.f32 %v557_v9, 0.0 }
  0xf9   : > { %v566_v20 = vmax.f32 %v516_v14, 0.0  ;;  %v568_v21 = vmax.f32 %v559_v15, 0.0  ;;  %v571_v26 = vpack.c.bf16 %v565_v16, %v561_v22  ;;  %v573_v27 = vpack.c.bf16 %v567_v17, %v563_v23 }
  0xfb   : > { %v572_v24 = vpack.c.bf16 %v566_v20, %v562_v18  ;;  %v574_v25 = vpack.c.bf16 %v568_v21, %v564_v19 }
  0xfd   : > { %863 = vmatprep.mubr.bf16.mxu0 %v572_v24  ;;  %904 = vmatprep.mubr.bf16.mxu1 %v574_v25 }
  0xfe   : > { %864 = vmatmul.mubr.bf16.vlgmr.msra.gmra.mxu0 %v571_v26  ;;  %905 = vmatmul.mubr.bf16.vlgmr.msra.gmra.mxu1 %v573_v27 }
 0x1be   : > { %v1167_v28 = vpop.f32.mrf.mxu0  ;;  %v1189_v29 = vpop.f32.mrf.mxu1 }
 0x1c0   : > { %v1168_v30 = vpop.f32.mrf.mxu0  ;;  %v1190_v31 = vpop.f32.mrf.mxu1 }
 0x1c1   : > { %v1169_v32 = vadd.f32 %v1168_v30, %v1167_v28  ;;  %v1191_v33 = vadd.f32 %v1190_v31, %v1189_v29 }
 0x1c2   : > { %v1170_v35 = vpop.f32.mrf.mxu0  ;;  %v1192_v36 = vpop.f32.mrf.mxu1 }
 0x1c3   : > { %v907_v37 = vadd.f32 %v1191_v33, %v1169_v32 }
 0x1c4   : > { %v1171_v38 = vpop.f32.mrf.mxu0  ;;  %v1193_v39 = vpop.f32.mrf.mxu1 }
 0x1c5   : > { %v913_v40 = vadd.f32 %v907_v37, %v569_v34  ;;  %v1172_v41 = vadd.f32 %v1171_v38, %v1170_v35  ;;  %v1194_v42 = vadd.f32 %v1193_v39, %v1192_v36 }
 0x1c7   : > { %915 = vst.msk [vmem:[%s1548_s7] sm:$0xff] %vm471_vm1, %v913_v40  ;;  %v910_v44 = vadd.f32 %v1194_v42, %v1172_v41  ;;  %920 = sbr.rel (%p1142_p12) target bundleno = 780 (0x30c), region = 79 }
 0x1c9   : > { %v914_v45 = vadd.f32 %v910_v44, %v570_v43 }
 0x1cb   : > { %916 = vst.msk [vmem:[%s1548_s7 + $0x8] sm:$0xff] %vm471_vm1, %v914_v45 }
 0x1cc   : > { %v921_v46 = vld [vmem:[%s1541_s0] sm:$0xff]  ;;  %v922_v50 = vld [vmem:[%s1541_s0 + $0x8] sm:$0xff] }
 0x1cd   : > { %v1143_v48 = vld [vmem:[%s1545_s4] ss:$0 sm:$0xff] }
 0x1ce   : > { %v923_v47 = vld [vmem:[%s1548_s7] sm:$0xff] }
 0x1cf   : > { %v925_v49 = vadd.f32 %v923_v47, %v921_v46  ;;  %v1144_v10 = vld [vmem:[%s1546_s5] ss:$0 sm:$0xff] }
 0x1d0   : > { %v1145_v12 = vld [vmem:[%s1547_s6] ss:$0 sm:$0xff] }
 0x1d1   : > { %v934_v53 = vadd.f32 %v1143_v48, %v925_v49 }
 0x1d2   : > { %v924_v51 = vld [vmem:[%s1548_s7 + $0x8] sm:$0xff] }
 0x1d3   : > { %v926_v52 = vadd.f32 %v924_v51, %v922_v50  ;;  %v936_v55 = vsel %vm471_vm1, %v934_v53, 0.0 }
 0x1d4   : > { %937 = vadd.xlane.f32.xlu0 %v936_v55 }
 0x1d5   : > { %v935_v54 = vadd.f32 %v1143_v48, %v926_v52 }
 0x1d7   : > { %v939_v56 = vsel %vm471_vm1, %v935_v54, 0.0 }
 0x1d8   : > { %940 = vadd.xlane.f32.xlu0 %v939_v56 }
 0x25d   : > { %v938_v57 = vpop.xlane.xlu0 %937 }
 0x25e   : > { %v943_v58 = vmul.f32 0.03125, %v938_v57 }
 0x260   : > { %v945_v59 = vsub.f32 %v934_v53, %v943_v58 }
 0x261   : > { %v941_v60 = vpop.xlane.xlu0 %940 }
 0x262   : > { %v944_v61 = vmul.f32 0.03125, %v941_v60  ;;  %v947_v62 = vmul.f32 %v945_v59, %v945_v59 }
 0x264   : > { %v946_v63 = vsub.f32 %v935_v54, %v944_v61  ;;  %v949_v0 = vsel %vm471_vm1, %v947_v62, 0.0 }
 0x265   : > { %950 = vadd.xlane.f32.xlu1 %v949_v0 }
 0x266   : > { %v948_v1 = vmul.f32 %v946_v63, %v946_v63 }
 0x268   : > { %v952_v2 = vsel %vm471_vm1, %v948_v1, 0.0 }
 0x269   : > { %953 = vadd.xlane.f32.xlu1 %v952_v2 }
 0x2ee   : > { %v951_v3 = vpop.xlane.xlu1 %950 }
 0x2ef   : > { %v955_v4 = vmul.f32 0.03125, %v951_v3 }
 0x2f1   : > { %v957_v5 = vadd.f32 1e-05, %v955_v4 }
 0x2f2   : > { %v954_v6 = vpop.xlane.xlu1 %953 }
 0x2f3   : > { %1281 = vrsqrt.f32 %v957_v5  ;;  %v956_v7 = vmul.f32 0.03125, %v954_v6 }
 0x2f5   : > { %v958_v8 = vadd.f32 1e-05, %v956_v7 }
 0x2f7   : > { %1283 = vrsqrt.f32 %v958_v8 }
 0x300   : > { %v1282_v9 = vpop.eup %1281 }
 0x301   : > { %v961_v11 = vmul.f32 %v1282_v9, %v945_v59 }
 0x303   : > { %v970_v13 = vmul.f32 %v1144_v10, %v961_v11 }
 0x304   : > { %v1284_v14 = vpop.eup %1283 }
 0x305   : > { %v979_v15 = vadd.f32 %v1145_v12, %v970_v13  ;;  %v962_v16 = vmul.f32 %v1284_v14, %v946_v63 }
 0x307   : > { %981 = vst.msk [vmem:[%s1548_s7] sm:$0xff] %vm471_vm1, %v979_v15  ;;  %v971_v17 = vmul.f32 %v1144_v10, %v962_v16 }
 0x309   : > { %v980_v18 = vadd.f32 %v1145_v12, %v971_v17 }
 0x30b   : > { %982 = vst.msk [vmem:[%s1548_s7 + $0x8] sm:$0xff] %vm471_vm1, %v980_v18 }
 0x30c PF: > { %s17_s28 = sadd.s32 1, %s1323_s28   ;;  %s1549_s24 = smov %s1311_s25 }
 0x30d   : > { %p14_p13 = scmp.ge.s32.totalorder %s17_s28, 6   ;;  %s1550_s25 = smov %s1402_s9 }
 0x30e   : > { %s1551_s26 = smov %s1319_s27  ;;  %s1552_s27 = smov %s1554_s29 }
 0x30f   :  { %16 = sbr.rel (!%p14_p13) target bundleno = 3 (0x3), region = 123 }

// kernel: transformer_model_forward.20
= control target key start
LH: loop header
LB: loop body
LE: loop exit
PB: predicated region body
PF: predicated region fallthrough
CT: control target
= control target key end

     0   :  { %vm16_vm0 = vcmask 261120   ;;  %s118_s0 = inlined_call_operand.vmem [shape: f32[16,32], index: 0, kind: input, shape index: {}]   ;;  %s119_s1 = inlined_call_operand.vmem [shape: f32[1,32], index: 1, kind: input, shape index: {}]   ;;  %s120_s2 = inlined_call_operand.vmem [shape: f32[1,32], index: 2, kind: input, shape index: {}]   ;;  %s121_s3 = inlined_call_operand.vmem [shape: f32[16,32], index: 3, kind: output, shape index: {}]  }
   0x1   :  { %v14_v0 = vld [vmem:[%s118_s0] sm:$0xff]  ;;  %v15_v1 = vld [vmem:[%s118_s0 + $0x8] sm:$0xff] }
   0x2   :  { %v17_v2 = vsel %vm16_vm0, %v14_v0, 0.0  ;;  %v20_v3 = vsel %vm16_vm0, %v15_v1, 0.0  ;;  %v68_v21 = vld [vmem:[%s119_s1] ss:$0 sm:$0xff] }
   0x3   :  { %18 = vadd.xlane.f32.xlu0 %v17_v2  ;;  %v69_v23 = vld [vmem:[%s120_s2] ss:$0 sm:$0xff] }
   0x7   :  { %21 = vadd.xlane.f32.xlu0 %v20_v3 }
  0x8c   :  { %v19_v4 = vpop.xlane.xlu0 %18 }
  0x8d   :  { %v24_v5 = vmul.f32 0.03125, %v19_v4 }
  0x8f   :  { %v26_v6 = vsub.f32 %v14_v0, %v24_v5 }
  0x90   :  { %v22_v7 = vpop.xlane.xlu0 %21 }
  0x91   :  { %v25_v8 = vmul.f32 0.03125, %v22_v7  ;;  %v28_v9 = vmul.f32 %v26_v6, %v26_v6 }
  0x93   :  { %v27_v10 = vsub.f32 %v15_v1, %v25_v8  ;;  %v30_v11 = vsel %vm16_vm0, %v28_v9, 0.0 }
  0x94   :  { %31 = vadd.xlane.f32.xlu1 %v30_v11 }
  0x95   :  { %v29_v12 = vmul.f32 %v27_v10, %v27_v10 }
  0x97   :  { %v33_v13 = vsel %vm16_vm0, %v29_v12, 0.0 }
  0x98   :  { %34 = vadd.xlane.f32.xlu1 %v33_v13 }
 0x11d   :  { %v32_v14 = vpop.xlane.xlu1 %31 }
 0x11e   :  { %v36_v15 = vmul.f32 0.03125, %v32_v14 }
 0x120   :  { %v38_v16 = vadd.f32 1e-05, %v36_v15 }
 0x121   :  { %v35_v17 = vpop.xlane.xlu1 %34 }
 0x122   :  { %70 = vrsqrt.f32 %v38_v16  ;;  %v37_v18 = vmul.f32 0.03125, %v35_v17 }
 0x124   :  { %v39_v19 = vadd.f32 1e-05, %v37_v18 }
 0x126   :  { %72 = vrsqrt.f32 %v39_v19 }
 0x12f   :  { %v71_v20 = vpop.eup %70 }
 0x130   :  { %v42_v22 = vmul.f32 %v71_v20, %v26_v6 }
 0x132   :  { %v51_v24 = vmul.f32 %v68_v21, %v42_v22 }
 0x133   :  { %v73_v25 = vpop.eup %72 }
 0x134   :  { %v60_v26 = vadd.f32 %v69_v23, %v51_v24  ;;  %v43_v27 = vmul.f32 %v73_v25, %v27_v10 }
 0x136   :  { %62 = vst.msk [vmem:[%s121_s3] sm:$0xff] %vm16_vm0, %v60_v26  ;;  %v52_v28 = vmul.f32 %v68_v21, %v43_v27 }
 0x138   :  { %v61_v29 = vadd.f32 %v69_v23, %v52_v28 }
 0x13a   :  { %63 = vst.msk [vmem:[%s121_s3 + $0x8] sm:$0xff] %vm16_vm0, %v61_v29 }

// kernel: transformer_model_forward.15
= control target key start
LH: loop header
LB: loop body
LE: loop exit
PB: predicated region body
PF: predicated region fallthrough
CT: control target
= control target key end

     0   :  { %vm19_vm0 = vcmask 261120   ;;  %vm21_vm1 = vcmask 257024   ;;  %v123_v0 = vmov 0.0   ;;  %vm124_vm2 = vmmov 0   ;;  %s193_s3 = inlined_call_operand.vmem [shape: f32[12,32], index: 3, kind: output, shape index: {}]   ;;  %s194_s1 = inlined_call_operand.vmem [shape: bf16[16,32], index: 1, kind: input, shape index: {}]   ;;  %s195_s0 = inlined_call_operand.vmem [shape: f32[12,16], index: 0, kind: input, shape index: {}]   ;;  %s196_s2 = inlined_call_operand.vmem [shape: f32[1,32], index: 2, kind: input, shape index: {}]  }
   0x1   :  { %20 = vst.msk [vmem:[%s193_s3] sm:$0xff] %vm19_vm0, %v123_v0  ;;  %114 = vmatprep.subr.bf16.mxu0 %v123_v0  ;;  %v122_v1 = vld [vmem:[%s194_s1] sm:$0xff]   ;;  %116 = vmatprep.mubr.msk.bf16.mxu0 %vm124_vm2, %v123_v0  ;;  %v26_v3 = vld [vmem:[%s195_s0 + $0x8] sm:$0xf]  ;;  %vm36_vm3 = vcmask 130048  }
   0x2   :  { %22 = vst.msk [vmem:[%s193_s3 + $0x8] sm:$0xf] %vm21_vm1, %v123_v0  ;;  %v25_v2 = vld [vmem:[%s195_s0] sm:$0xff]  ;;  %115 = vmatpush3.bf16.msra.mxu0 %v122_v1 }
   0x3   :  { %v27_v4 = vpack.c.bf16 %v26_v3, %v25_v2  ;;  %v111_v13 = vld [vmem:[%s196_s2] ss:$0 sm:$0xff] }
   0x5   :  { %117 = vmatmul.mubr.msk.bf16.vlgmr.msra.gmra.mxu0 %vm36_vm3, %v27_v4 }
   0x8   :  { %v23_v5 = vld [vmem:[%s193_s3] sm:$0xff] }
   0x9   :  { %v24_v9 = vld [vmem:[%s193_s3 + $0x8] sm:$0xf] }
  0xc5   :  { %v74_v6 = vpop.f32.mrf.mxu0 }
  0xc6   :  { %v81_v7 = vadd.f32 %v74_v6, %v23_v5 }
  0xc7   :  { %v118_v8 = vpop.f32.mrf.mxu0 }
  0xc8   :  { %84 = vst.msk [vmem:[%s193_s3] sm:$0xff] %vm19_vm0, %v81_v7 }
  0xc9   :  { %v77_v10 = vpop.f32.mrf.mxu0 }
  0xca   :  { %v82_v11 = vadd.f32 %v77_v10, %v24_v9 }
  0xcb   :  { %v119_v12 = vpop.f32.mrf.mxu0 }
  0xcc   :  { %86 = vst.msk [vmem:[%s193_s3 + $0x8] sm:$0xf] %vm21_vm1, %v82_v11 }
  0xcf   :  { %v90_v14 = vld [vmem:[%s193_s3] sm:$0xff] }
  0xd0   :  { %v99_v15 = vadd.f32 %v111_v13, %v90_v14 }
  0xd2   :  { %v101_v16 = vmul.f32 5.656854, %v99_v15 }
  0xd3   :  { %v91_v17 = vld [vmem:[%s193_s3 + $0x8] sm:$0xf] }
  0xd4   :  { %103 = vst.msk [vmem:[%s193_s3] sm:$0xff] %vm19_vm0, %v101_v16  ;;  %v100_v18 = vadd.f32 %v111_v13, %v91_v17 }
  0xd6   :  { %v102_v19 = vmul.f32 5.656854, %v100_v18 }
  0xd8   :  { %104 = vst.msk [vmem:[%s193_s3 + $0x8] sm:$0xf] %vm21_vm1, %v102_v19 }

// kernel: transformer_model_forward.18
= control target key start
LH: loop header
LB: loop body
LE: loop exit
PB: predicated region body
PF: predicated region fallthrough
CT: control target
= control target key end

     0   :  { %s1608_s21 = smov 0   ;;  %s1610_s22 = smov 0   ;;  %s1777_s0 = inlined_call_operand.vmem [shape: f32[2,8,32], index: 0, kind: input, shape index: {}, may-alias: {0,1}]   ;;  %s1778_s1 = inlined_call_operand.vmem [shape: f32[2,8,32], index: 1, kind: input, shape index: {}, may-alias: {0,1}]   ;;  %s1779_s2 = inlined_call_operand.vmem [shape: bf16[32,32], index: 2, kind: input, shape index: {}]   ;;  %s1780_s3 = inlined_call_operand.vmem [shape: bf16[32,32], index: 3, kind: input, shape index: {}]   ;;  %s1781_s4 = inlined_call_operand.vmem [shape: bf16[32,32], index: 4, kind: input, shape index: {}]   ;;  %s1782_s5 = inlined_call_operand.vmem [shape: f32[1,32], index: 5, kind: input, shape index: {}]   ;;  %s1783_s6 = inlined_call_operand.vmem [shape: f32[1,32], index: 6, kind: input, shape index: {}]   ;;  %s1784_s7 = inlined_call_operand.vmem [shape: f32[1,32], index: 7, kind: input, shape index: {}]   ;;  %s1785_s8 = inlined_call_operand.vmem [shape: bf16[32,32], index: 8, kind: input, shape index: {}]   ;;  %s1786_s9 = inlined_call_operand.vmem [shape: f32[1,32], index: 9, kind: input, shape index: {}]   ;;  %s1787_s10 = inlined_call_operand.vmem [shape: f32[1,32], index: 10, kind: input, shape index: {}]   ;;  %s1788_s11 = inlined_call_operand.vmem [shape: f32[1,32], index: 11, kind: input, shape index: {}]   ;;  %s1789_s12 = inlined_call_operand.vmem [shape: f32[2,8,32], index: 12, kind: output, shape index: {}]  }
   0x1   :  { %s1612_s23 = smov 0  }
   0x2 LB: > { %s34_s24 = sadd.s32 1, %s1529_s22  ;;  %p1313_p0 = scmp.ge.s32.totalorder %s1533_s23, 1  ;;  %s1533_s23 = sphi %s1612_s23, %s22_s23   ;;  %s1529_s22 = sphi %s1610_s22, %s1791_s22   ;;  %s1525_s21 = sphi %s1608_s21, %s1790_s21  }
   0x3   : > { %p36_p1 = scmp.ge.s32.totalorder %s34_s24, 2  ;;  %p389_p2 = scmp.lt.s32.totalorder %s1533_s23, 3 }
   0x5   : > { %s1793_s24 = smov (%p36_p1, %s34_s24), 0  ;;  %p390_p3 = pnand %p1313_p0, %p389_p2 }
   0x6   : > { %p439_p4 = scmp.lt.s32.totalorder (!%p390_p3), %s1525_s21, 1  ;;  %s1537_s29 = smov (!%p390_p3), 112  }
   0x7   : > { %393 = sbr.rel (%p390_p3) target bundleno = 1690 (0x69a), region = 68  ;;  %s1538_s30 = smov (!%p390_p3), 120  }
   0x8   : > { %s1539_s13 = smov (!%p390_p3), 104  }
   0xc   : > { %v1485_v0 = vld [vmem:[%s1780_s3 + $0x8] sm:$0xff]   ;;  %v1535_v1 = vmov 0.0   ;;  %v1487_v3 = vld [vmem:[%s1780_s3] sm:$0xff]   ;;  %vm1536_vm0 = vmmov 0   ;;  %s1795_s21 = smov (!%p439_p4, %s1525_s21), 1  ;;  %vm485_vm1 = vcmask 261120  }
   0xd   : > { %1381 = vmatprep.subr.bf16.mxu1 %v1535_v1  ;;  %1373 = vmatprep.subr.bf16.mxu0 %v1535_v1  ;;  %v1486_v2 = vld [vmem:[%s1779_s2 + $0x8] sm:$0xff]   ;;  %v1488_v4 = vld [vmem:[%s1779_s2] sm:$0xff]   ;;  %s1646_s15 = sshll.u32 %s1795_s21, 3  ;;  %vm661_vm2 = vcmask 64512   ;;  %vm724_vm3 = vcmask 1043456   ;;  %vm887_vm4 = vcmask 130112  }
   0xe   : > { %1382 = vmatpush3.bf16.msra.mxu1 %v1485_v0  ;;  %1385 = vmatprep.mubr.msk.bf16.mxu1 %vm1536_vm0, %v1535_v1  ;;  %s449_s18 = scalar_lea.vmem %s1778_s1, %s1646_s15  ;;  %s445_s25 = scalar_lea.vmem %s1777_s0, %s1646_s15  ;;  %v1321_v9 = vld [vmem:[%s1783_s6] ss:$0 sm:$0xff]  ;;  %v1489_v24 = vld [vmem:[%s1781_s4 + $0x8] sm:$0xff]   ;;  %vm1004_vm5 = vcmask 195712   ;;  %vm1121_vm6 = vcmask 261312  }
   0xf   : > { %1374 = vmatpush3.bf16.msra.mxu0 %v1486_v2  ;;  %1383 = vmatprep.subr.bf16.mxu1 %v1535_v1  ;;  %v459_v5 = vld [vmem:[%s449_s18] sm:$0xff]  ;;  %s456_s21 = scalar_lea.vmem %s1789_s12, %s1646_s15 }
  0x10   : > { %1375 = vmatprep.subr.bf16.mxu0 %v1535_v1  ;;  %1377 = vmatprep.mubr.msk.bf16.mxu0 %vm1536_vm0, %v1535_v1  ;;  %v461_v6 = vpack.c.bf16 %v459_v5, %v459_v5  ;;  %v1658_v7 = vld [vmem:[%s445_s25] sm:$0xff]  ;;  %s1540_s25 = smov 8  }
  0x11   : > { %v460_v8 = vpack.c.bf16 %v1658_v7, %v1658_v7  ;;  %v1317_v10 = vld [vmem:[%s1782_s5] ss:$0 sm:$0xff] }
  0x12   : > { %1384 = vmatpush3.bf16.msra.mxu1 %v1487_v3  ;;  %v1490_v25 = vld [vmem:[%s1781_s4] sm:$0xff]  }
  0x13   : > { %1376 = vmatpush3.bf16.msra.mxu0 %v1488_v4  ;;  %1397 = vmatprep.subr.bf16.mxu1 %v1535_v1  ;;  %v1325_v41 = vld [vmem:[%s1784_s7] ss:$0 sm:$0xff] }
  0x14   : > { %1389 = vmatprep.subr.bf16.mxu0 %v1535_v1 }
  0x15   : > { %1386 = vmatmul.mubr.msk.bf16.vlgmr.msra.gmra.mxu1 %vm485_vm1, %v461_v6 }
  0x16   : > { %1378 = vmatmul.mubr.msk.bf16.vlgmr.msra.gmra.mxu0 %vm485_vm1, %v460_v8  ;;  %1399 = vmatprep.mubr.msk.bf16.mxu1 %vm1536_vm0, %v1535_v1 }
  0x17   : > { %1393 = vmatprep.mubr.msk.bf16.mxu0 %vm1536_vm0, %v1535_v1  ;;  %1390 = vmatpush3.bf16.msra.mxu0 %v1489_v24 }
  0x18   : > { %1391 = vmatprep.subr.bf16.mxu0 %v1535_v1 }
  0x1b   : > { %1392 = vmatpush3.bf16.msra.mxu0 %v1490_v25 }
  0x1c   : > { %1403 = vmatprep.subr.bf16.mxu0 %v1535_v1 }
  0x1e   : > { %1394 = vmatmul.mubr.msk.bf16.vlgmr.msra.gmra.mxu0 %vm485_vm1, %v461_v6 }
  0x1f   : > { %1405 = vmatprep.mubr.msk.bf16.mxu0 %vm1536_vm0, %v1535_v1 }
  0xd5   : > { %v589_v11 = vpop.f32.mrf.mxu1 }
  0xd6   : > { %v590_v12 = vadd.f32 %v1321_v9, %v589_v11  ;;  %v523_v13 = vpop.f32.mrf.mxu0 }
  0xd7   : > { %v524_v14 = vadd.f32 %v1317_v10, %v523_v13  ;;  %v1387_v15 = vpop.f32.mrf.mxu1 }
  0xd8   : > { %v659_v16 = vpack.c.bf16 %v590_v12, %v590_v12  ;;  %v1379_v17 = vpop.f32.mrf.mxu0 }
  0xd9   : > { %v592_v18 = vpop.f32.mrf.mxu1  ;;  %v658_v19 = vpack.c.bf16 %v524_v14, %v524_v14 }
  0xda   : > { %891 = vrot.lane.b32.xlu1 %v659_v16, %s1537_s29  ;;  %773 = vrot.lane.b32.xlu0 %v659_v16, %s1538_s30  ;;  %v526_v20 = vpop.f32.mrf.mxu0  ;;  %v666_v21 = vsel %vm661_vm2, %v659_v16, 0 }
  0xdb   : > { %v1388_v22 = vpop.f32.mrf.mxu1  ;;  %1398 = vmatpush3.bf16.xpose.msra.mxu1 %v666_v21 }
  0xdc   : > { %v1380_v23 = vpop.f32.mrf.mxu0  ;;  %1409 = vmatprep.subr.bf16.mxu1 %v1535_v1 }
  0xde   : > { %889 = vrot.lane.b32.xlu1 %v658_v19, %s1537_s29  ;;  %770 = vrot.lane.b32.xlu0 %v658_v19, %s1538_s30  ;;  %v652_v42 = vpop.f32.mrf.mxu0 }
  0xdf   : > { %v653_v43 = vadd.f32 %v1325_v41, %v652_v42 }
  0xe0   : > { %v1395_v44 = vpop.f32.mrf.mxu0 }
  0xe1   : > { %v660_v45 = vpack.c.bf16 %v653_v43, %v653_v43 }
  0xe2   : > { %1006 = vrot.lane.b32.xlu1 %v658_v19, %s1539_s13  ;;  %1008 = vrot.lane.b32.xlu0 %v659_v16, %s1539_s13  ;;  %v655_v46 = vpop.f32.mrf.mxu0 }
  0xe3   : > { %1400 = vmatmul.mubr.msk.bf16.vlgmr.msra.gmra.mxu1 %vm661_vm2, %v658_v19  ;;  %v726_v47 = vsel %vm724_vm3, %v660_v45, 0 }
  0xe4   : > { %1411 = vmatprep.mubr.msk.bf16.mxu1 %vm1536_vm0, %v1535_v1  ;;  %v1396_v48 = vpop.f32.mrf.mxu0  ;;  %1404 = vmatpush3.bf16.msra.mxu0 %v726_v47 }
  0xe5   : > { %1415 = vmatprep.subr.bf16.mxu0 %v1535_v1 }
 0x14c   : > { %v774_v26 = vpop.permute.xlu0 %773  ;;  %v892_v28 = vpop.permute.xlu1 %891 }
 0x14d   : > { %v779_v27 = vsel %vm661_vm2, %v774_v26, 0  ;;  %v897_v30 = vsel %vm661_vm2, %v892_v28, 0 }
 0x14e   : > { %1410 = vmatpush3.bf16.xpose.msra.mxu1 %v779_v27 }
 0x14f   : > { %1421 = vmatprep.subr.bf16.mxu1 %v1535_v1 }
 0x150   : > { %v771_v29 = vpop.permute.xlu0 %770  ;;  %v890_v32 = vpop.permute.xlu1 %889 }
 0x154   : > { %v1009_v31 = vpop.permute.xlu0 %1008  ;;  %v1007_v34 = vpop.permute.xlu1 %1006 }
 0x155   : > { %1412 = vmatmul.mubr.msk.bf16.vlgmr.msra.gmra.mxu1 %vm661_vm2, %v771_v29  ;;  %v1014_v33 = vsel %vm661_vm2, %v1009_v31, 0 }
 0x156   : > { %1422 = vmatpush3.bf16.xpose.msra.mxu1 %v897_v30  ;;  %1423 = vmatprep.mubr.msk.bf16.mxu1 %vm1536_vm0, %v1535_v1 }
 0x157   : > { %1433 = vmatprep.subr.bf16.mxu1 %v1535_v1 }
 0x15d   : > { %1424 = vmatmul.mubr.msk.bf16.vlgmr.msra.gmra.mxu1 %vm661_vm2, %v890_v32 }
 0x15e   : > { %1434 = vmatpush3.bf16.xpose.msra.mxu1 %v1014_v33  ;;  %1435 = vmatprep.mubr.msk.bf16.mxu1 %vm1536_vm0, %v1535_v1 }
 0x15f   : > { %1445 = vmatprep.subr.bf16.mxu1 %v1535_v1 }
 0x165   : > { %1436 = vmatmul.mubr.msk.bf16.vlgmr.msra.gmra.mxu1 %vm661_vm2, %v1007_v34 }
 0x166   : > { %1449 = vmatprep.mubr.msk.bf16.mxu1 %vm1536_vm0, %v1535_v1 }
 0x1a3   : > { %v702_v35 = vpop.f32.mrf.mxu1 }
 0x1a4   : > { %v708_v36 = vmul.f32 0.35355338, %v702_v35 }
 0x1a5   : > { %v1401_v37 = vpop.f32.mrf.mxu1 }
 0x1a6   : > { %v709_v38 = vsel %vm661_vm2, %v708_v36, -inf }
 0x1a7   : > { %710 = vmax.xlane.f32.xlu0 %v709_v38  ;;  %v705_v39 = vpop.f32.mrf.mxu1 }
 0x1a9   : > { %v1402_v40 = vpop.f32.mrf.mxu1 }
 0x215   : > { %v815_v49 = vpop.f32.mrf.mxu1 }
 0x216   : > { %v821_v50 = vmul.f32 0.35355338, %v815_v49 }
 0x217   : > { %v1413_v51 = vpop.f32.mrf.mxu1 }
 0x218   : > { %v822_v52 = vsel %vm661_vm2, %v821_v50, -inf }
 0x219   : > { %823 = vmax.xlane.f32.xlu1 %v822_v52  ;;  %v818_v53 = vpop.f32.mrf.mxu1 }
 0x21b   : > { %v1414_v54 = vpop.f32.mrf.mxu1 }
 0x21c   : > { %v1491_v54 = vld [vmem:[%s1785_s8 + $0x8] sm:$0xff]  }
 0x21d   : > { %v933_v55 = vpop.f32.mrf.mxu1  ;;  %1446 = vmatpush3.bf16.msra.mxu1 %v1491_v54 }
 0x21e   : > { %v939_v56 = vmul.f32 0.35355338, %v933_v55  ;;  %1447 = vmatprep.subr.bf16.mxu1 %v1535_v1 }
 0x21f   : > { %v1425_v57 = vpop.f32.mrf.mxu1 }
 0x220   : > { %v940_v58 = vsel %vm661_vm2, %v939_v56, -inf }
 0x221   : > { %941 = vmax.xlane.f32.xlu0 %v940_v58  ;;  %v936_v59 = vpop.f32.mrf.mxu1 }
 0x223   : > { %v1426_v60 = vpop.f32.mrf.mxu1 }
 0x225   : > { %v1050_v61 = vpop.f32.mrf.mxu1 }
 0x226   : > { %v1056_v62 = vmul.f32 0.35355338, %v1050_v61 }
 0x227   : > { %v1437_v63 = vpop.f32.mrf.mxu1 }
 0x228   : > { %v1057_v0 = vsel %vm661_vm2, %v1056_v62, -inf }
 0x229   : > { %1058 = vmax.xlane.f32.xlu0 %v1057_v0  ;;  %v1053_v2 = vpop.f32.mrf.mxu1 }
 0x22b   : > { %v1438_v3 = vpop.f32.mrf.mxu1 }
 0x230   : > { %v711_v4 = vpop.xlane.xlu0 %710 }
 0x231   : > { %v712_v5 = vsub.f32 %v708_v36, %v711_v4 }
 0x233   : > { %v713_v6 = vmul.f32 1.442695, %v712_v5 }
 0x235   : > { %1493 = vpow2.f32 %v713_v6  ;;  %v1337_v6 = vld [vmem:[%s1786_s9] ss:$0 sm:$0xff] }
 0x242   : > { %v1494_v8 = vpop.eup %1493 }
 0x243   : > { %v715_v9 = vsel %vm661_vm2, %v1494_v8, 0.0 }
 0x244   : > { %716 = vadd.xlane.f32.xlu1 %v715_v9 }
 0x255   : > { %835 = vrot.lane.b32.xlu1 %v660_v45, %s1538_s30  ;;  %s1542_s30 = smov 24  }
 0x2a2   : > { %v824_v10 = vpop.xlane.xlu1 %823 }
 0x2a3   : > { %v825_v11 = vsub.f32 %v821_v50, %v824_v10 }
 0x2a5   : > { %v826_v12 = vmul.f32 1.442695, %v825_v11 }
 0x2a7   : > { %1495 = vpow2.f32 %v826_v12 }
 0x2aa   : > { %v942_v13 = vpop.xlane.xlu0 %941 }
 0x2ab   : > { %v943_v14 = vsub.f32 %v939_v56, %v942_v13  ;;  %v1492_v56 = vld [vmem:[%s1785_s8] sm:$0xff]  }
 0x2ac   : > { %1448 = vmatpush3.bf16.msra.mxu1 %v1492_v56 }
 0x2ad   : > { %v944_v15 = vmul.f32 1.442695, %v943_v14 }
 0x2af   : > { %1497 = vpow2.f32 %v944_v15 }
 0x2b2   : > { %v1059_v16 = vpop.xlane.xlu0 %1058 }
 0x2b3   : > { %v1060_v17 = vsub.f32 %v1056_v62, %v1059_v16 }
 0x2b4   : > { %v1496_v18 = vpop.eup %1495 }
 0x2b5   : > { %v1061_v19 = vmul.f32 1.442695, %v1060_v17  ;;  %v828_v20 = vsel %vm661_vm2, %v1496_v18, 0.0 }
 0x2b6   : > { %829 = vadd.xlane.f32.xlu0 %v828_v20 }
 0x2b7   : > { %1499 = vpow2.f32 %v1061_v19 }
 0x2bc   : > { %v1498_v21 = vpop.eup %1497 }
 0x2bd   : > { %v946_v22 = vsel %vm661_vm2, %v1498_v21, 0.0 }
 0x2be   : > { %947 = vadd.xlane.f32.xlu1 %v946_v22 }
 0x2c4   : > { %v1500_v23 = vpop.eup %1499 }
 0x2c5   : > { %v1063_v24 = vsel %vm661_vm2, %v1500_v23, 0.0 }
 0x2c6   : > { %1064 = vadd.xlane.f32.xlu0 %v1063_v24 }
 0x2cd   : > { %v717_v25 = vpop.xlane.xlu1 %716 }
 0x2ce   : > { %1501 = vrcp.f32 %v717_v25  ;;  %v1342_v25 = vld [vmem:[%s1788_s11] ss:$0 sm:$0xff] }
 0x2cf   : > { %1069 = vrot.lane.b32.xlu1 %v660_v45, %s1539_s13 }
 0x2d1   : > { %v836_v27 = vpop.permute.xlu1 %835 }
 0x2d2   : > { %v841_v30 = vsel %vm724_vm3, %v836_v27, 0 }
 0x2db   : > { %v1502_v26 = vpop.eup %1501 }
 0x2dc   : > { %952 = vrot.lane.b32.xlu0 %v660_v45, %s1537_s29  ;;  %v719_v28 = vmul.f32 %v1502_v26, %v1494_v8  ;;  %s1541_s29 = smov 16  }
 0x2de   : > { %v720_v29 = vpack.c.bf16 %v719_v28, %v719_v28 }
 0x2e0   : > { %1406 = vmatmul.mubr.msk.bf16.vlgmr.msra.gmra.mxu0 %vm661_vm2, %v720_v29 }
 0x2e1   : > { %1416 = vmatpush3.bf16.msra.mxu0 %v841_v30  ;;  %1417 = vmatprep.mubr.msk.bf16.mxu0 %vm1536_vm0, %v1535_v1 }
 0x2e2   : > { %1427 = vmatprep.subr.bf16.mxu0 %v1535_v1 }
 0x33f   : > { %v830_v31 = vpop.xlane.xlu0 %829 }
 0x340   : > { %1503 = vrcp.f32 %v830_v31 }
 0x347   : > { %v948_v32 = vpop.xlane.xlu1 %947 }
 0x348   : > { %1505 = vrcp.f32 %v948_v32 }
 0x34b   : > { %v1070_v41 = vpop.permute.xlu1 %1069 }
 0x34c   : > { %v1075_v43 = vsel %vm724_vm3, %v1070_v41, 0 }
 0x34d   : > { %v1504_v33 = vpop.eup %1503 }
 0x34e   : > { %v832_v34 = vmul.f32 %v1504_v33, %v1496_v18 }
 0x34f   : > { %v1065_v35 = vpop.xlane.xlu0 %1064 }
 0x350   : > { %1507 = vrcp.f32 %v1065_v35  ;;  %v833_v36 = vpack.c.bf16 %v832_v34, %v832_v34 }
 0x352   : > { %1418 = vmatmul.mubr.msk.bf16.vlgmr.msra.gmra.mxu0 %vm661_vm2, %v833_v36 }
 0x353   : > { %v953_v37 = vpop.permute.xlu0 %952  ;;  %1429 = vmatprep.mubr.msk.bf16.mxu0 %vm1536_vm0, %v1535_v1 }
 0x354   : > { %v958_v38 = vsel %vm724_vm3, %v953_v37, 0 }
 0x355   : > { %v1506_v39 = vpop.eup %1505  ;;  %1428 = vmatpush3.bf16.msra.mxu0 %v958_v38 }
 0x356   : > { %1439 = vmatprep.subr.bf16.mxu0 %v1535_v1  ;;  %v950_v40 = vmul.f32 %v1506_v39, %v1498_v21 }
 0x358   : > { %v951_v42 = vpack.c.bf16 %v950_v40, %v950_v40 }
 0x35a   : > { %1430 = vmatmul.mubr.msk.bf16.vlgmr.msra.gmra.mxu0 %vm661_vm2, %v951_v42 }
 0x35b   : > { %1440 = vmatpush3.bf16.msra.mxu0 %v1075_v43  ;;  %1441 = vmatprep.mubr.msk.bf16.mxu0 %vm1536_vm0, %v1535_v1 }
 0x35d   : > { %v1508_v44 = vpop.eup %1507 }
 0x35e   : > { %v1067_v45 = vmul.f32 %v1508_v44, %v1500_v23 }
 0x360   : > { %v1068_v46 = vpack.c.bf16 %v1067_v45, %v1067_v45 }
 0x362   : > { %1442 = vmatmul.mubr.msk.bf16.vlgmr.msra.gmra.mxu0 %vm661_vm2, %v1068_v46 }
 0x3a0   : > { %v762_v47 = vpop.f32.mrf.mxu0 }
 0x3a1   : > { %768 = vst.msk [vmem:[#allocation2] sm:$0xff] %vm661_vm2, %v762_v47 }
 0x3a2   : > { %v1407_v48 = vpop.f32.mrf.mxu0 }
 0x3a4   : > { %v765_v49 = vpop.f32.mrf.mxu0 }
 0x3a6   : > { %v1408_v50 = vpop.f32.mrf.mxu0 }
 0x412   : > { %v877_v51 = vpop.f32.mrf.mxu0 }
 0x413   : > { %884 = vrot.lane.b32.xlu1 %v877_v51, %s1540_s25 }
 0x414   : > { %v1419_v52 = vpop.f32.mrf.mxu0 }
 0x416   : > { %v880_v53 = vpop.f32.mrf.mxu0 }
 0x418   : > { %v1420_v55 = vpop.f32.mrf.mxu0 }
 0x41a   : > { %v994_v57 = vpop.f32.mrf.mxu0 }
 0x41b   : > { %1001 = vrot.lane.b32.xlu0 %v994_v57, %s1541_s29 }
 0x41c   : > { %v1431_v58 = vpop.f32.mrf.mxu0 }
 0x41e   : > { %v997_v59 = vpop.f32.mrf.mxu0 }
 0x420   : > { %v1432_v60 = vpop.f32.mrf.mxu0 }
 0x422   : > { %v1111_v61 = vpop.f32.mrf.mxu0 }
 0x423   : > { %1118 = vrot.lane.b32.xlu1 %v1111_v61, %s1542_s30 }
 0x424   : > { %v1443_v62 = vpop.f32.mrf.mxu0 }
 0x426   : > { %v1114_v63 = vpop.f32.mrf.mxu0 }
 0x428   : > { %v1444_v0 = vpop.f32.mrf.mxu0 }
 0x485   : > { %v885_v2 = vpop.permute.xlu1 %884 }
 0x486   : > { %888 = vst.msk [vmem:[#allocation2] sm:$0xff] %vm887_vm4, %v885_v2 }
 0x48d   : > { %v1002_v3 = vpop.permute.xlu0 %1001 }
 0x48e   : > { %1005 = vst.msk [vmem:[#allocation2] sm:$0xff] %vm1004_vm5, %v1002_v3 }
 0x495   : > { %v1119_v1 = vpop.permute.xlu1 %1118 }
 0x496   : > { %1122 = vst.msk [vmem:[#allocation2] sm:$0xff] %vm1121_vm6, %v1119_v1 }
 0x49d   : > { %v1123_v4 = vld [vmem:[#allocation2] sm:$0xff] }
 0x49e   : > { %v1124_v5 = vpack.c.bf16 %v1123_v4, %v1123_v4 }
 0x4a0   : > { %1450 = vmatmul.mubr.msk.bf16.vlgmr.msra.gmra.mxu1 %vm485_vm1, %v1124_v5 }
 0x560   : > { %v1185_v8 = vpop.f32.mrf.mxu1 }
 0x561   : > { %v1186_v9 = vadd.f32 %v1337_v6, %v1185_v8 }
 0x562   : > { %v1451_v10 = vpop.f32.mrf.mxu1 }
 0x563   : > { %v1191_v11 = vadd.f32 %v1186_v9, %v1658_v7  ;;  %v1341_v7 = vld [vmem:[%s1787_s10] ss:$0 sm:$0xff] }
 0x564   : > { %v1188_v12 = vpop.f32.mrf.mxu1 }
 0x565   : > { %v1192_v13 = vsel %vm485_vm1, %v1191_v11, 0.0 }
 0x566   : > { %1193 = vadd.xlane.f32.xlu0 %v1192_v13  ;;  %v1452_v14 = vpop.f32.mrf.mxu1 }
 0x5ef   : > { %v1194_v15 = vpop.xlane.xlu0 %1193 }
 0x5f0   : > { %v1196_v16 = vmul.f32 0.03125, %v1194_v15 }
 0x5f2   : > { %v1197_v17 = vsub.f32 %v1191_v11, %v1196_v16 }
 0x5f4   : > { %v1198_v18 = vmul.f32 %v1197_v17, %v1197_v17 }
 0x5f6   : > { %v1199_v19 = vsel %vm485_vm1, %v1198_v18, 0.0 }
 0x5f7   : > { %1200 = vadd.xlane.f32.xlu1 %v1199_v19 }
 0x680   : > { %v1201_v20 = vpop.xlane.xlu1 %1200 }
 0x681   : > { %v1202_v21 = vmul.f32 0.03125, %v1201_v20 }
 0x683   : > { %v1203_v22 = vadd.f32 1e-05, %v1202_v21 }
 0x685   : > { %1509 = vrsqrt.f32 %v1203_v22 }
 0x692   : > { %v1510_v23 = vpop.eup %1509 }
 0x693   : > { %v1205_v24 = vmul.f32 %v1510_v23, %v1197_v17 }
 0x695   : > { %v1213_v26 = vmul.f32 %v1341_v7, %v1205_v24 }
 0x697   : > { %v1221_v27 = vadd.f32 %v1342_v25, %v1213_v26 }
 0x699   : > { %1222 = vst.msk [vmem:[%s456_s21] sm:$0xff] %vm485_vm1, %v1221_v27 }
 0x69a PF: > { %s22_s23 = sadd.s32 1, %s1533_s23   ;;  %s1790_s21 = smov %s1529_s22 }
 0x69b   : > { %p19_p5 = scmp.ge.s32.totalorder %s22_s23, 4   ;;  %s1791_s22 = smov %s1793_s24 }
 0x69d   :  { %21 = sbr.rel (!%p19_p5) target bundleno = 2 (0x2), region = 101 }

// kernel: transformer_model_forward.21
= control target key start
LH: loop header
LB: loop body
LE: loop exit
PB: predicated region body
PF: predicated region fallthrough
CT: control target
= control target key end

     0   :  { %s1612_s21 = smov 0   ;;  %s1614_s22 = smov 0   ;;  %s1780_s0 = inlined_call_operand.vmem [shape: f32[2,6,32], index: 0, kind: input, shape index: {}, may-alias: {0,1}]   ;;  %s1781_s1 = inlined_call_operand.vmem [shape: f32[2,6,32], index: 1, kind: input, shape index: {}, may-alias: {0,1}]   ;;  %s1782_s2 = inlined_call_operand.vmem [shape: bf16[32,32], index: 2, kind: input, shape index: {}]   ;;  %s1783_s3 = inlined_call_operand.vmem [shape: bf16[32,32], index: 3, kind: input, shape index: {}]   ;;  %s1784_s4 = inlined_call_operand.vmem [shape: bf16[32,32], index: 4, kind: input, shape index: {}]   ;;  %s1785_s5 = inlined_call_operand.vmem [shape: f32[1,32], index: 5, kind: input, shape index: {}]   ;;  %s1786_s6 = inlined_call_operand.vmem [shape: f32[1,32], index: 6, kind: input, shape index: {}]   ;;  %s1787_s7 = inlined_call_operand.vmem [shape: f32[1,32], index: 7, kind: input, shape index: {}]   ;;  %s1788_s8 = inlined_call_operand.vmem [shape: bf16[32,32], index: 8, kind: input, shape index: {}]   ;;  %s1789_s9 = inlined_call_operand.vmem [shape: f32[1,32], index: 9, kind: input, shape index: {}]   ;;  %s1790_s10 = inlined_call_operand.vmem [shape: f32[1,32], index: 10, kind: input, shape index: {}]   ;;  %s1791_s11 = inlined_call_operand.vmem [shape: f32[1,32], index: 11, kind: input, shape index: {}]   ;;  %s1792_s12 = inlined_call_operand.vmem [shape: f32[2,6,32], index: 12, kind: output, shape index: {}]  }
   0x1   :  { %s1616_s23 = smov 0  }
   0x2 LB: > { %s34_s24 = sadd.s32 1, %s1533_s22  ;;  %p1317_p0 = scmp.ge.s32.totalorder %s1537_s23, 1  ;;  %s1537_s23 = sphi %s1616_s23, %s22_s23   ;;  %s1533_s22 = sphi %s1614_s22, %s1794_s22   ;;  %s1529_s21 = sphi %s1612_s21, %s1793_s21  }
   0x3   : > { %p36_p1 = scmp.ge.s32.totalorder %s34_s24, 2  ;;  %p389_p2 = scmp.lt.s32.totalorder %s1537_s23, 3 }
   0x5   : > { %s1796_s24 = smov (%p36_p1, %s34_s24), 0  ;;  %p390_p3 = pnand %p1317_p0, %p389_p2 }
   0x6   : > { %p439_p4 = scmp.lt.s32.totalorder (!%p390_p3), %s1529_s21, 1  ;;  %s1541_s29 = smov (!%p390_p3), 112  }
   0x7   : > { %393 = sbr.rel (%p390_p3) target bundleno = 1690 (0x69a), region = 68  ;;  %s1542_s30 = smov (!%p390_p3), 120  }
   0x8   : > { %s1543_s13 = smov (!%p390_p3), 104  }
   0xc   : > { %v1489_v0 = vld [vmem:[%s1783_s3 + $0x8] sm:$0xff]   ;;  %v1539_v1 = vmov 0.0   ;;  %v1491_v3 = vld [vmem:[%s1783_s3] sm:$0xff]   ;;  %vm1540_vm0 = vmmov 0   ;;  %s1798_s21 = smov (!%p439_p4, %s1529_s21), 1  ;;  %vm485_vm1 = vcmask 261120  }
   0xd   : > { %1385 = vmatprep.subr.bf16.mxu1 %v1539_v1  ;;  %1377 = vmatprep.subr.bf16.mxu0 %v1539_v1  ;;  %v1490_v2 = vld [vmem:[%s1782_s2 + $0x8] sm:$0xff]   ;;  %v1492_v4 = vld [vmem:[%s1782_s2] sm:$0xff]   ;;  %s1650_s15 = sshll.u32 %s1798_s21, 3  ;;  %vm661_vm2 = vcmask 64512   ;;  %vm709_vm3 = vcmask 46080   ;;  %vm726_vm4 = vcmask 1042432  }
   0xe   : > { %1386 = vmatpush3.bf16.msra.mxu1 %v1489_v0  ;;  %1389 = vmatprep.mubr.msk.bf16.mxu1 %vm1540_vm0, %v1539_v1  ;;  %s449_s18 = scalar_lea.vmem %s1781_s1, %s1650_s15  ;;  %s445_s25 = scalar_lea.vmem %s1780_s0, %s1650_s15  ;;  %v1325_v9 = vld [vmem:[%s1786_s6] ss:$0 sm:$0xff]  ;;  %v1493_v24 = vld [vmem:[%s1784_s4 + $0x8] sm:$0xff]   ;;  %vm722_vm5 = vcmask 48128   ;;  %vm770_vm6 = vcmask 62464   ;;  %vm890_vm7 = vcmask 128064  }
   0xf   : > { %1378 = vmatpush3.bf16.msra.mxu0 %v1490_v2  ;;  %1387 = vmatprep.subr.bf16.mxu1 %v1539_v1  ;;  %v459_v5 = vld [vmem:[%s449_s18] sm:$0x3f]  ;;  %vm1007_vm8 = vcmask 193664   ;;  %vm1124_vm9 = vcmask 259264   ;;  %vm1195_vm10 = vcmask 259072   ;;  %s456_s21 = scalar_lea.vmem %s1792_s12, %s1650_s15 }
  0x10   : > { %1379 = vmatprep.subr.bf16.mxu0 %v1539_v1  ;;  %1381 = vmatprep.mubr.msk.bf16.mxu0 %vm1540_vm0, %v1539_v1  ;;  %v461_v6 = vpack.c.bf16 %v459_v5, %v459_v5  ;;  %v1662_v7 = vld [vmem:[%s445_s25] sm:$0x3f]  ;;  %s1544_s25 = smov 8  }
  0x11   : > { %v460_v8 = vpack.c.bf16 %v1662_v7, %v1662_v7  ;;  %v1321_v10 = vld [vmem:[%s1785_s5] ss:$0 sm:$0xff] }
  0x12   : > { %1388 = vmatpush3.bf16.msra.mxu1 %v1491_v3  ;;  %v1494_v25 = vld [vmem:[%s1784_s4] sm:$0xff]  }
  0x13   : > { %1380 = vmatpush3.bf16.msra.mxu0 %v1492_v4  ;;  %1401 = vmatprep.subr.bf16.mxu1 %v1539_v1  ;;  %v1329_v41 = vld [vmem:[%s1787_s7] ss:$0 sm:$0xff] }
  0x14   : > { %1393 = vmatprep.subr.bf16.mxu0 %v1539_v1 }
  0x15   : > { %1390 = vmatmul.mubr.msk.bf16.vlgmr.msra.gmra.mxu1 %vm485_vm1, %v461_v6 }
  0x16   : > { %1382 = vmatmul.mubr.msk.bf16.vlgmr.msra.gmra.mxu0 %vm485_vm1, %v460_v8  ;;  %1403 = vmatprep.mubr.msk.bf16.mxu1 %vm1540_vm0, %v1539_v1 }
  0x17   : > { %1397 = vmatprep.mubr.msk.bf16.mxu0 %vm1540_vm0, %v1539_v1  ;;  %1394 = vmatpush3.bf16.msra.mxu0 %v1493_v24 }
  0x18   : > { %1395 = vmatprep.subr.bf16.mxu0 %v1539_v1 }
  0x1b   : > { %1396 = vmatpush3.bf16.msra.mxu0 %v1494_v25 }
  0x1c   : > { %1407 = vmatprep.subr.bf16.mxu0 %v1539_v1 }
  0x1e   : > { %1398 = vmatmul.mubr.msk.bf16.vlgmr.msra.gmra.mxu0 %vm485_vm1, %v461_v6 }
  0x1f   : > { %1409 = vmatprep.mubr.msk.bf16.mxu0 %vm1540_vm0, %v1539_v1 }
  0xd5   : > { %v589_v11 = vpop.f32.mrf.mxu1 }
  0xd6   : > { %v590_v12 = vadd.f32 %v1325_v9, %v589_v11  ;;  %v523_v13 = vpop.f32.mrf.mxu0 }
  0xd7   : > { %v524_v14 = vadd.f32 %v1321_v10, %v523_v13  ;;  %v1391_v15 = vpop.f32.mrf.mxu1 }
  0xd8   : > { %v659_v16 = vpack.c.bf16 %v590_v12, %v590_v12  ;;  %v1383_v17 = vpop.f32.mrf.mxu0 }
  0xd9   : > { %v592_v18 = vpop.f32.mrf.mxu1  ;;  %v658_v19 = vpack.c.bf16 %v524_v14, %v524_v14 }
  0xda   : > { %894 = vrot.lane.b32.xlu1 %v659_v16, %s1541_s29  ;;  %776 = vrot.lane.b32.xlu0 %v659_v16, %s1542_s30  ;;  %v526_v20 = vpop.f32.mrf.mxu0  ;;  %v666_v21 = vsel %vm661_vm2, %v659_v16, 0 }
  0xdb   : > { %v1392_v22 = vpop.f32.mrf.mxu1  ;;  %1402 = vmatpush3.bf16.xpose.msra.mxu1 %v666_v21 }
  0xdc   : > { %v1384_v23 = vpop.f32.mrf.mxu0  ;;  %1413 = vmatprep.subr.bf16.mxu1 %v1539_v1 }
  0xde   : > { %892 = vrot.lane.b32.xlu1 %v658_v19, %s1541_s29  ;;  %773 = vrot.lane.b32.xlu0 %v658_v19, %s1542_s30  ;;  %v652_v42 = vpop.f32.mrf.mxu0 }
  0xdf   : > { %v653_v43 = vadd.f32 %v1329_v41, %v652_v42 }
  0xe0   : > { %v1399_v44 = vpop.f32.mrf.mxu0 }
  0xe1   : > { %v660_v45 = vpack.c.bf16 %v653_v43, %v653_v43 }
  0xe2   : > { %1009 = vrot.lane.b32.xlu1 %v658_v19, %s1543_s13  ;;  %1011 = vrot.lane.b32.xlu0 %v659_v16, %s1543_s13  ;;  %v655_v46 = vpop.f32.mrf.mxu0 }
  0xe3   : > { %1404 = vmatmul.mubr.msk.bf16.vlgmr.msra.gmra.mxu1 %vm661_vm2, %v658_v19  ;;  %v728_v47 = vsel %vm726_vm4, %v660_v45, 0 }
  0xe4   : > { %1415 = vmatprep.mubr.msk.bf16.mxu1 %vm1540_vm0, %v1539_v1  ;;  %v1400_v48 = vpop.f32.mrf.mxu0  ;;  %1408 = vmatpush3.bf16.msra.mxu0 %v728_v47 }
  0xe5   : > { %1419 = vmatprep.subr.bf16.mxu0 %v1539_v1 }
 0x14c   : > { %v777_v26 = vpop.permute.xlu0 %776  ;;  %v895_v28 = vpop.permute.xlu1 %894 }
 0x14d   : > { %v782_v27 = vsel %vm661_vm2, %v777_v26, 0  ;;  %v900_v30 = vsel %vm661_vm2, %v895_v28, 0 }
 0x14e   : > { %1414 = vmatpush3.bf16.xpose.msra.mxu1 %v782_v27 }
 0x14f   : > { %1425 = vmatprep.subr.bf16.mxu1 %v1539_v1 }
 0x150   : > { %v774_v29 = vpop.permute.xlu0 %773  ;;  %v893_v32 = vpop.permute.xlu1 %892 }
 0x154   : > { %v1012_v31 = vpop.permute.xlu0 %1011  ;;  %v1010_v34 = vpop.permute.xlu1 %1009 }
 0x155   : > { %1416 = vmatmul.mubr.msk.bf16.vlgmr.msra.gmra.mxu1 %vm661_vm2, %v774_v29  ;;  %v1017_v33 = vsel %vm661_vm2, %v1012_v31, 0 }
 0x156   : > { %1426 = vmatpush3.bf16.xpose.msra.mxu1 %v900_v30  ;;  %1427 = vmatprep.mubr.msk.bf16.mxu1 %vm1540_vm0, %v1539_v1 }
 0x157   : > { %1437 = vmatprep.subr.bf16.mxu1 %v1539_v1 }
 0x15d   : > { %1428 = vmatmul.mubr.msk.bf16.vlgmr.msra.gmra.mxu1 %vm661_vm2, %v893_v32 }
 0x15e   : > { %1438 = vmatpush3.bf16.xpose.msra.mxu1 %v1017_v33  ;;  %1439 = vmatprep.mubr.msk.bf16.mxu1 %vm1540_vm0, %v1539_v1 }
 0x15f   : > { %1449 = vmatprep.subr.bf16.mxu1 %v1539_v1 }
 0x165   : > { %1440 = vmatmul.mubr.msk.bf16.vlgmr.msra.gmra.mxu1 %vm661_vm2, %v1010_v34 }
 0x166   : > { %1453 = vmatprep.mubr.msk.bf16.mxu1 %vm1540_vm0, %v1539_v1 }
 0x1a3   : > { %v702_v35 = vpop.f32.mrf.mxu1 }
 0x1a4   : > { %v708_v36 = vmul.f32 0.35355338, %v702_v35 }
 0x1a5   : > { %v1405_v37 = vpop.f32.mrf.mxu1 }
 0x1a6   : > { %v710_v38 = vsel %vm709_vm3, %v708_v36, -inf }
 0x1a7   : > { %711 = vmax.xlane.f32.xlu0 %v710_v38  ;;  %v705_v39 = vpop.f32.mrf.mxu1 }
 0x1a9   : > { %v1406_v40 = vpop.f32.mrf.mxu1 }
 0x215   : > { %v818_v49 = vpop.f32.mrf.mxu1 }
 0x216   : > { %v824_v50 = vmul.f32 0.35355338, %v818_v49 }
 0x217   : > { %v1417_v51 = vpop.f32.mrf.mxu1 }
 0x218   : > { %v825_v52 = vsel %vm709_vm3, %v824_v50, -inf }
 0x219   : > { %826 = vmax.xlane.f32.xlu1 %v825_v52  ;;  %v821_v53 = vpop.f32.mrf.mxu1 }
 0x21b   : > { %v1418_v54 = vpop.f32.mrf.mxu1 }
 0x21c   : > { %v1495_v54 = vld [vmem:[%s1788_s8 + $0x8] sm:$0xff]  }
 0x21d   : > { %v936_v55 = vpop.f32.mrf.mxu1  ;;  %1450 = vmatpush3.bf16.msra.mxu1 %v1495_v54 }
 0x21e   : > { %v942_v56 = vmul.f32 0.35355338, %v936_v55  ;;  %1451 = vmatprep.subr.bf16.mxu1 %v1539_v1 }
 0x21f   : > { %v1429_v57 = vpop.f32.mrf.mxu1 }
 0x220   : > { %v943_v58 = vsel %vm709_vm3, %v942_v56, -inf }
 0x221   : > { %944 = vmax.xlane.f32.xlu0 %v943_v58  ;;  %v939_v59 = vpop.f32.mrf.mxu1 }
 0x223   : > { %v1430_v60 = vpop.f32.mrf.mxu1 }
 0x225   : > { %v1053_v61 = vpop.f32.mrf.mxu1 }
 0x226   : > { %v1059_v62 = vmul.f32 0.35355338, %v1053_v61 }
 0x227   : > { %v1441_v63 = vpop.f32.mrf.mxu1 }
 0x228   : > { %v1060_v0 = vsel %vm709_vm3, %v1059_v62, -inf }
 0x229   : > { %1061 = vmax.xlane.f32.xlu0 %v1060_v0  ;;  %v1056_v2 = vpop.f32.mrf.mxu1 }
 0x22b   : > { %v1442_v3 = vpop.f32.mrf.mxu1 }
 0x230   : > { %v712_v4 = vpop.xlane.xlu0 %711 }
 0x231   : > { %v713_v5 = vsub.f32 %v708_v36, %v712_v4 }
 0x233   : > { %v714_v6 = vmul.f32 1.442695, %v713_v5 }
 0x235   : > { %1497 = vpow2.f32 %v714_v6  ;;  %v1341_v6 = vld [vmem:[%s1789_s9] ss:$0 sm:$0xff] }
 0x242   : > { %v1498_v8 = vpop.eup %1497 }
 0x243   : > { %v716_v9 = vsel %vm709_vm3, %v1498_v8, 0.0 }
 0x244   : > { %717 = vadd.xlane.f32.xlu1 %v716_v9 }
 0x255   : > { %838 = vrot.lane.b32.xlu1 %v660_v45, %s1542_s30  ;;  %s1546_s30 = smov 24  }
 0x2a2   : > { %v827_v10 = vpop.xlane.xlu1 %826 }
 0x2a3   : > { %v828_v11 = vsub.f32 %v824_v50, %v827_v10 }
 0x2a5   : > { %v829_v12 = vmul.f32 1.442695, %v828_v11 }
 0x2a7   : > { %1499 = vpow2.f32 %v829_v12 }
 0x2aa   : > { %v945_v13 = vpop.xlane.xlu0 %944 }
 0x2ab   : > { %v946_v14 = vsub.f32 %v942_v56, %v945_v13  ;;  %v1496_v56 = vld [vmem:[%s1788_s8] sm:$0xff]  }
 0x2ac   : > { %1452 = vmatpush3.bf16.msra.mxu1 %v1496_v56 }
 0x2ad   : > { %v947_v15 = vmul.f32 1.442695, %v946_v14 }
 0x2af   : > { %1501 = vpow2.f32 %v947_v15 }
 0x2b2   : > { %v1062_v16 = vpop.xlane.xlu0 %1061 }
 0x2b3   : > { %v1063_v17 = vsub.f32 %v1059_v62, %v1062_v16 }
 0x2b4   : > { %v1500_v18 = vpop.eup %1499 }
 0x2b5   : > { %v1064_v19 = vmul.f32 1.442695, %v1063_v17  ;;  %v831_v20 = vsel %vm709_vm3, %v1500_v18, 0.0 }
 0x2b6   : > { %832 = vadd.xlane.f32.xlu0 %v831_v20 }
 0x2b7   : > { %1503 = vpow2.f32 %v1064_v19 }
 0x2bc   : > { %v1502_v21 = vpop.eup %1501 }
 0x2bd   : > { %v949_v22 = vsel %vm709_vm3, %v1502_v21, 0.0 }
 0x2be   : > { %950 = vadd.xlane.f32.xlu1 %v949_v22 }
 0x2c4   : > { %v1504_v23 = vpop.eup %1503 }
 0x2c5   : > { %v1066_v24 = vsel %vm709_vm3, %v1504_v23, 0.0 }
 0x2c6   : > { %1067 = vadd.xlane.f32.xlu0 %v1066_v24 }
 0x2cd   : > { %v718_v25 = vpop.xlane.xlu1 %717 }
 0x2ce   : > { %1505 = vrcp.f32 %v718_v25  ;;  %v1346_v25 = vld [vmem:[%s1791_s11] ss:$0 sm:$0xff] }
 0x2cf   : > { %1072 = vrot.lane.b32.xlu1 %v660_v45, %s1543_s13 }
 0x2d1   : > { %v839_v27 = vpop.permute.xlu1 %838 }
 0x2d2   : > { %v844_v30 = vsel %vm726_vm4, %v839_v27, 0 }
 0x2db   : > { %v1506_v26 = vpop.eup %1505 }
 0x2dc   : > { %955 = vrot.lane.b32.xlu0 %v660_v45, %s1541_s29  ;;  %v720_v28 = vmul.f32 %v1506_v26, %v1498_v8  ;;  %s1545_s29 = smov 16  }
 0x2de   : > { %v721_v29 = vpack.c.bf16 %v720_v28, %v720_v28 }
 0x2e0   : > { %1410 = vmatmul.mubr.msk.bf16.vlgmr.msra.gmra.mxu0 %vm722_vm5, %v721_v29 }
 0x2e1   : > { %1420 = vmatpush3.bf16.msra.mxu0 %v844_v30  ;;  %1421 = vmatprep.mubr.msk.bf16.mxu0 %vm1540_vm0, %v1539_v1 }
 0x2e2   : > { %1431 = vmatprep.subr.bf16.mxu0 %v1539_v1 }
 0x33f   : > { %v833_v31 = vpop.xlane.xlu0 %832 }
 0x340   : > { %1507 = vrcp.f32 %v833_v31 }
 0x347   : > { %v951_v32 = vpop.xlane.xlu1 %950 }
 0x348   : > { %1509 = vrcp.f32 %v951_v32 }
 0x34b   : > { %v1073_v41 = vpop.permute.xlu1 %1072 }
 0x34c   : > { %v1078_v43 = vsel %vm726_vm4, %v1073_v41, 0 }
 0x34d   : > { %v1508_v33 = vpop.eup %1507 }
 0x34e   : > { %v835_v34 = vmul.f32 %v1508_v33, %v1500_v18 }
 0x34f   : > { %v1068_v35 = vpop.xlane.xlu0 %1067 }
 0x350   : > { %1511 = vrcp.f32 %v1068_v35  ;;  %v836_v36 = vpack.c.bf16 %v835_v34, %v835_v34 }
 0x352   : > { %1422 = vmatmul.mubr.msk.bf16.vlgmr.msra.gmra.mxu0 %vm722_vm5, %v836_v36 }
 0x353   : > { %v956_v37 = vpop.permute.xlu0 %955  ;;  %1433 = vmatprep.mubr.msk.bf16.mxu0 %vm1540_vm0, %v1539_v1 }
 0x354   : > { %v961_v38 = vsel %vm726_vm4, %v956_v37, 0 }
 0x355   : > { %v1510_v39 = vpop.eup %1509  ;;  %1432 = vmatpush3.bf16.msra.mxu0 %v961_v38 }
 0x356   : > { %1443 = vmatprep.subr.bf16.mxu0 %v1539_v1  ;;  %v953_v40 = vmul.f32 %v1510_v39, %v1502_v21 }
 0x358   : > { %v954_v42 = vpack.c.bf16 %v953_v40, %v953_v40 }
 0x35a   : > { %1434 = vmatmul.mubr.msk.bf16.vlgmr.msra.gmra.mxu0 %vm722_vm5, %v954_v42 }
 0x35b   : > { %1444 = vmatpush3.bf16.msra.mxu0 %v1078_v43  ;;  %1445 = vmatprep.mubr.msk.bf16.mxu0 %vm1540_vm0, %v1539_v1 }
 0x35d   : > { %v1512_v44 = vpop.eup %1511 }
 0x35e   : > { %v1070_v45 = vmul.f32 %v1512_v44, %v1504_v23 }
 0x360   : > { %v1071_v46 = vpack.c.bf16 %v1070_v45, %v1070_v45 }
 0x362   : > { %1446 = vmatmul.mubr.msk.bf16.vlgmr.msra.gmra.mxu0 %vm722_vm5, %v1071_v46 }
 0x3a0   : > { %v764_v47 = vpop.f32.mrf.mxu0 }
 0x3a1   : > { %771 = vst.msk [vmem:[#allocation2] sm:$0x3f] %vm770_vm6, %v764_v47 }
 0x3a2   : > { %v1411_v48 = vpop.f32.mrf.mxu0 }
 0x3a4   : > { %v767_v49 = vpop.f32.mrf.mxu0 }
 0x3a6   : > { %v1412_v50 = vpop.f32.mrf.mxu0 }
 0x412   : > { %v880_v51 = vpop.f32.mrf.mxu0 }
 0x413   : > { %887 = vrot.lane.b32.xlu1 %v880_v51, %s1544_s25 }
 0x414   : > { %v1423_v52 = vpop.f32.mrf.mxu0 }
 0x416   : > { %v883_v53 = vpop.f32.mrf.mxu0 }
 0x418   : > { %v1424_v55 = vpop.f32.mrf.mxu0 }
 0x41a   : > { %v997_v57 = vpop.f32.mrf.mxu0 }
 0x41b   : > { %1004 = vrot.lane.b32.xlu0 %v997_v57, %s1545_s29 }
 0x41c   : > { %v1435_v58 = vpop.f32.mrf.mxu0 }
 0x41e   : > { %v1000_v59 = vpop.f32.mrf.mxu0 }
 0x420   : > { %v1436_v60 = vpop.f32.mrf.mxu0 }
 0x422   : > { %v1114_v61 = vpop.f32.mrf.mxu0 }
 0x423   : > { %1121 = vrot.lane.b32.xlu1 %v1114_v61, %s1546_s30 }
 0x424   : > { %v1447_v62 = vpop.f32.mrf.mxu0 }
 0x426   : > { %v1117_v63 = vpop.f32.mrf.mxu0 }
 0x428   : > { %v1448_v0 = vpop.f32.mrf.mxu0 }
 0x485   : > { %v888_v2 = vpop.permute.xlu1 %887 }
 0x486   : > { %891 = vst.msk [vmem:[#allocation2] sm:$0x3f] %vm890_vm7, %v888_v2 }
 0x48d   : > { %v1005_v3 = vpop.permute.xlu0 %1004 }
 0x48e   : > { %1008 = vst.msk [vmem:[#allocation2] sm:$0x3f] %vm1007_vm8, %v1005_v3 }
 0x495   : > { %v1122_v1 = vpop.permute.xlu1 %1121 }
 0x496   : > { %1125 = vst.msk [vmem:[#allocation2] sm:$0x3f] %vm1124_vm9, %v1122_v1 }
 0x49d   : > { %v1126_v4 = vld [vmem:[#allocation2] sm:$0x3f] }
 0x49e   : > { %v1127_v5 = vpack.c.bf16 %v1126_v4, %v1126_v4 }
 0x4a0   : > { %1454 = vmatmul.mubr.msk.bf16.vlgmr.msra.gmra.mxu1 %vm485_vm1, %v1127_v5 }
 0x560   : > { %v1188_v8 = vpop.f32.mrf.mxu1 }
 0x561   : > { %v1189_v9 = vadd.f32 %v1341_v6, %v1188_v8 }
 0x562   : > { %v1455_v10 = vpop.f32.mrf.mxu1 }
 0x563   : > { %v1194_v11 = vadd.f32 %v1189_v9, %v1662_v7  ;;  %v1345_v7 = vld [vmem:[%s1790_s10] ss:$0 sm:$0xff] }
 0x564   : > { %v1191_v12 = vpop.f32.mrf.mxu1 }
 0x565   : > { %v1196_v13 = vsel %vm1195_vm10, %v1194_v11, 0.0 }
 0x566   : > { %1197 = vadd.xlane.f32.xlu0 %v1196_v13  ;;  %v1456_v14 = vpop.f32.mrf.mxu1 }
 0x5ef   : > { %v1198_v15 = vpop.xlane.xlu0 %1197 }
 0x5f0   : > { %v1200_v16 = vmul.f32 0.03125, %v1198_v15 }
 0x5f2   : > { %v1201_v17 = vsub.f32 %v1194_v11, %v1200_v16 }
 0x5f4   : > { %v1202_v18 = vmul.f32 %v1201_v17, %v1201_v17 }
 0x5f6   : > { %v1203_v19 = vsel %vm1195_vm10, %v1202_v18, 0.0 }
 0x5f7   : > { %1204 = vadd.xlane.f32.xlu1 %v1203_v19 }
 0x680   : > { %v1205_v20 = vpop.xlane.xlu1 %1204 }
 0x681   : > { %v1206_v21 = vmul.f32 0.03125, %v1205_v20 }
 0x683   : > { %v1207_v22 = vadd.f32 1e-05, %v1206_v21 }
 0x685   : > { %1513 = vrsqrt.f32 %v1207_v22 }
 0x692   : > { %v1514_v23 = vpop.eup %1513 }
 0x693   : > { %v1209_v24 = vmul.f32 %v1514_v23, %v1201_v17 }
 0x695   : > { %v1217_v26 = vmul.f32 %v1345_v7, %v1209_v24 }
 0x697   : > { %v1225_v27 = vadd.f32 %v1346_v25, %v1217_v26 }
 0x699   : > { %1226 = vst.msk [vmem:[%s456_s21] sm:$0x3f] %vm1195_vm10, %v1225_v27 }
 0x69a PF: > { %s22_s23 = sadd.s32 1, %s1537_s23   ;;  %s1793_s21 = smov %s1533_s22 }
 0x69b   : > { %p19_p5 = scmp.ge.s32.totalorder %s22_s23, 4   ;;  %s1794_s22 = smov %s1796_s24 }
 0x69d   :  { %21 = sbr.rel (!%p19_p5) target bundleno = 2 (0x2), region = 101 }

// kernel: transformer_model_forward.22
= control target key start
LH: loop header
LB: loop body
LE: loop exit
PB: predicated region body
PF: predicated region fallthrough
CT: control target
= control target key end

     0   :  { %s1610_s21 = smov 0   ;;  %s1612_s22 = smov 0   ;;  %s1779_s0 = inlined_call_operand.vmem [shape: f32[2,6,32], index: 0, kind: input, shape index: {}]   ;;  %s1780_s1 = inlined_call_operand.vmem [shape: f32[2,8,32], index: 1, kind: input, shape index: {}]   ;;  %s1781_s2 = inlined_call_operand.vmem [shape: bf16[32,32], index: 2, kind: input, shape index: {}]   ;;  %s1782_s3 = inlined_call_operand.vmem [shape: bf16[32,32], index: 3, kind: input, shape index: {}]   ;;  %s1783_s4 = inlined_call_operand.vmem [shape: bf16[32,32], index: 4, kind: input, shape index: {}]   ;;  %s1784_s5 = inlined_call_operand.vmem [shape: f32[1,32], index: 5, kind: input, shape index: {}]   ;;  %s1785_s6 = inlined_call_operand.vmem [shape: f32[1,32], index: 6, kind: input, shape index: {}]   ;;  %s1786_s7 = inlined_call_operand.vmem [shape: f32[1,32], index: 7, kind: input, shape index: {}]   ;;  %s1787_s8 = inlined_call_operand.vmem [shape: bf16[32,32], index: 8, kind: input, shape index: {}]   ;;  %s1788_s9 = inlined_call_operand.vmem [shape: f32[1,32], index: 9, kind: input, shape index: {}]   ;;  %s1789_s10 = inlined_call_operand.vmem [shape: f32[1,32], index: 10, kind: input, shape index: {}]   ;;  %s1790_s11 = inlined_call_operand.vmem [shape: f32[1,32], index: 11, kind: input, shape index: {}]   ;;  %s1791_s12 = inlined_call_operand.vmem [shape: f32[2,6,32], index: 12, kind: output, shape index: {}]  }
   0x1   :  { %s1614_s23 = smov 0  }
   0x2 LB: > { %s34_s24 = sadd.s32 1, %s1531_s22  ;;  %p1315_p0 = scmp.ge.s32.totalorder %s1535_s23, 1  ;;  %s1535_s23 = sphi %s1614_s23, %s22_s23   ;;  %s1531_s22 = sphi %s1612_s22, %s1793_s22   ;;  %s1527_s21 = sphi %s1610_s21, %s1792_s21  }
   0x3   : > { %p36_p1 = scmp.ge.s32.totalorder %s34_s24, 2  ;;  %p389_p2 = scmp.lt.s32.totalorder %s1535_s23, 3 }
   0x5   : > { %s1795_s24 = smov (%p36_p1, %s34_s24), 0  ;;  %p390_p3 = pnand %p1315_p0, %p389_p2 }
   0x6   : > { %p439_p4 = scmp.lt.s32.totalorder (!%p390_p3), %s1527_s21, 1  ;;  %s1539_s29 = smov (!%p390_p3), 112  }
   0x7   : > { %393 = sbr.rel (%p390_p3) target bundleno = 1690 (0x69a), region = 68  ;;  %s1540_s30 = smov (!%p390_p3), 120  }
   0x8   : > { %s1541_s13 = smov (!%p390_p3), 104  }
   0xc   : > { %v1487_v0 = vld [vmem:[%s1782_s3 + $0x8] sm:$0xff]   ;;  %v1537_v1 = vmov 0.0   ;;  %v1489_v3 = vld [vmem:[%s1782_s3] sm:$0xff]   ;;  %vm1538_vm0 = vmmov 0   ;;  %s1797_s21 = smov (!%p439_p4, %s1527_s21), 1  ;;  %vm485_vm1 = vcmask 261120  }
   0xd   : > { %1383 = vmatprep.subr.bf16.mxu1 %v1537_v1  ;;  %1375 = vmatprep.subr.bf16.mxu0 %v1537_v1  ;;  %v1488_v2 = vld [vmem:[%s1781_s2 + $0x8] sm:$0xff]   ;;  %v1490_v4 = vld [vmem:[%s1781_s2] sm:$0xff]   ;;  %s1648_s15 = sshll.u32 %s1797_s21, 3  ;;  %vm661_vm2 = vcmask 64512   ;;  %vm709_vm3 = vcmask 62464   ;;  %vm725_vm4 = vcmask 1043456  }
   0xe   : > { %1384 = vmatpush3.bf16.msra.mxu1 %v1487_v0  ;;  %1387 = vmatprep.mubr.msk.bf16.mxu1 %vm1538_vm0, %v1537_v1  ;;  %s449_s18 = scalar_lea.vmem %s1780_s1, %s1648_s15  ;;  %s445_s25 = scalar_lea.vmem %s1779_s0, %s1648_s15  ;;  %v1323_v9 = vld [vmem:[%s1785_s6] ss:$0 sm:$0xff]  ;;  %v1491_v24 = vld [vmem:[%s1783_s4 + $0x8] sm:$0xff]   ;;  %vm888_vm5 = vcmask 128064   ;;  %vm1005_vm6 = vcmask 193664   ;;  %vm1122_vm7 = vcmask 259264  }
   0xf   : > { %1376 = vmatpush3.bf16.msra.mxu0 %v1488_v2  ;;  %1385 = vmatprep.subr.bf16.mxu1 %v1537_v1  ;;  %v459_v5 = vld [vmem:[%s449_s18] sm:$0xff]  ;;  %vm1193_vm8 = vcmask 259072   ;;  %s456_s21 = scalar_lea.vmem %s1791_s12, %s1648_s15 }
  0x10   : > { %1377 = vmatprep.subr.bf16.mxu0 %v1537_v1  ;;  %1379 = vmatprep.mubr.msk.bf16.mxu0 %vm1538_vm0, %v1537_v1  ;;  %v461_v6 = vpack.c.bf16 %v459_v5, %v459_v5  ;;  %v1660_v7 = vld [vmem:[%s445_s25] sm:$0x3f]  ;;  %s1542_s25 = smov 8  }
  0x11   : > { %v460_v8 = vpack.c.bf16 %v1660_v7, %v1660_v7  ;;  %v1319_v10 = vld [vmem:[%s1784_s5] ss:$0 sm:$0xff] }
  0x12   : > { %1386 = vmatpush3.bf16.msra.mxu1 %v1489_v3  ;;  %v1492_v25 = vld [vmem:[%s1783_s4] sm:$0xff]  }
  0x13   : > { %1378 = vmatpush3.bf16.msra.mxu0 %v1490_v4  ;;  %1399 = vmatprep.subr.bf16.mxu1 %v1537_v1  ;;  %v1327_v41 = vld [vmem:[%s1786_s7] ss:$0 sm:$0xff] }
  0x14   : > { %1391 = vmatprep.subr.bf16.mxu0 %v1537_v1 }
  0x15   : > { %1388 = vmatmul.mubr.msk.bf16.vlgmr.msra.gmra.mxu1 %vm485_vm1, %v461_v6 }
  0x16   : > { %1380 = vmatmul.mubr.msk.bf16.vlgmr.msra.gmra.mxu0 %vm485_vm1, %v460_v8  ;;  %1401 = vmatprep.mubr.msk.bf16.mxu1 %vm1538_vm0, %v1537_v1 }
  0x17   : > { %1395 = vmatprep.mubr.msk.bf16.mxu0 %vm1538_vm0, %v1537_v1  ;;  %1392 = vmatpush3.bf16.msra.mxu0 %v1491_v24 }
  0x18   : > { %1393 = vmatprep.subr.bf16.mxu0 %v1537_v1 }
  0x1b   : > { %1394 = vmatpush3.bf16.msra.mxu0 %v1492_v25 }
  0x1c   : > { %1405 = vmatprep.subr.bf16.mxu0 %v1537_v1 }
  0x1e   : > { %1396 = vmatmul.mubr.msk.bf16.vlgmr.msra.gmra.mxu0 %vm485_vm1, %v461_v6 }
  0x1f   : > { %1407 = vmatprep.mubr.msk.bf16.mxu0 %vm1538_vm0, %v1537_v1 }
  0xd5   : > { %v589_v11 = vpop.f32.mrf.mxu1 }
  0xd6   : > { %v590_v12 = vadd.f32 %v1323_v9, %v589_v11  ;;  %v523_v13 = vpop.f32.mrf.mxu0 }
  0xd7   : > { %v524_v14 = vadd.f32 %v1319_v10, %v523_v13  ;;  %v1389_v15 = vpop.f32.mrf.mxu1 }
  0xd8   : > { %v659_v16 = vpack.c.bf16 %v590_v12, %v590_v12  ;;  %v1381_v17 = vpop.f32.mrf.mxu0 }
  0xd9   : > { %v592_v18 = vpop.f32.mrf.mxu1  ;;  %v658_v19 = vpack.c.bf16 %v524_v14, %v524_v14 }
  0xda   : > { %892 = vrot.lane.b32.xlu1 %v659_v16, %s1539_s29  ;;  %774 = vrot.lane.b32.xlu0 %v659_v16, %s1540_s30  ;;  %v526_v20 = vpop.f32.mrf.mxu0  ;;  %v666_v21 = vsel %vm661_vm2, %v659_v16, 0 }
  0xdb   : > { %v1390_v22 = vpop.f32.mrf.mxu1  ;;  %1400 = vmatpush3.bf16.xpose.msra.mxu1 %v666_v21 }
  0xdc   : > { %v1382_v23 = vpop.f32.mrf.mxu0  ;;  %1411 = vmatprep.subr.bf16.mxu1 %v1537_v1 }
  0xde   : > { %890 = vrot.lane.b32.xlu1 %v658_v19, %s1539_s29  ;;  %771 = vrot.lane.b32.xlu0 %v658_v19, %s1540_s30  ;;  %v652_v42 = vpop.f32.mrf.mxu0 }
  0xdf   : > { %v653_v43 = vadd.f32 %v1327_v41, %v652_v42 }
  0xe0   : > { %v1397_v44 = vpop.f32.mrf.mxu0 }
  0xe1   : > { %v660_v45 = vpack.c.bf16 %v653_v43, %v653_v43 }
  0xe2   : > { %1007 = vrot.lane.b32.xlu1 %v658_v19, %s1541_s13  ;;  %1009 = vrot.lane.b32.xlu0 %v659_v16, %s1541_s13  ;;  %v655_v46 = vpop.f32.mrf.mxu0 }
  0xe3   : > { %1402 = vmatmul.mubr.msk.bf16.vlgmr.msra.gmra.mxu1 %vm661_vm2, %v658_v19  ;;  %v727_v47 = vsel %vm725_vm4, %v660_v45, 0 }
  0xe4   : > { %1413 = vmatprep.mubr.msk.bf16.mxu1 %vm1538_vm0, %v1537_v1  ;;  %v1398_v48 = vpop.f32.mrf.mxu0  ;;  %1406 = vmatpush3.bf16.msra.mxu0 %v727_v47 }
  0xe5   : > { %1417 = vmatprep.subr.bf16.mxu0 %v1537_v1 }
 0x14c   : > { %v775_v26 = vpop.permute.xlu0 %774  ;;  %v893_v28 = vpop.permute.xlu1 %892 }
 0x14d   : > { %v780_v27 = vsel %vm661_vm2, %v775_v26, 0  ;;  %v898_v30 = vsel %vm661_vm2, %v893_v28, 0 }
 0x14e   : > { %1412 = vmatpush3.bf16.xpose.msra.mxu1 %v780_v27 }
 0x14f   : > { %1423 = vmatprep.subr.bf16.mxu1 %v1537_v1 }
 0x150   : > { %v772_v29 = vpop.permute.xlu0 %771  ;;  %v891_v32 = vpop.permute.xlu1 %890 }
 0x154   : > { %v1010_v31 = vpop.permute.xlu0 %1009  ;;  %v1008_v34 = vpop.permute.xlu1 %1007 }
 0x155   : > { %1414 = vmatmul.mubr.msk.bf16.vlgmr.msra.gmra.mxu1 %vm661_vm2, %v772_v29  ;;  %v1015_v33 = vsel %vm661_vm2, %v1010_v31, 0 }
 0x156   : > { %1424 = vmatpush3.bf16.xpose.msra.mxu1 %v898_v30  ;;  %1425 = vmatprep.mubr.msk.bf16.mxu1 %vm1538_vm0, %v1537_v1 }
 0x157   : > { %1435 = vmatprep.subr.bf16.mxu1 %v1537_v1 }
 0x15d   : > { %1426 = vmatmul.mubr.msk.bf16.vlgmr.msra.gmra.mxu1 %vm661_vm2, %v891_v32 }
 0x15e   : > { %1436 = vmatpush3.bf16.xpose.msra.mxu1 %v1015_v33  ;;  %1437 = vmatprep.mubr.msk.bf16.mxu1 %vm1538_vm0, %v1537_v1 }
 0x15f   : > { %1447 = vmatprep.subr.bf16.mxu1 %v1537_v1 }
 0x165   : > { %1438 = vmatmul.mubr.msk.bf16.vlgmr.msra.gmra.mxu1 %vm661_vm2, %v1008_v34 }
 0x166   : > { %1451 = vmatprep.mubr.msk.bf16.mxu1 %vm1538_vm0, %v1537_v1 }
 0x1a3   : > { %v702_v35 = vpop.f32.mrf.mxu1 }
 0x1a4   : > { %v708_v36 = vmul.f32 0.35355338, %v702_v35 }
 0x1a5   : > { %v1403_v37 = vpop.f32.mrf.mxu1 }
 0x1a6   : > { %v710_v38 = vsel %vm709_vm3, %v708_v36, -inf }
 0x1a7   : > { %711 = vmax.xlane.f32.xlu0 %v710_v38  ;;  %v705_v39 = vpop.f32.mrf.mxu1 }
 0x1a9   : > { %v1404_v40 = vpop.f32.mrf.mxu1 }
 0x215   : > { %v816_v49 = vpop.f32.mrf.mxu1 }
 0x216   : > { %v822_v50 = vmul.f32 0.35355338, %v816_v49 }
 0x217   : > { %v1415_v51 = vpop.f32.mrf.mxu1 }
 0x218   : > { %v823_v52 = vsel %vm709_vm3, %v822_v50, -inf }
 0x219   : > { %824 = vmax.xlane.f32.xlu1 %v823_v52  ;;  %v819_v53 = vpop.f32.mrf.mxu1 }
 0x21b   : > { %v1416_v54 = vpop.f32.mrf.mxu1 }
 0x21c   : > { %v1493_v54 = vld [vmem:[%s1787_s8 + $0x8] sm:$0xff]  }
 0x21d   : > { %v934_v55 = vpop.f32.mrf.mxu1  ;;  %1448 = vmatpush3.bf16.msra.mxu1 %v1493_v54 }
 0x21e   : > { %v940_v56 = vmul.f32 0.35355338, %v934_v55  ;;  %1449 = vmatprep.subr.bf16.mxu1 %v1537_v1 }
 0x21f   : > { %v1427_v57 = vpop.f32.mrf.mxu1 }
 0x220   : > { %v941_v58 = vsel %vm709_vm3, %v940_v56, -inf }
 0x221   : > { %942 = vmax.xlane.f32.xlu0 %v941_v58  ;;  %v937_v59 = vpop.f32.mrf.mxu1 }
 0x223   : > { %v1428_v60 = vpop.f32.mrf.mxu1 }
 0x225   : > { %v1051_v61 = vpop.f32.mrf.mxu1 }
 0x226   : > { %v1057_v62 = vmul.f32 0.35355338, %v1051_v61 }
 0x227   : > { %v1439_v63 = vpop.f32.mrf.mxu1 }
 0x228   : > { %v1058_v0 = vsel %vm709_vm3, %v1057_v62, -inf }
 0x229   : > { %1059 = vmax.xlane.f32.xlu0 %v1058_v0  ;;  %v1054_v2 = vpop.f32.mrf.mxu1 }
 0x22b   : > { %v1440_v3 = vpop.f32.mrf.mxu1 }
 0x230   : > { %v712_v4 = vpop.xlane.xlu0 %711 }
 0x231   : > { %v713_v5 = vsub.f32 %v708_v36, %v712_v4 }
 0x233   : > { %v714_v6 = vmul.f32 1.442695, %v713_v5 }
 0x235   : > { %1495 = vpow2.f32 %v714_v6  ;;  %v1339_v6 = vld [vmem:[%s1788_s9] ss:$0 sm:$0xff] }
 0x242   : > { %v1496_v8 = vpop.eup %1495 }
 0x243   : > { %v716_v9 = vsel %vm709_vm3, %v1496_v8, 0.0 }
 0x244   : > { %717 = vadd.xlane.f32.xlu1 %v716_v9 }
 0x255   : > { %836 = vrot.lane.b32.xlu1 %v660_v45, %s1540_s30  ;;  %s1544_s30 = smov 24  }
 0x2a2   : > { %v825_v10 = vpop.xlane.xlu1 %824 }
 0x2a3   : > { %v826_v11 = vsub.f32 %v822_v50, %v825_v10 }
 0x2a5   : > { %v827_v12 = vmul.f32 1.442695, %v826_v11 }
 0x2a7   : > { %1497 = vpow2.f32 %v827_v12 }
 0x2aa   : > { %v943_v13 = vpop.xlane.xlu0 %942 }
 0x2ab   : > { %v944_v14 = vsub.f32 %v940_v56, %v943_v13  ;;  %v1494_v56 = vld [vmem:[%s1787_s8] sm:$0xff]  }
 0x2ac   : > { %1450 = vmatpush3.bf16.msra.mxu1 %v1494_v56 }
 0x2ad   : > { %v945_v15 = vmul.f32 1.442695, %v944_v14 }
 0x2af   : > { %1499 = vpow2.f32 %v945_v15 }
 0x2b2   : > { %v1060_v16 = vpop.xlane.xlu0 %1059 }
 0x2b3   : > { %v1061_v17 = vsub.f32 %v1057_v62, %v1060_v16 }
 0x2b4   : > { %v1498_v18 = vpop.eup %1497 }
 0x2b5   : > { %v1062_v19 = vmul.f32 1.442695, %v1061_v17  ;;  %v829_v20 = vsel %vm709_vm3, %v1498_v18, 0.0 }
 0x2b6   : > { %830 = vadd.xlane.f32.xlu0 %v829_v20 }
 0x2b7   : > { %1501 = vpow2.f32 %v1062_v19 }
 0x2bc   : > { %v1500_v21 = vpop.eup %1499 }
 0x2bd   : > { %v947_v22 = vsel %vm709_vm3, %v1500_v21, 0.0 }
 0x2be   : > { %948 = vadd.xlane.f32.xlu1 %v947_v22 }
 0x2c4   : > { %v1502_v23 = vpop.eup %1501 }
 0x2c5   : > { %v1064_v24 = vsel %vm709_vm3, %v1502_v23, 0.0 }
 0x2c6   : > { %1065 = vadd.xlane.f32.xlu0 %v1064_v24 }
 0x2cd   : > { %v718_v25 = vpop.xlane.xlu1 %717 }
 0x2ce   : > { %1503 = vrcp.f32 %v718_v25  ;;  %v1344_v25 = vld [vmem:[%s1790_s11] ss:$0 sm:$0xff] }
 0x2cf   : > { %1070 = vrot.lane.b32.xlu1 %v660_v45, %s1541_s13 }
 0x2d1   : > { %v837_v27 = vpop.permute.xlu1 %836 }
 0x2d2   : > { %v842_v30 = vsel %vm725_vm4, %v837_v27, 0 }
 0x2db   : > { %v1504_v26 = vpop.eup %1503 }
 0x2dc   : > { %953 = vrot.lane.b32.xlu0 %v660_v45, %s1539_s29  ;;  %v720_v28 = vmul.f32 %v1504_v26, %v1496_v8  ;;  %s1543_s29 = smov 16  }
 0x2de   : > { %v721_v29 = vpack.c.bf16 %v720_v28, %v720_v28 }
 0x2e0   : > { %1408 = vmatmul.mubr.msk.bf16.vlgmr.msra.gmra.mxu0 %vm661_vm2, %v721_v29 }
 0x2e1   : > { %1418 = vmatpush3.bf16.msra.mxu0 %v842_v30  ;;  %1419 = vmatprep.mubr.msk.bf16.mxu0 %vm1538_vm0, %v1537_v1 }
 0x2e2   : > { %1429 = vmatprep.subr.bf16.mxu0 %v1537_v1 }
 0x33f   : > { %v831_v31 = vpop.xlane.xlu0 %830 }
 0x340   : > { %1505 = vrcp.f32 %v831_v31 }
 0x347   : > { %v949_v32 = vpop.xlane.xlu1 %948 }
 0x348   : > { %1507 = vrcp.f32 %v949_v32 }
 0x34b   : > { %v1071_v41 = vpop.permute.xlu1 %1070 }
 0x34c   : > { %v1076_v43 = vsel %vm725_vm4, %v1071_v41, 0 }
 0x34d   : > { %v1506_v33 = vpop.eup %1505 }
 0x34e   : > { %v833_v34 = vmul.f32 %v1506_v33, %v1498_v18 }
 0x34f   : > { %v1066_v35 = vpop.xlane.xlu0 %1065 }
 0x350   : > { %1509 = vrcp.f32 %v1066_v35  ;;  %v834_v36 = vpack.c.bf16 %v833_v34, %v833_v34 }
 0x352   : > { %1420 = vmatmul.mubr.msk.bf16.vlgmr.msra.gmra.mxu0 %vm661_vm2, %v834_v36 }
 0x353   : > { %v954_v37 = vpop.permute.xlu0 %953  ;;  %1431 = vmatprep.mubr.msk.bf16.mxu0 %vm1538_vm0, %v1537_v1 }
 0x354   : > { %v959_v38 = vsel %vm725_vm4, %v954_v37, 0 }
 0x355   : > { %v1508_v39 = vpop.eup %1507  ;;  %1430 = vmatpush3.bf16.msra.mxu0 %v959_v38 }
 0x356   : > { %1441 = vmatprep.subr.bf16.mxu0 %v1537_v1  ;;  %v951_v40 = vmul.f32 %v1508_v39, %v1500_v21 }
 0x358   : > { %v952_v42 = vpack.c.bf16 %v951_v40, %v951_v40 }
 0x35a   : > { %1432 = vmatmul.mubr.msk.bf16.vlgmr.msra.gmra.mxu0 %vm661_vm2, %v952_v42 }
 0x35b   : > { %1442 = vmatpush3.bf16.msra.mxu0 %v1076_v43  ;;  %1443 = vmatprep.mubr.msk.bf16.mxu0 %vm1538_vm0, %v1537_v1 }
 0x35d   : > { %v1510_v44 = vpop.eup %1509 }
 0x35e   : > { %v1068_v45 = vmul.f32 %v1510_v44, %v1502_v23 }
 0x360   : > { %v1069_v46 = vpack.c.bf16 %v1068_v45, %v1068_v45 }
 0x362   : > { %1444 = vmatmul.mubr.msk.bf16.vlgmr.msra.gmra.mxu0 %vm661_vm2, %v1069_v46 }
 0x3a0   : > { %v763_v47 = vpop.f32.mrf.mxu0 }
 0x3a1   : > { %769 = vst.msk [vmem:[#allocation2] sm:$0x3f] %vm709_vm3, %v763_v47 }
 0x3a2   : > { %v1409_v48 = vpop.f32.mrf.mxu0 }
 0x3a4   : > { %v766_v49 = vpop.f32.mrf.mxu0 }
 0x3a6   : > { %v1410_v50 = vpop.f32.mrf.mxu0 }
 0x412   : > { %v878_v51 = vpop.f32.mrf.mxu0 }
 0x413   : > { %885 = vrot.lane.b32.xlu1 %v878_v51, %s1542_s25 }
 0x414   : > { %v1421_v52 = vpop.f32.mrf.mxu0 }
 0x416   : > { %v881_v53 = vpop.f32.mrf.mxu0 }
 0x418   : > { %v1422_v55 = vpop.f32.mrf.mxu0 }
 0x41a   : > { %v995_v57 = vpop.f32.mrf.mxu0 }
 0x41b   : > { %1002 = vrot.lane.b32.xlu0 %v995_v57, %s1543_s29 }
 0x41c   : > { %v1433_v58 = vpop.f32.mrf.mxu0 }
 0x41e   : > { %v998_v59 = vpop.f32.mrf.mxu0 }
 0x420   : > { %v1434_v60 = vpop.f32.mrf.mxu0 }
 0x422   : > { %v1112_v61 = vpop.f32.mrf.mxu0 }
 0x423   : > { %1119 = vrot.lane.b32.xlu1 %v1112_v61, %s1544_s30 }
 0x424   : > { %v1445_v62 = vpop.f32.mrf.mxu0 }
 0x426   : > { %v1115_v63 = vpop.f32.mrf.mxu0 }
 0x428   : > { %v1446_v0 = vpop.f32.mrf.mxu0 }
 0x485   : > { %v886_v2 = vpop.permute.xlu1 %885 }
 0x486   : > { %889 = vst.msk [vmem:[#allocation2] sm:$0x3f] %vm888_vm5, %v886_v2 }
 0x48d   : > { %v1003_v3 = vpop.permute.xlu0 %1002 }
 0x48e   : > { %1006 = vst.msk [vmem:[#allocation2] sm:$0x3f] %vm1005_vm6, %v1003_v3 }
 0x495   : > { %v1120_v1 = vpop.permute.xlu1 %1119 }
 0x496   : > { %1123 = vst.msk [vmem:[#allocation2] sm:$0x3f] %vm1122_vm7, %v1120_v1 }
 0x49d   : > { %v1124_v4 = vld [vmem:[#allocation2] sm:$0x3f] }
 0x49e   : > { %v1125_v5 = vpack.c.bf16 %v1124_v4, %v1124_v4 }
 0x4a0   : > { %1452 = vmatmul.mubr.msk.bf16.vlgmr.msra.gmra.mxu1 %vm485_vm1, %v1125_v5 }
 0x560   : > { %v1186_v8 = vpop.f32.mrf.mxu1 }
 0x561   : > { %v1187_v9 = vadd.f32 %v1339_v6, %v1186_v8 }
 0x562   : > { %v1453_v10 = vpop.f32.mrf.mxu1 }
 0x563   : > { %v1192_v11 = vadd.f32 %v1187_v9, %v1660_v7  ;;  %v1343_v7 = vld [vmem:[%s1789_s10] ss:$0 sm:$0xff] }
 0x564   : > { %v1189_v12 = vpop.f32.mrf.mxu1 }
 0x565   : > { %v1194_v13 = vsel %vm1193_vm8, %v1192_v11, 0.0 }
 0x566   : > { %1195 = vadd.xlane.f32.xlu0 %v1194_v13  ;;  %v1454_v14 = vpop.f32.mrf.mxu1 }
 0x5ef   : > { %v1196_v15 = vpop.xlane.xlu0 %1195 }
 0x5f0   : > { %v1198_v16 = vmul.f32 0.03125, %v1196_v15 }
 0x5f2   : > { %v1199_v17 = vsub.f32 %v1192_v11, %v1198_v16 }
 0x5f4   : > { %v1200_v18 = vmul.f32 %v1199_v17, %v1199_v17 }
 0x5f6   : > { %v1201_v19 = vsel %vm1193_vm8, %v1200_v18, 0.0 }
 0x5f7   : > { %1202 = vadd.xlane.f32.xlu1 %v1201_v19 }
 0x680   : > { %v1203_v20 = vpop.xlane.xlu1 %1202 }
 0x681   : > { %v1204_v21 = vmul.f32 0.03125, %v1203_v20 }
 0x683   : > { %v1205_v22 = vadd.f32 1e-05, %v1204_v21 }
 0x685   : > { %1511 = vrsqrt.f32 %v1205_v22 }
 0x692   : > { %v1512_v23 = vpop.eup %1511 }
 0x693   : > { %v1207_v24 = vmul.f32 %v1512_v23, %v1199_v17 }
 0x695   : > { %v1215_v26 = vmul.f32 %v1343_v7, %v1207_v24 }
 0x697   : > { %v1223_v27 = vadd.f32 %v1344_v25, %v1215_v26 }
 0x699   : > { %1224 = vst.msk [vmem:[%s456_s21] sm:$0x3f] %vm1193_vm8, %v1223_v27 }
 0x69a PF: > { %s22_s23 = sadd.s32 1, %s1535_s23   ;;  %s1792_s21 = smov %s1531_s22 }
 0x69b   : > { %p19_p5 = scmp.ge.s32.totalorder %s22_s23, 4   ;;  %s1793_s22 = smov %s1795_s24 }
 0x69d   :  { %21 = sbr.rel (!%p19_p5) target bundleno = 2 (0x2), region = 101 }

// kernel: transformer_model_forward.27
= control target key start
LH: loop header
LB: loop body
LE: loop exit
PB: predicated region body
PF: predicated region fallthrough
CT: control target
= control target key end

     0   :  { %vm23_vm0 = vcmask 261120   ;;  %vm27_vm1 = vcmask 257024   ;;  %v169_v14 = vmov 0.0   ;;  %vm170_vm2 = vmmov 0   ;;  %s231_s0 = inlined_call_operand.vmem [shape: f32[12,32], index: 0, kind: input, shape index: {}]   ;;  %s232_s3 = inlined_call_operand.vmem [shape: bf16[32,128], index: 3, kind: input, shape index: {}]   ;;  %s233_s1 = inlined_call_operand.vmem [shape: f32[1,32], index: 1, kind: input, shape index: {}]   ;;  %s234_s2 = inlined_call_operand.vmem [shape: f32[1,32], index: 2, kind: input, shape index: {}]   ;;  %s235_s4 = inlined_call_operand.vmem [shape: f32[1,128], index: 4, kind: input, shape index: {}]   ;;  %s236_s5 = inlined_call_operand.vmem [shape: f32[12,128], index: 5, kind: output, shape index: {}]  }
   0x1   :  { %v21_v0 = vld [vmem:[%s231_s0] sm:$0xff]  ;;  %v22_v1 = vld [vmem:[%s231_s0 + $0x8] sm:$0xf]  ;;  %153 = vmatprep.subr.bf16.mxu0 %v169_v14  ;;  %157 = vmatprep.mubr.msk.bf16.mxu0 %vm170_vm2, %v169_v14 }
   0x2   :  { %v24_v2 = vsel %vm23_vm0, %v21_v0, 0.0  ;;  %v28_v3 = vsel %vm27_vm1, %v22_v1, 0.0  ;;  %v163_v15 = vld [vmem:[%s232_s3 + $0x8] sm:$0xff]   ;;  %v164_v16 = vld [vmem:[%s232_s3] sm:$0xff]  }
   0x3   :  { %25 = vadd.xlane.f32.xlu0 %v24_v2  ;;  %154 = vmatpush3.bf16.msra.mxu0 %v163_v15  ;;  %v144_v25 = vld [vmem:[%s233_s1] ss:$0 sm:$0xff] }
   0x4   :  { %155 = vmatprep.subr.bf16.mxu0 %v169_v14  ;;  %v145_v29 = vld [vmem:[%s234_s2] ss:$0 sm:$0xff] }
   0x5   :  { %v146_v34 = vld [vmem:[%s235_s4] ss:$0 sm:$0xff] }
   0x7   :  { %29 = vadd.xlane.f32.xlu0 %v28_v3  ;;  %156 = vmatpush3.bf16.msra.mxu0 %v164_v16 }
  0x8c   :  { %v26_v4 = vpop.xlane.xlu0 %25 }
  0x8d   :  { %v32_v5 = vmul.f32 0.03125, %v26_v4 }
  0x8f   :  { %v34_v6 = vsub.f32 %v21_v0, %v32_v5 }
  0x90   :  { %v30_v7 = vpop.xlane.xlu0 %29 }
  0x91   :  { %v33_v8 = vmul.f32 0.03125, %v30_v7  ;;  %v36_v9 = vmul.f32 %v34_v6, %v34_v6 }
  0x93   :  { %v35_v10 = vsub.f32 %v22_v1, %v33_v8  ;;  %v38_v11 = vsel %vm23_vm0, %v36_v9, 0.0 }
  0x94   :  { %39 = vadd.xlane.f32.xlu1 %v38_v11 }
  0x95   :  { %v37_v12 = vmul.f32 %v35_v10, %v35_v10 }
  0x97   :  { %v41_v13 = vsel %vm27_vm1, %v37_v12, 0.0 }
  0x98   :  { %42 = vadd.xlane.f32.xlu1 %v41_v13 }
 0x11d   :  { %v40_v17 = vpop.xlane.xlu1 %39 }
 0x11e   :  { %v44_v18 = vmul.f32 0.03125, %v40_v17 }
 0x120   :  { %v46_v19 = vadd.f32 1e-05, %v44_v18 }
 0x121   :  { %v43_v20 = vpop.xlane.xlu1 %42 }
 0x122   :  { %165 = vrsqrt.f32 %v46_v19  ;;  %v45_v21 = vmul.f32 0.03125, %v43_v20 }
 0x124   :  { %v47_v22 = vadd.f32 1e-05, %v45_v21 }
 0x126   :  { %167 = vrsqrt.f32 %v47_v22 }
 0x12f   :  { %v166_v23 = vpop.eup %165 }
 0x130   :  { %v50_v24 = vmul.f32 %v166_v23, %v34_v6 }
 0x132   :  { %v59_v28 = vmul.f32 %v144_v25, %v50_v24 }
 0x133   :  { %v168_v26 = vpop.eup %167 }
 0x134   :  { %v51_v27 = vmul.f32 %v168_v26, %v35_v10  ;;  %v68_v31 = vadd.f32 %v145_v29, %v59_v28 }
 0x136   :  { %v60_v30 = vmul.f32 %v144_v25, %v51_v27 }
 0x138   :  { %v69_v32 = vadd.f32 %v145_v29, %v60_v30 }
 0x13a   :  { %v70_v33 = vpack.c.bf16 %v69_v32, %v68_v31 }
 0x13c   :  { %158 = vmatmul.mubr.msk.bf16.vlgmr.msra.gmra.mxu0 %vm23_vm0, %v70_v33 }
 0x1fc   :  { %v131_v35 = vpop.f32.mrf.mxu0 }
 0x1fd   :  { %v132_v36 = vadd.f32 %v146_v34, %v131_v35 }
 0x1fe   :  { %v159_v37 = vpop.f32.mrf.mxu0 }
 0x1ff   :  { %138 = vst [vmem:[%s236_s5] sm:$0xff] %v132_v36 }
 0x200   :  { %v134_v38 = vpop.f32.mrf.mxu0 }
 0x201   :  { %v135_v39 = vadd.f32 %v146_v34, %v134_v38 }
 0x202   :  { %v160_v40 = vpop.f32.mrf.mxu0 }
 0x203   :  { %139 = vst [vmem:[%s236_s5 + $0x8] sm:$0xf] %v135_v39 }

// kernel: transformer_model_forward.23
= control target key start
LH: loop header
LB: loop body
LE: loop exit
PB: predicated region body
PF: predicated region fallthrough
CT: control target
= control target key end

     0   :  { %s1369_s24 = smov 0   ;;  %s1371_s25 = smov 0   ;;  %s1543_s0 = inlined_call_operand.vmem [shape: f32[12,32], index: 0, kind: input, shape index: {}]   ;;  %s1544_s1 = inlined_call_operand.vmem [shape: bf16[32,2048], index: 1, kind: input, shape index: {}]   ;;  %s1545_s2 = inlined_call_operand.vmem [shape: f32[1,2048], index: 2, kind: input, shape index: {}]   ;;  %s1546_s3 = inlined_call_operand.vmem [shape: bf16[2048,32], index: 3, kind: input, shape index: {}]   ;;  %s1547_s4 = inlined_call_operand.vmem [shape: f32[1,32], index: 4, kind: input, shape index: {}]   ;;  %s1548_s5 = inlined_call_operand.vmem [shape: f32[1,32], index: 5, kind: input, shape index: {}]   ;;  %s1549_s6 = inlined_call_operand.vmem [shape: f32[1,32], index: 6, kind: input, shape index: {}]   ;;  %s1550_s7 = inlined_call_operand.vmem [shape: f32[12,32], index: 7, kind: output, shape index: {}]  }
   0x1   :  { %s1373_s26 = smov 0   ;;  %s1375_s27 = smov 0  }
   0x2   :  { %s1377_s28 = smov 0  }
   0x3 LB: > { %s26_s29 = sadd.s32 1, %s1321_s27  ;;  %p69_p1 = scmp.ne.s32.totalorder %s1313_s25, %s1309_s24  ;;  %s1325_s28 = sphi %s1377_s28, %s17_s28   ;;  %s1321_s27 = sphi %s1375_s27, %s1554_s27   ;;  %s1317_s26 = sphi %s1373_s26, %s1553_s26   ;;  %s1313_s25 = sphi %s1371_s25, %s1552_s25   ;;  %s1309_s24 = sphi %s1369_s24, %s1551_s24  }
   0x4   : > { %p27_p0 = scmp.ge.s32.totalorder %s26_s29, 4  ;;  %p70_p2 = scmp.eq.s32.totalorder %s1325_s28, 0 }
   0x5   : > { %s62_s8 = sadd.s32 1, %s1313_s25  ;;  %p1092_p5 = scmp.ge.s32.totalorder %s1325_s28, 4 }
   0x6   : > { %s1556_s29 = smov (%p27_p0, %s26_s29), 0  ;;  %p71_p3 = por %p70_p2, %p69_p1 }
   0x7   : > { %s59_s30 = ssub.s32 %s1321_s27, %s1556_s29  ;;  %254 = sbr.rel (%p1092_p5) target bundleno = 20 (0x14), region = 32 }
   0x8   : > { %p60_p4 = scmp.eq.s32.totalorder %s59_s30, 0 }
   0xa   : > { %s1404_s9 = scalar_select %p60_p4, %s1313_s25, %s62_s8  }
   0xc   : > { %257 = sbr.rel (!%p71_p3) target bundleno = 20 (0x14), region = 36  ;;  %s259_s10 = sand.u32 (%p71_p3), 1, %s1313_s25  }
   0xd   : > { %s1152_s11 = sshll.u32 (%p71_p3), %s1321_s27, 4  ;;  %s1093_s12 = sshll.u32 (%p71_p3), %s259_s10, 6 }
   0xe   : > { %s264_s15 = scalar_lea.vmem (%p71_p3), %s1544_s1, %s1152_s11  ;;  %s261_s16 = scalar_lea.vmem (%p71_p3), [#allocation2], %s1093_s12 }
   0xf   : > { %v277_v0 = vld [vmem:[%s264_s15] sm:$0xff] (%p71_p3)  ;;  %v279_v1 = vld [vmem:[%s264_s15 + $0x8] sm:$0xff] (%p71_p3) }
  0x10   : > { %v281_v2 = vld [vmem:[%s264_s15 + $0x40] sm:$0xff] (%p71_p3)  ;;  %278 = vst [vmem:[%s261_s16] sm:$0xff] (%p71_p3), %v277_v0  ;;  %280 = vst [vmem:[%s261_s16 + $0x8] sm:$0xff] (%p71_p3), %v279_v1  ;;  %v283_v3 = vld [vmem:[%s264_s15 + $0x48] sm:$0xff] (%p71_p3) }
  0x11   : > { %282 = vst [vmem:[%s261_s16 + $0x10] sm:$0xff] %v281_v2  ;;  %v285_v4 = vld [vmem:[%s264_s15 + $0x80] sm:$0xff]  ;;  %v287_v5 = vld [vmem:[%s264_s15 + $0x88] sm:$0xff]  ;;  %284 = vst [vmem:[%s261_s16 + $0x18] sm:$0xff] %v283_v3 }
  0x12   : > { %286 = vst [vmem:[%s261_s16 + $0x20] sm:$0xff] %v285_v4  ;;  %288 = vst [vmem:[%s261_s16 + $0x28] sm:$0xff] %v287_v5  ;;  %v289_v6 = vld [vmem:[%s264_s15 + $0xc0] sm:$0xff]  ;;  %v291_v7 = vld [vmem:[%s264_s15 + $0xc8] sm:$0xff] }
  0x13   : > { %290 = vst [vmem:[%s261_s16 + $0x30] sm:$0xff] %v289_v6  ;;  %292 = vst [vmem:[%s261_s16 + $0x38] sm:$0xff] %v291_v7 }
  0x14 PF: > { %p1096_p6 = scmp.ge.s32.totalorder %s1325_s28, 1  ;;  %p314_p7 = scmp.lt.s32.totalorder %s1325_s28, 5 }
  0x16   : > { %p315_p8 = pnand %p1096_p6, %p314_p7 }
  0x17   : > { %s321_s17 = sand.u32 (!%p315_p8), 1, %s1309_s24   ;;  %s1098_s18 = sshll.u32 (!%p315_p8), %s1317_s26, 2 }
  0x18   : > { %318 = sbr.rel (%p315_p8) target bundleno = 781 (0x30d), region = 67  ;;  %s1097_s19 = sshll.u32 (!%p315_p8), %s321_s17, 6 }
  0x19   : > { %p374_p9 = scmp.lt.s32.totalorder (!%p315_p8), %s1098_s18, 15  ;;  %s1099_s20 = sshll.u32 (!%p315_p8), %s1317_s26, 6 }
  0x1a   : > { %p379_p10 = scmp.lt.s32.totalorder (!%p315_p8), %s1099_s20, 255  ;;  %s323_s24 = scalar_lea.vmem (!%p315_p8), [#allocation2], %s1097_s19 }
  0x1b   : > { %p1101_p11 = scmp.ne.s32.totalorder (!%p315_p8), %s1317_s26, 0 }
  0x1d   : > { %s1558_s18 = smov (!%p374_p9, %s1098_s18), 15  ;;  %s1560_s20 = smov (!%p379_p10, %s1099_s20), 255 }
  0x1e   : > { %s376_s23 = scalar_lea.vmem %s1545_s2, %s1558_s18  ;;  %s1100_s30 = sshll.u32 %s1560_s20, 2 }
  0x1f   : > { %s1426_s11 = scalar_lea.vmem %s1546_s3, %s1100_s30  ;;  %394 = sbr.rel (%p1101_p11) target bundleno = 39 (0x27), region = 75 }
  0x24   : > { %vm395_vm0 = vcmask 261120   ;;  %vm397_vm1 = vcmask 257024   ;;  %v1327_v8 = vmov 0.0  }
  0x25   : > { %396 = vst.msk [vmem:[%s1550_s7] sm:$0xff] %vm395_vm0, %v1327_v8 }
  0x26   : > { %398 = vst.msk [vmem:[%s1550_s7 + $0x8] sm:$0xf] %vm397_vm1, %v1327_v8 }
  0x27 PF: > { %v1239_v9 = vld [vmem:[%s323_s24 + $0x24] ss:$16 sps:$4 sm:$0xff]   ;;  %v1241_v10 = vld [vmem:[%s323_s24 + $0x2c] ss:$16 sps:$4 sm:$0xff]   ;;  %v1328_v11 = vmov 0   ;;  %vm472_vm2 = vcmask 261120   ;;  %v412_v53 = vlaneseq }
  0x28   : > { %508 = vmatprep.mubr.bf16.mxu0 %v1328_v11  ;;  %551 = vmatprep.mubr.bf16.mxu1 %v1328_v11  ;;  %v1243_v12 = vld [vmem:[%s323_s24 + $0x20] ss:$16 sps:$4 sm:$0xff]   ;;  %v1244_v13 = vld [vmem:[%s323_s24 + $0x28] ss:$16 sps:$4 sm:$0xff]   ;;  %v1245_v14 = vld [vmem:[%s323_s24 + $0x4] ss:$16 sps:$4 sm:$0xff]  }
  0x29   : > { %488 = vmatprep.subr.bf16.mxu0 %v1239_v9  ;;  %531 = vmatprep.subr.bf16.mxu1 %v1241_v10  ;;  %v1247_v15 = vld [vmem:[%s323_s24 + $0xc] ss:$16 sps:$4 sm:$0xff]   ;;  %v1249_v16 = vld [vmem:[%s323_s24] ss:$16 sps:$4 sm:$0xff]   ;;  %v1250_v17 = vld [vmem:[%s323_s24 + $0x8] ss:$16 sps:$4 sm:$0xff]  }
  0x2a   : > { %489 = vmatpush1.bf16.msra.mxu0 %v1243_v12  ;;  %532 = vmatpush1.bf16.msra.mxu1 %v1244_v13  ;;  %v399_v18 = vld [vmem:[%s1543_s0] sm:$0xff]  ;;  %v400_v19 = vld [vmem:[%s1543_s0 + $0x8] sm:$0xf]  ;;  %v1251_v20 = vld [vmem:[%s1426_s11 + $0x78] sm:$0xff]   ;;  %v413_v54 = vshrl.u32 %v412_v53, 7  ;;  %vm917_vm3 = vcmask 257024  }
  0x2b   : > { %490 = vmatprep.subr.bf16.mxu0 %v1245_v14  ;;  %533 = vmatprep.subr.bf16.mxu1 %v1247_v15  ;;  %v401_v21 = vpack.c.bf16 %v400_v19, %v399_v18  ;;  %v1252_v22 = vld [vmem:[%s1426_s11 + $0xf8] sm:$0xff]   ;;  %v1255_v25 = vld [vmem:[%s1426_s11 + $0x70] sm:$0xff]   ;;  %v1259_v29 = vld [vmem:[%s1426_s11 + $0x68] sm:$0xff]   ;;  %p1144_p12 = scmp.ne.s32.totalorder %s1317_s26, 3 }
  0x2c   : > { %v1253_v23 = vld [vmem:[%s1426_s11 + $0x38] sm:$0xff]   ;;  %v1256_v26 = vld [vmem:[%s1426_s11 + $0xf0] sm:$0xff]   ;;  %v1260_v30 = vld [vmem:[%s1426_s11 + $0xe8] sm:$0xff]   ;;  %v418_v55 = vsub.s32 1, %v413_v54  ;;  %v426_v56 = vsub.s32 3, %v413_v54  ;;  %v414_v57 = vsub.s32 0, %v413_v54 }
  0x2d   : > { %v1254_v24 = vld [vmem:[%s1426_s11 + $0xb8] sm:$0xff]   ;;  %v1257_v27 = vld [vmem:[%s1426_s11 + $0x30] sm:$0xff]   ;;  %v1261_v31 = vld [vmem:[%s1426_s11 + $0x28] sm:$0xff]   ;;  %v422_v58 = vsub.s32 2, %v413_v54 }
  0x2e   : > { %491 = vmatpush1.bf16.msra.mxu0 %v1249_v16  ;;  %534 = vmatpush1.bf16.msra.mxu1 %v1250_v17  ;;  %v1258_v28 = vld [vmem:[%s1426_s11 + $0xb0] sm:$0xff]   ;;  %v1262_v32 = vld [vmem:[%s1426_s11 + $0xa8] sm:$0xff]   ;;  %v1263_v33 = vld [vmem:[%s1426_s11 + $0x60] sm:$0xff]  }
  0x2f   : > { %1153 = vmatprep.subr.bf16.mxu0 %v1251_v20  ;;  %1175 = vmatprep.subr.bf16.mxu1 %v1252_v22  ;;  %v1264_v34 = vld [vmem:[%s1426_s11 + $0xe0] sm:$0xff]   ;;  %v1267_v37 = vld [vmem:[%s1426_s11 + $0x58] sm:$0xff]   ;;  %v1271_v41 = vld [vmem:[%s1426_s11 + $0x50] sm:$0xff]  }
  0x30   : > { %v1265_v35 = vld [vmem:[%s1426_s11 + $0x20] sm:$0xff]   ;;  %v1268_v38 = vld [vmem:[%s1426_s11 + $0xd8] sm:$0xff]   ;;  %v1272_v42 = vld [vmem:[%s1426_s11 + $0xd0] sm:$0xff]  }
  0x31   : > { %1110 = vmatmul.mubr.msk.bf16.vlgmr.msra.gmra.mxu0 %vm472_vm2, %v401_v21  ;;  %1111 = vmatmul.mubr.msk.bf16.vlgmr.msra.gmra.mxu1 %vm472_vm2, %v401_v21  ;;  %v1266_v36 = vld [vmem:[%s1426_s11 + $0xa0] sm:$0xff]   ;;  %v1269_v39 = vld [vmem:[%s1426_s11 + $0x18] sm:$0xff]   ;;  %v1273_v43 = vld [vmem:[%s1426_s11 + $0x10] sm:$0xff]  }
  0x32   : > { %1154 = vmatpush3.bf16.msra.mxu0 %v1253_v23  ;;  %1176 = vmatpush3.bf16.msra.mxu1 %v1254_v24  ;;  %v1270_v40 = vld [vmem:[%s1426_s11 + $0x98] sm:$0xff]   ;;  %v1274_v44 = vld [vmem:[%s1426_s11 + $0x90] sm:$0xff]   ;;  %v1275_v45 = vld [vmem:[%s1426_s11 + $0x48] sm:$0xff]  }
  0x33   : > { %1155 = vmatprep.subr.bf16.mxu0 %v1255_v25  ;;  %1177 = vmatprep.subr.bf16.mxu1 %v1256_v26  ;;  %v1276_v46 = vld [vmem:[%s1426_s11 + $0xc8] sm:$0xff]   ;;  %v1279_v49 = vld [vmem:[%s1426_s11 + $0x40] sm:$0xff]  }
  0x34   : > { %v1277_v47 = vld [vmem:[%s1426_s11 + $0x8] sm:$0xff]   ;;  %v1280_v50 = vld [vmem:[%s1426_s11 + $0xc0] sm:$0xff]  }
  0x35   : > { %v1278_v48 = vld [vmem:[%s1426_s11 + $0x88] sm:$0xff]   ;;  %v1281_v51 = vld [vmem:[%s1426_s11] sm:$0xff]  }
  0x36   : > { %1156 = vmatpush3.bf16.msra.mxu0 %v1257_v27  ;;  %1178 = vmatpush3.bf16.msra.mxu1 %v1258_v28  ;;  %v1282_v52 = vld [vmem:[%s1426_s11 + $0x80] sm:$0xff]  }
  0x37   : > { %1157 = vmatprep.subr.bf16.mxu0 %v1259_v29  ;;  %1179 = vmatprep.subr.bf16.mxu1 %v1260_v30  ;;  %v410_v59 = vld [vmem:[%s376_s23] sm:$0xf] }
  0x38   : > { %v419_v62 = vrot.slane %v410_v59, %v418_v55  ;;  %v427_v63 = vrot.slane %v410_v59, %v426_v56  ;;  %v415_v0 = vrot.slane %v410_v59, %v414_v57  ;;  %v423_v1 = vrot.slane %v410_v59, %v422_v58 }
  0x3a   : > { %1158 = vmatpush3.bf16.msra.mxu0 %v1261_v31  ;;  %1180 = vmatpush3.bf16.msra.mxu1 %v1262_v32 }
  0x3b   : > { %1159 = vmatprep.subr.bf16.mxu0 %v1263_v33  ;;  %1181 = vmatprep.subr.bf16.mxu1 %v1264_v34  ;;  %v570_v34 = vld [vmem:[%s1550_s7] sm:$0xff] }
  0x3e   : > { %1160 = vmatpush3.bf16.msra.mxu0 %v1265_v35  ;;  %1182 = vmatpush3.bf16.msra.mxu1 %v1266_v36 }
  0x3f   : > { %1161 = vmatprep.subr.bf16.mxu0 %v1267_v37  ;;  %1183 = vmatprep.subr.bf16.mxu1 %v1268_v38 }
  0x42   : > { %1162 = vmatpush3.bf16.msra.mxu0 %v1269_v39  ;;  %1184 = vmatpush3.bf16.msra.mxu1 %v1270_v40 }
  0x43   : > { %1163 = vmatprep.subr.bf16.mxu0 %v1271_v41  ;;  %1185 = vmatprep.subr.bf16.mxu1 %v1272_v42 }
  0x46   : > { %1164 = vmatpush3.bf16.msra.mxu0 %v1273_v43  ;;  %1186 = vmatpush3.bf16.msra.mxu1 %v1274_v44  ;;  %v571_v43 = vld [vmem:[%s1550_s7 + $0x8] sm:$0xf] }
  0x47   : > { %1165 = vmatprep.subr.bf16.mxu0 %v1275_v45  ;;  %1187 = vmatprep.subr.bf16.mxu1 %v1276_v46 }
  0x4a   : > { %1166 = vmatpush3.bf16.msra.mxu0 %v1277_v47  ;;  %1188 = vmatpush3.bf16.msra.mxu1 %v1278_v48 }
  0x4b   : > { %1167 = vmatprep.subr.bf16.mxu0 %v1279_v49  ;;  %1189 = vmatprep.subr.bf16.mxu1 %v1280_v50 }
  0x4e   : > { %1168 = vmatpush3.bf16.msra.mxu0 %v1281_v51  ;;  %1190 = vmatpush3.bf16.msra.mxu1 %v1282_v52 }
  0xf1   : > { %v510_v60 = vpop.f32.mrf.mxu0  ;;  %v553_v61 = vpop.f32.mrf.mxu1 }
  0xf2   : > { %v511_v10 = vadd.f32 %v510_v60, %v415_v0  ;;  %v554_v11 = vadd.f32 %v553_v61, %v423_v1 }
  0xf3   : > { %v512_v2 = vpop.f32.mrf.mxu0  ;;  %v555_v3 = vpop.f32.mrf.mxu1 }
  0xf4   : > { %v513_v6 = vadd.f32 %v512_v2, %v419_v62  ;;  %v556_v7 = vadd.f32 %v555_v3, %v427_v63  ;;  %v562_v22 = vmax.f32 %v511_v10, 0.0  ;;  %v564_v23 = vmax.f32 %v554_v11, 0.0 }
  0xf5   : > { %v514_v4 = vpop.f32.mrf.mxu0  ;;  %v557_v5 = vpop.f32.mrf.mxu1 }
  0xf6   : > { %v515_v8 = vadd.f32 %v514_v4, %v415_v0  ;;  %v558_v9 = vadd.f32 %v557_v5, %v423_v1  ;;  %v563_v18 = vmax.f32 %v513_v6, 0.0  ;;  %v565_v19 = vmax.f32 %v556_v7, 0.0 }
  0xf7   : > { %v516_v12 = vpop.f32.mrf.mxu0  ;;  %v559_v13 = vpop.f32.mrf.mxu1 }
  0xf8   : > { %v517_v14 = vadd.f32 %v516_v12, %v419_v62  ;;  %v560_v15 = vadd.f32 %v559_v13, %v427_v63  ;;  %v566_v16 = vmax.f32 %v515_v8, 0.0  ;;  %v568_v17 = vmax.f32 %v558_v9, 0.0 }
  0xfa   : > { %v567_v20 = vmax.f32 %v517_v14, 0.0  ;;  %v569_v21 = vmax.f32 %v560_v15, 0.0  ;;  %v572_v26 = vpack.c.bf16 %v566_v16, %v562_v22  ;;  %v574_v27 = vpack.c.bf16 %v568_v17, %v564_v23 }
  0xfc   : > { %v573_v24 = vpack.c.bf16 %v567_v20, %v563_v18  ;;  %v575_v25 = vpack.c.bf16 %v569_v21, %v565_v19 }
  0xfe   : > { %864 = vmatprep.mubr.bf16.mxu0 %v573_v24  ;;  %905 = vmatprep.mubr.bf16.mxu1 %v575_v25 }
  0xff   : > { %865 = vmatmul.mubr.bf16.vlgmr.msra.gmra.mxu0 %v572_v26  ;;  %906 = vmatmul.mubr.bf16.vlgmr.msra.gmra.mxu1 %v574_v27 }
 0x1bf   : > { %v1169_v28 = vpop.f32.mrf.mxu0  ;;  %v1191_v29 = vpop.f32.mrf.mxu1 }
 0x1c1   : > { %v1170_v30 = vpop.f32.mrf.mxu0  ;;  %v1192_v31 = vpop.f32.mrf.mxu1 }
 0x1c2   : > { %v1171_v32 = vadd.f32 %v1170_v30, %v1169_v28  ;;  %v1193_v33 = vadd.f32 %v1192_v31, %v1191_v29 }
 0x1c3   : > { %v1172_v35 = vpop.f32.mrf.mxu0  ;;  %v1194_v36 = vpop.f32.mrf.mxu1 }
 0x1c4   : > { %v908_v37 = vadd.f32 %v1193_v33, %v1171_v32 }
 0x1c5   : > { %v1173_v38 = vpop.f32.mrf.mxu0  ;;  %v1195_v39 = vpop.f32.mrf.mxu1 }
 0x1c6   : > { %v914_v40 = vadd.f32 %v908_v37, %v570_v34  ;;  %v1174_v41 = vadd.f32 %v1173_v38, %v1172_v35  ;;  %v1196_v42 = vadd.f32 %v1195_v39, %v1194_v36 }
 0x1c8   : > { %916 = vst.msk [vmem:[%s1550_s7] sm:$0xff] %vm472_vm2, %v914_v40  ;;  %v911_v44 = vadd.f32 %v1196_v42, %v1174_v41  ;;  %922 = sbr.rel (%p1144_p12) target bundleno = 781 (0x30d), region = 79 }
 0x1ca   : > { %v915_v45 = vadd.f32 %v911_v44, %v571_v43 }
 0x1cc   : > { %918 = vst.msk [vmem:[%s1550_s7 + $0x8] sm:$0xf] %vm917_vm3, %v915_v45 }
 0x1cd   : > { %v923_v46 = vld [vmem:[%s1543_s0] sm:$0xff]  ;;  %v924_v50 = vld [vmem:[%s1543_s0 + $0x8] sm:$0xf] }
 0x1ce   : > { %v1145_v48 = vld [vmem:[%s1547_s4] ss:$0 sm:$0xff] }
 0x1cf   : > { %v925_v47 = vld [vmem:[%s1550_s7] sm:$0xff] }
 0x1d0   : > { %v927_v49 = vadd.f32 %v925_v47, %v923_v46  ;;  %v1146_v10 = vld [vmem:[%s1548_s5] ss:$0 sm:$0xff] }
 0x1d1   : > { %v1147_v12 = vld [vmem:[%s1549_s6] ss:$0 sm:$0xff] }
 0x1d2   : > { %v936_v53 = vadd.f32 %v1145_v48, %v927_v49 }
 0x1d3   : > { %v926_v51 = vld [vmem:[%s1550_s7 + $0x8] sm:$0xf] }
 0x1d4   : > { %v928_v52 = vadd.f32 %v926_v51, %v924_v50  ;;  %v938_v55 = vsel %vm472_vm2, %v936_v53, 0.0 }
 0x1d5   : > { %939 = vadd.xlane.f32.xlu0 %v938_v55 }
 0x1d6   : > { %v937_v54 = vadd.f32 %v1145_v48, %v928_v52 }
 0x1d8   : > { %v941_v56 = vsel %vm917_vm3, %v937_v54, 0.0 }
 0x1d9   : > { %942 = vadd.xlane.f32.xlu0 %v941_v56 }
 0x25e   : > { %v940_v57 = vpop.xlane.xlu0 %939 }
 0x25f   : > { %v945_v58 = vmul.f32 0.03125, %v940_v57 }
 0x261   : > { %v947_v59 = vsub.f32 %v936_v53, %v945_v58 }
 0x262   : > { %v943_v60 = vpop.xlane.xlu0 %942 }
 0x263   : > { %v946_v61 = vmul.f32 0.03125, %v943_v60  ;;  %v949_v62 = vmul.f32 %v947_v59, %v947_v59 }
 0x265   : > { %v948_v63 = vsub.f32 %v937_v54, %v946_v61  ;;  %v951_v0 = vsel %vm472_vm2, %v949_v62, 0.0 }
 0x266   : > { %952 = vadd.xlane.f32.xlu1 %v951_v0 }
 0x267   : > { %v950_v1 = vmul.f32 %v948_v63, %v948_v63 }
 0x269   : > { %v954_v2 = vsel %vm917_vm3, %v950_v1, 0.0 }
 0x26a   : > { %955 = vadd.xlane.f32.xlu1 %v954_v2 }
 0x2ef   : > { %v953_v3 = vpop.xlane.xlu1 %952 }
 0x2f0   : > { %v957_v4 = vmul.f32 0.03125, %v953_v3 }
 0x2f2   : > { %v959_v5 = vadd.f32 1e-05, %v957_v4 }
 0x2f3   : > { %v956_v6 = vpop.xlane.xlu1 %955 }
 0x2f4   : > { %1283 = vrsqrt.f32 %v959_v5  ;;  %v958_v7 = vmul.f32 0.03125, %v956_v6 }
 0x2f6   : > { %v960_v8 = vadd.f32 1e-05, %v958_v7 }
 0x2f8   : > { %1285 = vrsqrt.f32 %v960_v8 }
 0x301   : > { %v1284_v9 = vpop.eup %1283 }
 0x302   : > { %v963_v11 = vmul.f32 %v1284_v9, %v947_v59 }
 0x304   : > { %v972_v13 = vmul.f32 %v1146_v10, %v963_v11 }
 0x305   : > { %v1286_v14 = vpop.eup %1285 }
 0x306   : > { %v981_v15 = vadd.f32 %v1147_v12, %v972_v13  ;;  %v964_v16 = vmul.f32 %v1286_v14, %v948_v63 }
 0x308   : > { %983 = vst.msk [vmem:[%s1550_s7] sm:$0xff] %vm472_vm2, %v981_v15  ;;  %v973_v17 = vmul.f32 %v1146_v10, %v964_v16 }
 0x30a   : > { %v982_v18 = vadd.f32 %v1147_v12, %v973_v17 }
 0x30c   : > { %984 = vst.msk [vmem:[%s1550_s7 + $0x8] sm:$0xf] %vm917_vm3, %v982_v18 }
 0x30d PF: > { %s17_s28 = sadd.s32 1, %s1325_s28   ;;  %s1551_s24 = smov %s1313_s25 }
 0x30e   : > { %p14_p13 = scmp.ge.s32.totalorder %s17_s28, 6   ;;  %s1552_s25 = smov %s1404_s9 }
 0x30f   : > { %s1553_s26 = smov %s1321_s27  ;;  %s1554_s27 = smov %s1556_s29 }
 0x310   :  { %16 = sbr.rel (!%p14_p13) target bundleno = 3 (0x3), region = 123 }

</bundles_post_ra>
